<compile_context>
chip_gen: v6e
topology: v6e:2x2x1
jax: 0.10.0
libtpu: 0.0.40
codegen_flags: <defaults>
</compile_context>

<pallas_src>
import jax
import jax.numpy as jnp
from jax.experimental import pallas as pl
from jax.experimental.pallas import tpu as pltpu

# ---- scaled-down model dims (real convnext_large: C=192 at stage 0) ----
PATCH = 4            # stem patch / stride
C_IN = 3             # RGB
C = 128              # stage width  (lane-dense: full 128-lane vregs)
HID = 4 * C          # ConvNeXt MLP expansion (512 -> full 256-wide MXU tiles on v6e/v7x)
FEAT = 1000          # backbone head width (folded away via head+classifier fusion)
NUM_CLASSES = 3
EPS = 1e-6
K_STEM = PATCH * PATCH * C_IN   # 48


# --------------------------------------------------------------------------
# Kernel 1: stem — patchify matmul (4x4/4 conv as GEMM) + LayerNorm over C
#   gridded over token tiles (TM rows per step), weights as full-extent blocks.
# --------------------------------------------------------------------------
def stem_kernel(p_ref, w_ref, b_ref, g_ref, be_ref, o_ref):
    y = jnp.dot(p_ref[...].astype(jnp.bfloat16), w_ref[...],
                preferred_element_type=jnp.float32) + b_ref[...]
    mu = jnp.mean(y, axis=-1, keepdims=True)
    var = jnp.mean((y - mu) ** 2, axis=-1, keepdims=True)
    o_ref[...] = (y - mu) * jax.lax.rsqrt(var + EPS) * g_ref[...] + be_ref[...]


# --------------------------------------------------------------------------
# Kernel 2 (fused ConvNeXt block), grid over batch:
#   depthwise 7x7 conv (pad=3) -> LayerNorm -> Linear(C,4C) -> GELU ->
#   Linear(4C,C) -> layer-scale -> residual add
#   xpad_ref: (1, H+6, W+6, C)   res_ref/o_ref: (1, H, W, C)
# --------------------------------------------------------------------------
def block_kernel(xpad_ref, res_ref, dww_ref, dwb_ref, g_ref, be_ref,
                 w1_ref, b1_ref, w2_ref, b2_ref, ls_ref, o_ref):
    H, W = o_ref.shape[1], o_ref.shape[2]
    HW = H * W

    # depthwise 7x7: weight loaded ONCE, bias folded into accumulator init.
    w = dww_ref[...]                                           # (7, 7, C), hoisted
    acc = jnp.zeros(o_ref.shape, jnp.float32) + dwb_ref[...]   # bias init
    for i in range(7):                                         # static taps -> unrolled VPU MACs
        for j in range(7):
            acc = acc + xpad_ref[:, i:i + H, j:j + W, :] * w[i, j]

    # flatten spatial to tokens (lane dim C unchanged -> trivial relayout)
    x = acc.reshape(HW, C)
    res = res_ref[...].reshape(HW, C)

    # LayerNorm (f32 on VPU)
    mu = jnp.mean(x, axis=-1, keepdims=True)
    var = jnp.mean((x - mu) ** 2, axis=-1, keepdims=True)
    xn = (x - mu) * jax.lax.rsqrt(var + EPS) * g_ref[...] + be_ref[...]

    # MLP: bf16 operands on the MXU, f32 accumulate
    h = jnp.dot(xn.astype(jnp.bfloat16), w1_ref[...],
                preferred_element_type=jnp.float32) + b1_ref[...]
    # TODO(synk): PyTorch nn.GELU default is exact erf; tanh approximation used here.
    h = jax.nn.gelu(h, approximate=True)
    h = jnp.dot(h.astype(jnp.bfloat16), w2_ref[...],
                preferred_element_type=jnp.float32) + b2_ref[...]

    y = res + ls_ref[...] * h
    o_ref[...] = y.reshape(o_ref.shape)


# --------------------------------------------------------------------------
# Kernel 3: global avg pool + LayerNorm + fused (head @ classifier) Linear(C -> 3)
#   x_ref: (B, HW, C)   w_ref: (C, NUM_CLASSES) = head_w @ cls_w (precomputed)
# --------------------------------------------------------------------------
def head_kernel(x_ref, g_ref, be_ref, w_ref, b_ref, o_ref):
    pooled = jnp.mean(x_ref[...], axis=1)                     # (B, C) global avg pool
    mu = jnp.mean(pooled, axis=-1, keepdims=True)
    var = jnp.mean((pooled - mu) ** 2, axis=-1, keepdims=True)
    pn = (pooled - mu) * jax.lax.rsqrt(var + EPS) * g_ref[...] + be_ref[...]
    o_ref[...] = jnp.dot(pn, w_ref[...], preferred_element_type=jnp.float32) + b_ref[...]


# --------------------------------------------------------------------------
# Wrapper (glue in plain JAX: layout conversion, patchify, padding, reshapes,
# offline head+classifier weight fusion)
# --------------------------------------------------------------------------
def base_model_forward(x_nchw, p):
    B = x_nchw.shape[0]
    x = jnp.transpose(x_nchw, (0, 2, 3, 1)).astype(jnp.float32)     # NCHW -> NHWC
    _, H, W, Cin = x.shape
    Hp, Wp = H // PATCH, W // PATCH
    HW = Hp * Wp
    n_tok = B * HW

    # stem patchify: non-overlapping 4x4 patches -> (n_tok, PATCH*PATCH*Cin)
    patches = (x.reshape(B, Hp, PATCH, Wp, PATCH, Cin)
                 .transpose(0, 1, 3, 2, 4, 5)
                 .reshape(n_tok, K_STEM))

    # token-tile size: multiple of 8, sized conservatively vs v7x's 64 MiB VMEM
    # (double-buffered (tm, K_STEM) + (tm, C) f32 tiles stay well under budget).
    tm = 64 if n_tok < 256 else 256
    n_pad = pl.cdiv(n_tok, tm) * tm
    if n_pad != n_tok:
        patches = jnp.pad(patches, ((0, n_pad - n_tok), (0, 0)))

    stem_cost = pl.CostEstimate(
        flops=2 * n_pad * K_STEM * C,
        transcendentals=n_pad,
        bytes_accessed=n_pad * K_STEM * 4 + K_STEM * C * 2 + 3 * C * 4 + n_pad * C * 4)

    tokens = pl.pallas_call(
        stem_kernel,
        out_shape=jax.ShapeDtypeStruct((n_pad, C), jnp.float32),
        grid=(n_pad // tm,),
        in_specs=[
            pl.BlockSpec((tm, K_STEM), lambda i: (i, 0)),
            pl.BlockSpec((K_STEM, C), lambda i: (0, 0)),
            pl.BlockSpec((1, C), lambda i: (0, 0)),
            pl.BlockSpec((1, C), lambda i: (0, 0)),
            pl.BlockSpec((1, C), lambda i: (0, 0)),
        ],
        out_specs=pl.BlockSpec((tm, C), lambda i: (i, 0)),
        compiler_params=pltpu.CompilerParams(dimension_semantics=("parallel",)),
        cost_estimate=stem_cost,
    )(patches, p["stem_w"], p["stem_b"], p["stem_g"], p["stem_be"])[:n_tok]

    # fused ConvNeXt block: dwconv 7x7 + LN + MLP + layer-scale + residual, grid over batch
    feat = tokens.reshape(B, Hp, Wp, C)
    feat_pad = jnp.pad(feat, ((0, 0), (3, 3), (3, 3), (0, 0)))

    block_cost = pl.CostEstimate(
        flops=B * (2 * HW * C * 49 + 4 * HW * C * HID),
        transcendentals=B * HW * HID,
        bytes_accessed=(B * ((Hp + 6) * (Wp + 6) * C + 2 * HW * C) * 4
                        + 2 * C * HID * 2 + (49 + 4 * C + HID) * 4))

    blk = pl.pallas_call(
        block_kernel,
        out_shape=jax.ShapeDtypeStruct((B, Hp, Wp, C), jnp.float32),
        grid=(B,),
        in_specs=[
            pl.BlockSpec((1, Hp + 6, Wp + 6, C), lambda b: (b, 0, 0, 0)),
            pl.BlockSpec((1, Hp, Wp, C), lambda b: (b, 0, 0, 0)),
            pl.BlockSpec((7, 7, C), lambda b: (0, 0, 0)),
            pl.BlockSpec((1, C), lambda b: (0, 0)),
            pl.BlockSpec((1, C), lambda b: (0, 0)),
            pl.BlockSpec((1, C), lambda b: (0, 0)),
            pl.BlockSpec((C, HID), lambda b: (0, 0)),
            pl.BlockSpec((1, HID), lambda b: (0, 0)),
            pl.BlockSpec((HID, C), lambda b: (0, 0)),
            pl.BlockSpec((1, C), lambda b: (0, 0)),
            pl.BlockSpec((1, C), lambda b: (0, 0)),
        ],
        out_specs=pl.BlockSpec((1, Hp, Wp, C), lambda b: (b, 0, 0, 0)),
        compiler_params=pltpu.CompilerParams(dimension_semantics=("parallel",)),
        cost_estimate=block_cost,
    )(feat_pad, feat, p["dw_w"], p["dw_b"], p["ln_g"], p["ln_be"],
      p["pw1_w"], p["pw1_b"], p["pw2_w"], p["pw2_b"], p["ls"])

    # fold head (C->1000) and classifier (1000->3) into one affine map (exact).
    fused_w = jnp.dot(p["head_w"], p["cls_w"])                        # (C, NUM_CLASSES)
    fused_b = jnp.dot(p["head_b"], p["cls_w"]) + p["cls_b"]           # (1, NUM_CLASSES)

    x3 = blk.reshape(B, HW, C)
    logits = pl.pallas_call(
        head_kernel,
        out_shape=jax.ShapeDtypeStruct((B, NUM_CLASSES), jnp.float32),
    )(x3, p["final_g"], p["final_be"], fused_w, fused_b)
    return logits


def init_params(key):
    ks = jax.random.split(key, 6)
    s = 0.02
    f32, bf16 = jnp.float32, jnp.bfloat16
    return {
        # MXU weights stored bf16 (halves weight DMA); everything else f32
        "stem_w": (jax.random.normal(ks[0], (K_STEM, C), f32) * s).astype(bf16),
        "stem_b": jnp.zeros((1, C), f32),
        "stem_g": jnp.ones((1, C), f32),
        "stem_be": jnp.zeros((1, C), f32),
        "dw_w": jax.random.normal(ks[1], (7, 7, C), f32) * s,
        "dw_b": jnp.zeros((1, C), f32),
        "ln_g": jnp.ones((1, C), f32),
        "ln_be": jnp.zeros((1, C), f32),
        "pw1_w": (jax.random.normal(ks[2], (C, HID), f32) * s).astype(bf16),
        "pw1_b": jnp.zeros((1, HID), f32),
        "pw2_w": (jax.random.normal(ks[3], (HID, C), f32) * s).astype(bf16),
        "pw2_b": jnp.zeros((1, C), f32),
        "ls": jnp.full((1, C), 1e-6, f32),            # ConvNeXt layer-scale init
        "final_g": jnp.ones((1, C), f32),
        "final_be": jnp.zeros((1, C), f32),
        "head_w": jax.random.normal(ks[4], (C, FEAT), f32) * s,
        "head_b": jnp.zeros((1, FEAT), f32),
        "cls_w": jax.random.normal(ks[5], (FEAT, NUM_CLASSES), f32) * s,
        "cls_b": jnp.zeros((1, NUM_CLASSES), f32),
    }


if __name__ == "__main__":
    key = jax.random.PRNGKey(0)
    k_x, k_p = jax.random.split(key)
    x = jax.random.normal(k_x, (2, C_IN, 32, 32), jnp.float32)   # NCHW, like PyTorch
    params = init_params(k_p)

    fwd = jax.jit(base_model_forward)
    logits = fwd(x, params)
    jax.block_until_ready(logits)
    assert logits.shape == (2, NUM_CLASSES)
    assert bool(jnp.all(jnp.isfinite(logits)))
    print("KERNEL_OK")
</pallas_src>

<mosaic_0001>
module attributes {stable_mosaic.version = 11 : i64} {
  func.func @stem_kernel(%arg0: i32, %arg1: memref<64x48xf32, #tpu.memory_space<vmem>>, %arg2: memref<48x128xbf16, #tpu.memory_space<vmem>>, %arg3: memref<1x128xf32, #tpu.memory_space<vmem>>, %arg4: memref<1x128xf32, #tpu.memory_space<vmem>>, %arg5: memref<1x128xf32, #tpu.memory_space<vmem>>, %arg6: memref<64x128xf32, #tpu.memory_space<vmem>>) attributes {dimension_semantics = [#tpu.dimension_semantics<parallel>], iteration_bounds = array<i64: 2>, scalar_prefetch = 0 : i64, scratch_operands = 0 : i64, tpu.core_type = #tpu.core_type<tc>, window_params = [{transform_indices = @transform_0, window_bounds = array<i64: 64, 48>}, {pipeline_mode = #tpu.pipeline_mode<synchronous>, transform_indices = @transform_1, window_bounds = array<i64: 48, 128>}, {pipeline_mode = #tpu.pipeline_mode<synchronous>, transform_indices = @transform_2, window_bounds = array<i64: 1, 128>}, {pipeline_mode = #tpu.pipeline_mode<synchronous>, transform_indices = @transform_3, window_bounds = array<i64: 1, 128>}, {pipeline_mode = #tpu.pipeline_mode<synchronous>, transform_indices = @transform_4, window_bounds = array<i64: 1, 128>}, {transform_indices = @transform_5, window_bounds = array<i64: 64, 128>}]} {
    %c0 = arith.constant 0 : index
    %c0_0 = arith.constant 0 : index
    %0 = vector.load %arg1[%c0, %c0_0] : memref<64x48xf32, #tpu.memory_space<vmem>>, vector<64x48xf32>
    %1 = arith.truncf %0 : vector<64x48xf32> to vector<64x48xbf16>
    %c0_1 = arith.constant 0 : index
    %c0_2 = arith.constant 0 : index
    %2 = vector.load %arg2[%c0_1, %c0_2] : memref<48x128xbf16, #tpu.memory_space<vmem>>, vector<48x128xbf16>
    %cst = arith.constant dense<0.000000e+00> : vector<64x128xf32>
    %3 = tpu.matmul %1, %2, %cst {dimension_numbers = #tpu.dot_dimension_numbers<[1], [0], [0], [1], [0, 0, 1, 1], [], []>} : vector<64x48xbf16>, vector<48x128xbf16>, vector<64x128xf32> -> vector<64x128xf32>
    %c0_3 = arith.constant 0 : index
    %c0_4 = arith.constant 0 : index
    %4 = vector.load %arg3[%c0_3, %c0_4] : memref<1x128xf32, #tpu.memory_space<vmem>>, vector<1x128xf32>
    %5 = vector.broadcast %4 : vector<1x128xf32> to vector<64x128xf32>
    %6 = arith.addf %3, %5 : vector<64x128xf32>
    %cst_5 = arith.constant dense<0.000000e+00> : vector<64xf32>
    %7 = vector.multi_reduction <add>, %6, %cst_5 [1] : vector<64x128xf32> to vector<64xf32>
    %8 = vector.shape_cast %7 : vector<64xf32> to vector<64x1xf32>
    %cst_6 = arith.constant 1.280000e+02 : f32
    %9 = vector.broadcast %cst_6 : f32 to vector<64x1xf32>
    %10 = arith.divf %8, %9 : vector<64x1xf32>
    %11 = vector.broadcast %10 : vector<64x1xf32> to vector<64x128xf32>
    %12 = arith.subf %6, %11 : vector<64x128xf32>
    %13 = arith.mulf %12, %12 : vector<64x128xf32>
    %cst_7 = arith.constant dense<0.000000e+00> : vector<64xf32>
    %14 = vector.multi_reduction <add>, %13, %cst_7 [1] : vector<64x128xf32> to vector<64xf32>
    %15 = vector.shape_cast %14 : vector<64xf32> to vector<64x1xf32>
    %cst_8 = arith.constant 1.280000e+02 : f32
    %16 = vector.broadcast %cst_8 : f32 to vector<64x1xf32>
    %17 = arith.divf %15, %16 : vector<64x1xf32>
    %18 = vector.broadcast %10 : vector<64x1xf32> to vector<64x128xf32>
    %19 = arith.subf %6, %18 : vector<64x128xf32>
    %cst_9 = arith.constant 9.99999997E-7 : f32
    %20 = vector.broadcast %cst_9 : f32 to vector<64x1xf32>
    %21 = arith.addf %17, %20 : vector<64x1xf32>
    %22 = math.rsqrt %21 : vector<64x1xf32>
    %23 = vector.broadcast %22 : vector<64x1xf32> to vector<64x128xf32>
    %24 = arith.mulf %19, %23 : vector<64x128xf32>
    %c0_10 = arith.constant 0 : index
    %c0_11 = arith.constant 0 : index
    %25 = vector.load %arg4[%c0_10, %c0_11] : memref<1x128xf32, #tpu.memory_space<vmem>>, vector<1x128xf32>
    %26 = vector.broadcast %25 : vector<1x128xf32> to vector<64x128xf32>
    %27 = arith.mulf %24, %26 : vector<64x128xf32>
    %c0_12 = arith.constant 0 : index
    %c0_13 = arith.constant 0 : index
    %28 = vector.load %arg5[%c0_12, %c0_13] : memref<1x128xf32, #tpu.memory_space<vmem>>, vector<1x128xf32>
    %29 = vector.broadcast %28 : vector<1x128xf32> to vector<64x128xf32>
    %30 = arith.addf %27, %29 : vector<64x128xf32>
    %c0_14 = arith.constant 0 : index
    %c0_15 = arith.constant 0 : index
    %31 = vector.load %arg6[%c0_14, %c0_15] : memref<64x128xf32, #tpu.memory_space<vmem>>, vector<64x128xf32>
    tpu.vector_store %arg6[%c0_14, %c0_15], %30 {strides = array<i32>} : memref<64x128xf32, #tpu.memory_space<vmem>>, vector<64x128xf32>,
    return
  }
  func.func @transform_0(%arg0: i32) -> (i32, i32) {
    %c0_i32 = arith.constant 0 : i32
    %c0_i32_0 = arith.constant 0 : i32
    return %arg0, %c0_i32 : i32, i32
  }
  func.func @transform_1(%arg0: i32) -> (i32, i32) {
    %c0_i32 = arith.constant 0 : i32
    %c0_i32_0 = arith.constant 0 : i32
    %c0_i32_1 = arith.constant 0 : i32
    return %c0_i32, %c0_i32_0 : i32, i32
  }
  func.func @transform_2(%arg0: i32) -> (i32, i32) {
    %c0_i32 = arith.constant 0 : i32
    %c0_i32_0 = arith.constant 0 : i32
    %c0_i32_1 = arith.constant 0 : i32
    return %c0_i32, %c0_i32_0 : i32, i32
  }
  func.func @transform_3(%arg0: i32) -> (i32, i32) {
    %c0_i32 = arith.constant 0 : i32
    %c0_i32_0 = arith.constant 0 : i32
    %c0_i32_1 = arith.constant 0 : i32
    return %c0_i32, %c0_i32_0 : i32, i32
  }
  func.func @transform_4(%arg0: i32) -> (i32, i32) {
    %c0_i32 = arith.constant 0 : i32
    %c0_i32_0 = arith.constant 0 : i32
    %c0_i32_1 = arith.constant 0 : i32
    return %c0_i32, %c0_i32_0 : i32, i32
  }
  func.func @transform_5(%arg0: i32) -> (i32, i32) {
    %c0_i32 = arith.constant 0 : i32
    %c0_i32_0 = arith.constant 0 : i32
    return %arg0, %c0_i32 : i32, i32
  }
}

module attributes {stable_mosaic.version = 11 : i64} {
  func.func @block_kernel(%arg0: i32, %arg1: memref<1x14x14x128xf32, #tpu.memory_space<vmem>>, %arg2: memref<1x8x8x128xf32, #tpu.memory_space<vmem>>, %arg3: memref<7x7x128xf32, #tpu.memory_space<vmem>>, %arg4: memref<1x128xf32, #tpu.memory_space<vmem>>, %arg5: memref<1x128xf32, #tpu.memory_space<vmem>>, %arg6: memref<1x128xf32, #tpu.memory_space<vmem>>, %arg7: memref<128x512xbf16, #tpu.memory_space<vmem>>, %arg8: memref<1x512xf32, #tpu.memory_space<vmem>>, %arg9: memref<512x128xbf16, #tpu.memory_space<vmem>>, %arg10: memref<1x128xf32, #tpu.memory_space<vmem>>, %arg11: memref<1x128xf32, #tpu.memory_space<vmem>>, %arg12: memref<1x8x8x128xf32, #tpu.memory_space<vmem>>) attributes {dimension_semantics = [#tpu.dimension_semantics<parallel>], iteration_bounds = array<i64: 2>, scalar_prefetch = 0 : i64, scratch_operands = 0 : i64, tpu.core_type = #tpu.core_type<tc>, window_params = [{transform_indices = @transform_0, window_bounds = array<i64: 1, 14, 14, 128>}, {transform_indices = @transform_1, window_bounds = array<i64: 1, 8, 8, 128>}, {pipeline_mode = #tpu.pipeline_mode<synchronous>, transform_indices = @transform_2, window_bounds = array<i64: 7, 7, 128>}, {pipeline_mode = #tpu.pipeline_mode<synchronous>, transform_indices = @transform_3, window_bounds = array<i64: 1, 128>}, {pipeline_mode = #tpu.pipeline_mode<synchronous>, transform_indices = @transform_4, window_bounds = array<i64: 1, 128>}, {pipeline_mode = #tpu.pipeline_mode<synchronous>, transform_indices = @transform_5, window_bounds = array<i64: 1, 128>}, {pipeline_mode = #tpu.pipeline_mode<synchronous>, transform_indices = @transform_6, window_bounds = array<i64: 128, 512>}, {pipeline_mode = #tpu.pipeline_mode<synchronous>, transform_indices = @transform_7, window_bounds = array<i64: 1, 512>}, {pipeline_mode = #tpu.pipeline_mode<synchronous>, transform_indices = @transform_8, window_bounds = array<i64: 512, 128>}, {pipeline_mode = #tpu.pipeline_mode<synchronous>, transform_indices = @transform_9, window_bounds = array<i64: 1, 128>}, {pipeline_mode = #tpu.pipeline_mode<synchronous>, transform_indices = @transform_10, window_bounds = array<i64: 1, 128>}, {transform_indices = @transform_11, window_bounds = array<i64: 1, 8, 8, 128>}]} {
    %c0 = arith.constant 0 : index
    %c0_0 = arith.constant 0 : index
    %c0_1 = arith.constant 0 : index
    %0 = vector.load %arg3[%c0, %c0_0, %c0_1] : memref<7x7x128xf32, #tpu.memory_space<vmem>>, vector<7x7x128xf32>
    %cst = arith.constant 0.000000e+00 : f32
    %1 = vector.broadcast %cst : f32 to vector<1x8x8x128xf32>
    %c0_2 = arith.constant 0 : index
    %c0_3 = arith.constant 0 : index
    %2 = vector.load %arg4[%c0_2, %c0_3] : memref<1x128xf32, #tpu.memory_space<vmem>>, vector<1x128xf32>
    %3 = vector.shape_cast %2 : vector<1x128xf32> to vector<1x1x1x128xf32>
    %4 = vector.broadcast %3 : vector<1x1x1x128xf32> to vector<1x8x8x128xf32>
    %5 = arith.addf %1, %4 : vector<1x8x8x128xf32>
    %c0_4 = arith.constant 0 : index
    %c0_5 = arith.constant 0 : index
    %c0_6 = arith.constant 0 : index
    %c0_7 = arith.constant 0 : index
    %6 = vector.load %arg1[%c0_4, %c0_5, %c0_6, %c0_7] : memref<1x14x14x128xf32, #tpu.memory_space<vmem>>, vector<1x8x8x128xf32>
    %7 = vector.extract_strided_slice %0 {offsets = [0, 0, 0], sizes = [1, 1, 128], strides = [1, 1, 1]} : vector<7x7x128xf32> to vector<1x1x128xf32>
    %8 = vector.shape_cast %7 : vector<1x1x128xf32> to vector<128xf32>
    %9 = vector.shape_cast %8 : vector<128xf32> to vector<1x1x1x128xf32>
    %10 = vector.broadcast %9 : vector<1x1x1x128xf32> to vector<1x8x8x128xf32>
    %11 = arith.mulf %6, %10 : vector<1x8x8x128xf32>
    %12 = arith.addf %5, %11 : vector<1x8x8x128xf32>
    %c0_8 = arith.constant 0 : index
    %c0_9 = arith.constant 0 : index
    %c1 = arith.constant 1 : index
    %c0_10 = arith.constant 0 : index
    %13 = vector.load %arg1[%c0_8, %c0_9, %c1, %c0_10] : memref<1x14x14x128xf32, #tpu.memory_space<vmem>>, vector<1x8x8x128xf32>
    %14 = vector.extract_strided_slice %0 {offsets = [0, 1, 0], sizes = [1, 1, 128], strides = [1, 1, 1]} : vector<7x7x128xf32> to vector<1x1x128xf32>
    %15 = vector.shape_cast %14 : vector<1x1x128xf32> to vector<128xf32>
    %16 = vector.shape_cast %15 : vector<128xf32> to vector<1x1x1x128xf32>
    %17 = vector.broadcast %16 : vector<1x1x1x128xf32> to vector<1x8x8x128xf32>
    %18 = arith.mulf %13, %17 : vector<1x8x8x128xf32>
    %19 = arith.addf %12, %18 : vector<1x8x8x128xf32>
    %c0_11 = arith.constant 0 : index
    %c0_12 = arith.constant 0 : index
    %c2 = arith.constant 2 : index
    %c0_13 = arith.constant 0 : index
    %20 = vector.load %arg1[%c0_11, %c0_12, %c2, %c0_13] : memref<1x14x14x128xf32, #tpu.memory_space<vmem>>, vector<1x8x8x128xf32>
    %21 = vector.extract_strided_slice %0 {offsets = [0, 2, 0], sizes = [1, 1, 128], strides = [1, 1, 1]} : vector<7x7x128xf32> to vector<1x1x128xf32>
    %22 = vector.shape_cast %21 : vector<1x1x128xf32> to vector<128xf32>
    %23 = vector.shape_cast %22 : vector<128xf32> to vector<1x1x1x128xf32>
    %24 = vector.broadcast %23 : vector<1x1x1x128xf32> to vector<1x8x8x128xf32>
    %25 = arith.mulf %20, %24 : vector<1x8x8x128xf32>
    %26 = arith.addf %19, %25 : vector<1x8x8x128xf32>
    %c0_14 = arith.constant 0 : index
    %c0_15 = arith.constant 0 : index
    %c3 = arith.constant 3 : index
    %c0_16 = arith.constant 0 : index
    %27 = vector.load %arg1[%c0_14, %c0_15, %c3, %c0_16] : memref<1x14x14x128xf32, #tpu.memory_space<vmem>>, vector<1x8x8x128xf32>
    %28 = vector.extract_strided_slice %0 {offsets = [0, 3, 0], sizes = [1, 1, 128], strides = [1, 1, 1]} : vector<7x7x128xf32> to vector<1x1x128xf32>
    %29 = vector.shape_cast %28 : vector<1x1x128xf32> to vector<128xf32>
    %30 = vector.shape_cast %29 : vector<128xf32> to vector<1x1x1x128xf32>
    %31 = vector.broadcast %30 : vector<1x1x1x128xf32> to vector<1x8x8x128xf32>
    %32 = arith.mulf %27, %31 : vector<1x8x8x128xf32>
    %33 = arith.addf %26, %32 : vector<1x8x8x128xf32>
    %c0_17 = arith.constant 0 : index
    %c0_18 = arith.constant 0 : index
    %c4 = arith.constant 4 : index
    %c0_19 = arith.constant 0 : index
    %34 = vector.load %arg1[%c0_17, %c0_18, %c4, %c0_19] : memref<1x14x14x128xf32, #tpu.memory_space<vmem>>, vector<1x8x8x128xf32>
    %35 = vector.extract_strided_slice %0 {offsets = [0, 4, 0], sizes = [1, 1, 128], strides = [1, 1, 1]} : vector<7x7x128xf32> to vector<1x1x128xf32>
    %36 = vector.shape_cast %35 : vector<1x1x128xf32> to vector<128xf32>
    %37 = vector.shape_cast %36 : vector<128xf32> to vector<1x1x1x128xf32>
    %38 = vector.broadcast %37 : vector<1x1x1x128xf32> to vector<1x8x8x128xf32>
    %39 = arith.mulf %34, %38 : vector<1x8x8x128xf32>
    %40 = arith.addf %33, %39 : vector<1x8x8x128xf32>
    %c0_20 = arith.constant 0 : index
    %c0_21 = arith.constant 0 : index
    %c5 = arith.constant 5 : index
    %c0_22 = arith.constant 0 : index
    %41 = vector.load %arg1[%c0_20, %c0_21, %c5, %c0_22] : memref<1x14x14x128xf32, #tpu.memory_space<vmem>>, vector<1x8x8x128xf32>
    %42 = vector.extract_strided_slice %0 {offsets = [0, 5, 0], sizes = [1, 1, 128], strides = [1, 1, 1]} : vector<7x7x128xf32> to vector<1x1x128xf32>
    %43 = vector.shape_cast %42 : vector<1x1x128xf32> to vector<128xf32>
    %44 = vector.shape_cast %43 : vector<128xf32> to vector<1x1x1x128xf32>
    %45 = vector.broadcast %44 : vector<1x1x1x128xf32> to vector<1x8x8x128xf32>
    %46 = arith.mulf %41, %45 : vector<1x8x8x128xf32>
    %47 = arith.addf %40, %46 : vector<1x8x8x128xf32>
    %c0_23 = arith.constant 0 : index
    %c0_24 = arith.constant 0 : index
    %c6 = arith.constant 6 : index
    %c0_25 = arith.constant 0 : index
    %48 = vector.load %arg1[%c0_23, %c0_24, %c6, %c0_25] : memref<1x14x14x128xf32, #tpu.memory_space<vmem>>, vector<1x8x8x128xf32>
    %49 = vector.extract_strided_slice %0 {offsets = [0, 6, 0], sizes = [1, 1, 128], strides = [1, 1, 1]} : vector<7x7x128xf32> to vector<1x1x128xf32>
    %50 = vector.shape_cast %49 : vector<1x1x128xf32> to vector<128xf32>
    %51 = vector.shape_cast %50 : vector<128xf32> to vector<1x1x1x128xf32>
    %52 = vector.broadcast %51 : vector<1x1x1x128xf32> to vector<1x8x8x128xf32>
    %53 = arith.mulf %48, %52 : vector<1x8x8x128xf32>
    %54 = arith.addf %47, %53 : vector<1x8x8x128xf32>
    %c0_26 = arith.constant 0 : index
    %c1_27 = arith.constant 1 : index
    %c0_28 = arith.constant 0 : index
    %c0_29 = arith.constant 0 : index
    %55 = vector.load %arg1[%c0_26, %c1_27, %c0_28, %c0_29] : memref<1x14x14x128xf32, #tpu.memory_space<vmem>>, vector<1x8x8x128xf32>
    %56 = vector.extract_strided_slice %0 {offsets = [1, 0, 0], sizes = [1, 1, 128], strides = [1, 1, 1]} : vector<7x7x128xf32> to vector<1x1x128xf32>
    %57 = vector.shape_cast %56 : vector<1x1x128xf32> to vector<128xf32>
    %58 = vector.shape_cast %57 : vector<128xf32> to vector<1x1x1x128xf32>
    %59 = vector.broadcast %58 : vector<1x1x1x128xf32> to vector<1x8x8x128xf32>
    %60 = arith.mulf %55, %59 : vector<1x8x8x128xf32>
    %61 = arith.addf %54, %60 : vector<1x8x8x128xf32>
    %c0_30 = arith.constant 0 : index
    %c1_31 = arith.constant 1 : index
    %c1_32 = arith.constant 1 : index
    %c0_33 = arith.constant 0 : index
    %62 = vector.load %arg1[%c0_30, %c1_31, %c1_32, %c0_33] : memref<1x14x14x128xf32, #tpu.memory_space<vmem>>, vector<1x8x8x128xf32>
    %63 = vector.extract_strided_slice %0 {offsets = [1, 1, 0], sizes = [1, 1, 128], strides = [1, 1, 1]} : vector<7x7x128xf32> to vector<1x1x128xf32>
    %64 = vector.shape_cast %63 : vector<1x1x128xf32> to vector<128xf32>
    %65 = vector.shape_cast %64 : vector<128xf32> to vector<1x1x1x128xf32>
    %66 = vector.broadcast %65 : vector<1x1x1x128xf32> to vector<1x8x8x128xf32>
    %67 = arith.mulf %62, %66 : vector<1x8x8x128xf32>
    %68 = arith.addf %61, %67 : vector<1x8x8x128xf32>
    %c0_34 = arith.constant 0 : index
    %c1_35 = arith.constant 1 : index
    %c2_36 = arith.constant 2 : index
    %c0_37 = arith.constant 0 : index
    %69 = vector.load %arg1[%c0_34, %c1_35, %c2_36, %c0_37] : memref<1x14x14x128xf32, #tpu.memory_space<vmem>>, vector<1x8x8x128xf32>
    %70 = vector.extract_strided_slice %0 {offsets = [1, 2, 0], sizes = [1, 1, 128], strides = [1, 1, 1]} : vector<7x7x128xf32> to vector<1x1x128xf32>
    %71 = vector.shape_cast %70 : vector<1x1x128xf32> to vector<128xf32>
    %72 = vector.shape_cast %71 : vector<128xf32> to vector<1x1x1x128xf32>
    %73 = vector.broadcast %72 : vector<1x1x1x128xf32> to vector<1x8x8x128xf32>
    %74 = arith.mulf %69, %73 : vector<1x8x8x128xf32>
    %75 = arith.addf %68, %74 : vector<1x8x8x128xf32>
    %c0_38 = arith.constant 0 : index
    %c1_39 = arith.constant 1 : index
    %c3_40 = arith.constant 3 : index
    %c0_41 = arith.constant 0 : index
    %76 = vector.load %arg1[%c0_38, %c1_39, %c3_40, %c0_41] : memref<1x14x14x128xf32, #tpu.memory_space<vmem>>, vector<1x8x8x128xf32>
    %77 = vector.extract_strided_slice %0 {offsets = [1, 3, 0], sizes = [1, 1, 128], strides = [1, 1, 1]} : vector<7x7x128xf32> to vector<1x1x128xf32>
    %78 = vector.shape_cast %77 : vector<1x1x128xf32> to vector<128xf32>
    %79 = vector.shape_cast %78 : vector<128xf32> to vector<1x1x1x128xf32>
    %80 = vector.broadcast %79 : vector<1x1x1x128xf32> to vector<1x8x8x128xf32>
    %81 = arith.mulf %76, %80 : vector<1x8x8x128xf32>
    %82 = arith.addf %75, %81 : vector<1x8x8x128xf32>
    %c0_42 = arith.constant 0 : index
    %c1_43 = arith.constant 1 : index
    %c4_44 = arith.constant 4 : index
    %c0_45 = arith.constant 0 : index
    %83 = vector.load %arg1[%c0_42, %c1_43, %c4_44, %c0_45] : memref<1x14x14x128xf32, #tpu.memory_space<vmem>>, vector<1x8x8x128xf32>
    %84 = vector.extract_strided_slice %0 {offsets = [1, 4, 0], sizes = [1, 1, 128], strides = [1, 1, 1]} : vector<7x7x128xf32> to vector<1x1x128xf32>
    %85 = vector.shape_cast %84 : vector<1x1x128xf32> to vector<128xf32>
    %86 = vector.shape_cast %85 : vector<128xf32> to vector<1x1x1x128xf32>
    %87 = vector.broadcast %86 : vector<1x1x1x128xf32> to vector<1x8x8x128xf32>
    %88 = arith.mulf %83, %87 : vector<1x8x8x128xf32>
    %89 = arith.addf %82, %88 : vector<1x8x8x128xf32>
    %c0_46 = arith.constant 0 : index
    %c1_47 = arith.constant 1 : index
    %c5_48 = arith.constant 5 : index
    %c0_49 = arith.constant 0 : index
    %90 = vector.load %arg1[%c0_46, %c1_47, %c5_48, %c0_49] : memref<1x14x14x128xf32, #tpu.memory_space<vmem>>, vector<1x8x8x128xf32>
    %91 = vector.extract_strided_slice %0 {offsets = [1, 5, 0], sizes = [1, 1, 128], strides = [1, 1, 1]} : vector<7x7x128xf32> to vector<1x1x128xf32>
    %92 = vector.shape_cast %91 : vector<1x1x128xf32> to vector<128xf32>
    %93 = vector.shape_cast %92 : vector<128xf32> to vector<1x1x1x128xf32>
    %94 = vector.broadcast %93 : vector<1x1x1x128xf32> to vector<1x8x8x128xf32>
    %95 = arith.mulf %90, %94 : vector<1x8x8x128xf32>
    %96 = arith.addf %89, %95 : vector<1x8x8x128xf32>
    %c0_50 = arith.constant 0 : index
    %c1_51 = arith.constant 1 : index
    %c6_52 = arith.constant 6 : index
    %c0_53 = arith.constant 0 : index
    %97 = vector.load %arg1[%c0_50, %c1_51, %c6_52, %c0_53] : memref<1x14x14x128xf32, #tpu.memory_space<vmem>>, vector<1x8x8x128xf32>
    %98 = vector.extract_strided_slice %0 {offsets = [1, 6, 0], sizes = [1, 1, 128], strides = [1, 1, 1]} : vector<7x7x128xf32> to vector<1x1x128xf32>
    %99 = vector.shape_cast %98 : vector<1x1x128xf32> to vector<128xf32>
    %100 = vector.shape_cast %99 : vector<128xf32> to vector<1x1x1x128xf32>
    %101 = vector.broadcast %100 : vector<1x1x1x128xf32> to vector<1x8x8x128xf32>
    %102 = arith.mulf %97, %101 : vector<1x8x8x128xf32>
    %103 = arith.addf %96, %102 : vector<1x8x8x128xf32>
    %c0_54 = arith.constant 0 : index
    %c2_55 = arith.constant 2 : index
    %c0_56 = arith.constant 0 : index
    %c0_57 = arith.constant 0 : index
    %104 = vector.load %arg1[%c0_54, %c2_55, %c0_56, %c0_57] : memref<1x14x14x128xf32, #tpu.memory_space<vmem>>, vector<1x8x8x128xf32>
    %105 = vector.extract_strided_slice %0 {offsets = [2, 0, 0], sizes = [1, 1, 128], strides = [1, 1, 1]} : vector<7x7x128xf32> to vector<1x1x128xf32>
    %106 = vector.shape_cast %105 : vector<1x1x128xf32> to vector<128xf32>
    %107 = vector.shape_cast %106 : vector<128xf32> to vector<1x1x1x128xf32>
    %108 = vector.broadcast %107 : vector<1x1x1x128xf32> to vector<1x8x8x128xf32>
    %109 = arith.mulf %104, %108 : vector<1x8x8x128xf32>
    %110 = arith.addf %103, %109 : vector<1x8x8x128xf32>
    %c0_58 = arith.constant 0 : index
    %c2_59 = arith.constant 2 : index
    %c1_60 = arith.constant 1 : index
    %c0_61 = arith.constant 0 : index
    %111 = vector.load %arg1[%c0_58, %c2_59, %c1_60, %c0_61] : memref<1x14x14x128xf32, #tpu.memory_space<vmem>>, vector<1x8x8x128xf32>
    %112 = vector.extract_strided_slice %0 {offsets = [2, 1, 0], sizes = [1, 1, 128], strides = [1, 1, 1]} : vector<7x7x128xf32> to vector<1x1x128xf32>
    %113 = vector.shape_cast %112 : vector<1x1x128xf32> to vector<128xf32>
    %114 = vector.shape_cast %113 : vector<128xf32> to vector<1x1x1x128xf32>
    %115 = vector.broadcast %114 : vector<1x1x1x128xf32> to vector<1x8x8x128xf32>
    %116 = arith.mulf %111, %115 : vector<1x8x8x128xf32>
    %117 = arith.addf %110, %116 : vector<1x8x8x128xf32>
    %c0_62 = arith.constant 0 : index
    %c2_63 = arith.constant 2 : index
    %c2_64 = arith.constant 2 : index
    %c0_65 = arith.constant 0 : index
    %118 = vector.load %arg1[%c0_62, %c2_63, %c2_64, %c0_65] : memref<1x14x14x128xf32, #tpu.memory_space<vmem>>, vector<1x8x8x128xf32>
    %119 = vector.extract_strided_slice %0 {offsets = [2, 2, 0], sizes = [1, 1, 128], strides = [1, 1, 1]} : vector<7x7x128xf32> to vector<1x1x128xf32>
    %120 = vector.shape_cast %119 : vector<1x1x128xf32> to vector<128xf32>
    %121 = vector.shape_cast %120 : vector<128xf32> to vector<1x1x1x128xf32>
    %122 = vector.broadcast %121 : vector<1x1x1x128xf32> to vector<1x8x8x128xf32>
    %123 = arith.mulf %118, %122 : vector<1x8x8x128xf32>
    %124 = arith.addf %117, %123 : vector<1x8x8x128xf32>
    %c0_66 = arith.constant 0 : index
    %c2_67 = arith.constant 2 : index
    %c3_68 = arith.constant 3 : index
    %c0_69 = arith.constant 0 : index
    %125 = vector.load %arg1[%c0_66, %c2_67, %c3_68, %c0_69] : memref<1x14x14x128xf32, #tpu.memory_space<vmem>>, vector<1x8x8x128xf32>
    %126 = vector.extract_strided_slice %0 {offsets = [2, 3, 0], sizes = [1, 1, 128], strides = [1, 1, 1]} : vector<7x7x128xf32> to vector<1x1x128xf32>
    %127 = vector.shape_cast %126 : vector<1x1x128xf32> to vector<128xf32>
    %128 = vector.shape_cast %127 : vector<128xf32> to vector<1x1x1x128xf32>
    %129 = vector.broadcast %128 : vector<1x1x1x128xf32> to vector<1x8x8x128xf32>
    %130 = arith.mulf %125, %129 : vector<1x8x8x128xf32>
    %131 = arith.addf %124, %130 : vector<1x8x8x128xf32>
    %c0_70 = arith.constant 0 : index
    %c2_71 = arith.constant 2 : index
    %c4_72 = arith.constant 4 : index
    %c0_73 = arith.constant 0 : index
    %132 = vector.load %arg1[%c0_70, %c2_71, %c4_72, %c0_73] : memref<1x14x14x128xf32, #tpu.memory_space<vmem>>, vector<1x8x8x128xf32>
    %133 = vector.extract_strided_slice %0 {offsets = [2, 4, 0], sizes = [1, 1, 128], strides = [1, 1, 1]} : vector<7x7x128xf32> to vector<1x1x128xf32>
    %134 = vector.shape_cast %133 : vector<1x1x128xf32> to vector<128xf32>
    %135 = vector.shape_cast %134 : vector<128xf32> to vector<1x1x1x128xf32>
    %136 = vector.broadcast %135 : vector<1x1x1x128xf32> to vector<1x8x8x128xf32>
    %137 = arith.mulf %132, %136 : vector<1x8x8x128xf32>
    %138 = arith.addf %131, %137 : vector<1x8x8x128xf32>
    %c0_74 = arith.constant 0 : index
    %c2_75 = arith.constant 2 : index
    %c5_76 = arith.constant 5 : index
    %c0_77 = arith.constant 0 : index
    %139 = vector.load %arg1[%c0_74, %c2_75, %c5_76, %c0_77] : memref<1x14x14x128xf32, #tpu.memory_space<vmem>>, vector<1x8x8x128xf32>
    %140 = vector.extract_strided_slice %0 {offsets = [2, 5, 0], sizes = [1, 1, 128], strides = [1, 1, 1]} : vector<7x7x128xf32> to vector<1x1x128xf32>
    %141 = vector.shape_cast %140 : vector<1x1x128xf32> to vector<128xf32>
    %142 = vector.shape_cast %141 : vector<128xf32> to vector<1x1x1x128xf32>
    %143 = vector.broadcast %142 : vector<1x1x1x128xf32> to vector<1x8x8x128xf32>
    %144 = arith.mulf %139, %143 : vector<1x8x8x128xf32>
    %145 = arith.addf %138, %144 : vector<1x8x8x128xf32>
    %c0_78 = arith.constant 0 : index
    %c2_79 = arith.constant 2 : index
    %c6_80 = arith.constant 6 : index
    %c0_81 = arith.constant 0 : index
    %146 = vector.load %arg1[%c0_78, %c2_79, %c6_80, %c0_81] : memref<1x14x14x128xf32, #tpu.memory_space<vmem>>, vector<1x8x8x128xf32>
    %147 = vector.extract_strided_slice %0 {offsets = [2, 6, 0], sizes = [1, 1, 128], strides = [1, 1, 1]} : vector<7x7x128xf32> to vector<1x1x128xf32>
    %148 = vector.shape_cast %147 : vector<1x1x128xf32> to vector<128xf32>
    %149 = vector.shape_cast %148 : vector<128xf32> to vector<1x1x1x128xf32>
    %150 = vector.broadcast %149 : vector<1x1x1x128xf32> to vector<1x8x8x128xf32>
    %151 = arith.mulf %146, %150 : vector<1x8x8x128xf32>
    %152 = arith.addf %145, %151 : vector<1x8x8x128xf32>
    %c0_82 = arith.constant 0 : index
    %c3_83 = arith.constant 3 : index
    %c0_84 = arith.constant 0 : index
    %c0_85 = arith.constant 0 : index
    %153 = vector.load %arg1[%c0_82, %c3_83, %c0_84, %c0_85] : memref<1x14x14x128xf32, #tpu.memory_space<vmem>>, vector<1x8x8x128xf32>
    %154 = vector.extract_strided_slice %0 {offsets = [3, 0, 0], sizes = [1, 1, 128], strides = [1, 1, 1]} : vector<7x7x128xf32> to vector<1x1x128xf32>
    %155 = vector.shape_cast %154 : vector<1x1x128xf32> to vector<128xf32>
    %156 = vector.shape_cast %155 : vector<128xf32> to vector<1x1x1x128xf32>
    %157 = vector.broadcast %156 : vector<1x1x1x128xf32> to vector<1x8x8x128xf32>
    %158 = arith.mulf %153, %157 : vector<1x8x8x128xf32>
    %159 = arith.addf %152, %158 : vector<1x8x8x128xf32>
    %c0_86 = arith.constant 0 : index
    %c3_87 = arith.constant 3 : index
    %c1_88 = arith.constant 1 : index
    %c0_89 = arith.constant 0 : index
    %160 = vector.load %arg1[%c0_86, %c3_87, %c1_88, %c0_89] : memref<1x14x14x128xf32, #tpu.memory_space<vmem>>, vector<1x8x8x128xf32>
    %161 = vector.extract_strided_slice %0 {offsets = [3, 1, 0], sizes = [1, 1, 128], strides = [1, 1, 1]} : vector<7x7x128xf32> to vector<1x1x128xf32>
    %162 = vector.shape_cast %161 : vector<1x1x128xf32> to vector<128xf32>
    %163 = vector.shape_cast %162 : vector<128xf32> to vector<1x1x1x128xf32>
    %164 = vector.broadcast %163 : vector<1x1x1x128xf32> to vector<1x8x8x128xf32>
    %165 = arith.mulf %160, %164 : vector<1x8x8x128xf32>
    %166 = arith.addf %159, %165 : vector<1x8x8x128xf32>
    %c0_90 = arith.constant 0 : index
    %c3_91 = arith.constant 3 : index
    %c2_92 = arith.constant 2 : index
    %c0_93 = arith.constant 0 : index
    %167 = vector.load %arg1[%c0_90, %c3_91, %c2_92, %c0_93] : memref<1x14x14x128xf32, #tpu.memory_space<vmem>>, vector<1x8x8x128xf32>
    %168 = vector.extract_strided_slice %0 {offsets = [3, 2, 0], sizes = [1, 1, 128], strides = [1, 1, 1]} : vector<7x7x128xf32> to vector<1x1x128xf32>
    %169 = vector.shape_cast %168 : vector<1x1x128xf32> to vector<128xf32>
    %170 = vector.shape_cast %169 : vector<128xf32> to vector<1x1x1x128xf32>
    %171 = vector.broadcast %170 : vector<1x1x1x128xf32> to vector<1x8x8x128xf32>
    %172 = arith.mulf %167, %171 : vector<1x8x8x128xf32>
    %173 = arith.addf %166, %172 : vector<1x8x8x128xf32>
    %c0_94 = arith.constant 0 : index
    %c3_95 = arith.constant 3 : index
    %c3_96 = arith.constant 3 : index
    %c0_97 = arith.constant 0 : index
    %174 = vector.load %arg1[%c0_94, %c3_95, %c3_96, %c0_97] : memref<1x14x14x128xf32, #tpu.memory_space<vmem>>, vector<1x8x8x128xf32>
    %175 = vector.extract_strided_slice %0 {offsets = [3, 3, 0], sizes = [1, 1, 128], strides = [1, 1, 1]} : vector<7x7x128xf32> to vector<1x1x128xf32>
    %176 = vector.shape_cast %175 : vector<1x1x128xf32> to vector<128xf32>
    %177 = vector.shape_cast %176 : vector<128xf32> to vector<1x1x1x128xf32>
    %178 = vector.broadcast %177 : vector<1x1x1x128xf32> to vector<1x8x8x128xf32>
    %179 = arith.mulf %174, %178 : vector<1x8x8x128xf32>
    %180 = arith.addf %173, %179 : vector<1x8x8x128xf32>
    %c0_98 = arith.constant 0 : index
    %c3_99 = arith.constant 3 : index
    %c4_100 = arith.constant 4 : index
    %c0_101 = arith.constant 0 : index
    %181 = vector.load %arg1[%c0_98, %c3_99, %c4_100, %c0_101] : memref<1x14x14x128xf32, #tpu.memory_space<vmem>>, vector<1x8x8x128xf32>
    %182 = vector.extract_strided_slice %0 {offsets = [3, 4, 0], sizes = [1, 1, 128], strides = [1, 1, 1]} : vector<7x7x128xf32> to vector<1x1x128xf32>
    %183 = vector.shape_cast %182 : vector<1x1x128xf32> to vector<128xf32>
    %184 = vector.shape_cast %183 : vector<128xf32> to vector<1x1x1x128xf32>
    %185 = vector.broadcast %184 : vector<1x1x1x128xf32> to vector<1x8x8x128xf32>
    %186 = arith.mulf %181, %185 : vector<1x8x8x128xf32>
    %187 = arith.addf %180, %186 : vector<1x8x8x128xf32>
    %c0_102 = arith.constant 0 : index
    %c3_103 = arith.constant 3 : index
    %c5_104 = arith.constant 5 : index
    %c0_105 = arith.constant 0 : index
    %188 = vector.load %arg1[%c0_102, %c3_103, %c5_104, %c0_105] : memref<1x14x14x128xf32, #tpu.memory_space<vmem>>, vector<1x8x8x128xf32>
    %189 = vector.extract_strided_slice %0 {offsets = [3, 5, 0], sizes = [1, 1, 128], strides = [1, 1, 1]} : vector<7x7x128xf32> to vector<1x1x128xf32>
    %190 = vector.shape_cast %189 : vector<1x1x128xf32> to vector<128xf32>
    %191 = vector.shape_cast %190 : vector<128xf32> to vector<1x1x1x128xf32>
    %192 = vector.broadcast %191 : vector<1x1x1x128xf32> to vector<1x8x8x128xf32>
    %193 = arith.mulf %188, %192 : vector<1x8x8x128xf32>
    %194 = arith.addf %187, %193 : vector<1x8x8x128xf32>
    %c0_106 = arith.constant 0 : index
    %c3_107 = arith.constant 3 : index
    %c6_108 = arith.constant 6 : index
    %c0_109 = arith.constant 0 : index
    %195 = vector.load %arg1[%c0_106, %c3_107, %c6_108, %c0_109] : memref<1x14x14x128xf32, #tpu.memory_space<vmem>>, vector<1x8x8x128xf32>
    %196 = vector.extract_strided_slice %0 {offsets = [3, 6, 0], sizes = [1, 1, 128], strides = [1, 1, 1]} : vector<7x7x128xf32> to vector<1x1x128xf32>
    %197 = vector.shape_cast %196 : vector<1x1x128xf32> to vector<128xf32>
    %198 = vector.shape_cast %197 : vector<128xf32> to vector<1x1x1x128xf32>
    %199 = vector.broadcast %198 : vector<1x1x1x128xf32> to vector<1x8x8x128xf32>
    %200 = arith.mulf %195, %199 : vector<1x8x8x128xf32>
    %201 = arith.addf %194, %200 : vector<1x8x8x128xf32>
    %c0_110 = arith.constant 0 : index
    %c4_111 = arith.constant 4 : index
    %c0_112 = arith.constant 0 : index
    %c0_113 = arith.constant 0 : index
    %202 = vector.load %arg1[%c0_110, %c4_111, %c0_112, %c0_113] : memref<1x14x14x128xf32, #tpu.memory_space<vmem>>, vector<1x8x8x128xf32>
    %203 = vector.extract_strided_slice %0 {offsets = [4, 0, 0], sizes = [1, 1, 128], strides = [1, 1, 1]} : vector<7x7x128xf32> to vector<1x1x128xf32>
    %204 = vector.shape_cast %203 : vector<1x1x128xf32> to vector<128xf32>
    %205 = vector.shape_cast %204 : vector<128xf32> to vector<1x1x1x128xf32>
    %206 = vector.broadcast %205 : vector<1x1x1x128xf32> to vector<1x8x8x128xf32>
    %207 = arith.mulf %202, %206 : vector<1x8x8x128xf32>
    %208 = arith.addf %201, %207 : vector<1x8x8x128xf32>
    %c0_114 = arith.constant 0 : index
    %c4_115 = arith.constant 4 : index
    %c1_116 = arith.constant 1 : index
    %c0_117 = arith.constant 0 : index
    %209 = vector.load %arg1[%c0_114, %c4_115, %c1_116, %c0_117] : memref<1x14x14x128xf32, #tpu.memory_space<vmem>>, vector<1x8x8x128xf32>
    %210 = vector.extract_strided_slice %0 {offsets = [4, 1, 0], sizes = [1, 1, 128], strides = [1, 1, 1]} : vector<7x7x128xf32> to vector<1x1x128xf32>
    %211 = vector.shape_cast %210 : vector<1x1x128xf32> to vector<128xf32>
    %212 = vector.shape_cast %211 : vector<128xf32> to vector<1x1x1x128xf32>
    %213 = vector.broadcast %212 : vector<1x1x1x128xf32> to vector<1x8x8x128xf32>
    %214 = arith.mulf %209, %213 : vector<1x8x8x128xf32>
    %215 = arith.addf %208, %214 : vector<1x8x8x128xf32>
    %c0_118 = arith.constant 0 : index
    %c4_119 = arith.constant 4 : index
    %c2_120 = arith.constant 2 : index
    %c0_121 = arith.constant 0 : index
    %216 = vector.load %arg1[%c0_118, %c4_119, %c2_120, %c0_121] : memref<1x14x14x128xf32, #tpu.memory_space<vmem>>, vector<1x8x8x128xf32>
    %217 = vector.extract_strided_slice %0 {offsets = [4, 2, 0], sizes = [1, 1, 128], strides = [1, 1, 1]} : vector<7x7x128xf32> to vector<1x1x128xf32>
    %218 = vector.shape_cast %217 : vector<1x1x128xf32> to vector<128xf32>
    %219 = vector.shape_cast %218 : vector<128xf32> to vector<1x1x1x128xf32>
    %220 = vector.broadcast %219 : vector<1x1x1x128xf32> to vector<1x8x8x128xf32>
    %221 = arith.mulf %216, %220 : vector<1x8x8x128xf32>
    %222 = arith.addf %215, %221 : vector<1x8x8x128xf32>
    %c0_122 = arith.constant 0 : index
    %c4_123 = arith.constant 4 : index
    %c3_124 = arith.constant 3 : index
    %c0_125 = arith.constant 0 : index
    %223 = vector.load %arg1[%c0_122, %c4_123, %c3_124, %c0_125] : memref<1x14x14x128xf32, #tpu.memory_space<vmem>>, vector<1x8x8x128xf32>
    %224 = vector.extract_strided_slice %0 {offsets = [4, 3, 0], sizes = [1, 1, 128], strides = [1, 1, 1]} : vector<7x7x128xf32> to vector<1x1x128xf32>
    %225 = vector.shape_cast %224 : vector<1x1x128xf32> to vector<128xf32>
    %226 = vector.shape_cast %225 : vector<128xf32> to vector<1x1x1x128xf32>
    %227 = vector.broadcast %226 : vector<1x1x1x128xf32> to vector<1x8x8x128xf32>
    %228 = arith.mulf %223, %227 : vector<1x8x8x128xf32>
    %229 = arith.addf %222, %228 : vector<1x8x8x128xf32>
    %c0_126 = arith.constant 0 : index
    %c4_127 = arith.constant 4 : index
    %c4_128 = arith.constant 4 : index
    %c0_129 = arith.constant 0 : index
    %230 = vector.load %arg1[%c0_126, %c4_127, %c4_128, %c0_129] : memref<1x14x14x128xf32, #tpu.memory_space<vmem>>, vector<1x8x8x128xf32>
    %231 = vector.extract_strided_slice %0 {offsets = [4, 4, 0], sizes = [1, 1, 128], strides = [1, 1, 1]} : vector<7x7x128xf32> to vector<1x1x128xf32>
    %232 = vector.shape_cast %231 : vector<1x1x128xf32> to vector<128xf32>
    %233 = vector.shape_cast %232 : vector<128xf32> to vector<1x1x1x128xf32>
    %234 = vector.broadcast %233 : vector<1x1x1x128xf32> to vector<1x8x8x128xf32>
    %235 = arith.mulf %230, %234 : vector<1x8x8x128xf32>
    %236 = arith.addf %229, %235 : vector<1x8x8x128xf32>
    %c0_130 = arith.constant 0 : index
    %c4_131 = arith.constant 4 : index
    %c5_132 = arith.constant 5 : index
    %c0_133 = arith.constant 0 : index
    %237 = vector.load %arg1[%c0_130, %c4_131, %c5_132, %c0_133] : memref<1x14x14x128xf32, #tpu.memory_space<vmem>>, vector<1x8x8x128xf32>
    %238 = vector.extract_strided_slice %0 {offsets = [4, 5, 0], sizes = [1, 1, 128], strides = [1, 1, 1]} : vector<7x7x128xf32> to vector<1x1x128xf32>
    %239 = vector.shape_cast %238 : vector<1x1x128xf32> to vector<128xf32>
    %240 = vector.shape_cast %239 : vector<128xf32> to vector<1x1x1x128xf32>
    %241 = vector.broadcast %240 : vector<1x1x1x128xf32> to vector<1x8x8x128xf32>
    %242 = arith.mulf %237, %241 : vector<1x8x8x128xf32>
    %243 = arith.addf %236, %242 : vector<1x8x8x128xf32>
    %c0_134 = arith.constant 0 : index
    %c4_135 = arith.constant 4 : index
    %c6_136 = arith.constant 6 : index
    %c0_137 = arith.constant 0 : index
    %244 = vector.load %arg1[%c0_134, %c4_135, %c6_136, %c0_137] : memref<1x14x14x128xf32, #tpu.memory_space<vmem>>, vector<1x8x8x128xf32>
    %245 = vector.extract_strided_slice %0 {offsets = [4, 6, 0], sizes = [1, 1, 128], strides = [1, 1, 1]} : vector<7x7x128xf32> to vector<1x1x128xf32>
    %246 = vector.shape_cast %245 : vector<1x1x128xf32> to vector<128xf32>
    %247 = vector.shape_cast %246 : vector<128xf32> to vector<1x1x1x128xf32>
    %248 = vector.broadcast %247 : vector<1x1x1x128xf32> to vector<1x8x8x128xf32>
    %249 = arith.mulf %244, %248 : vector<1x8x8x128xf32>
    %250 = arith.addf %243, %249 : vector<1x8x8x128xf32>
    %c0_138 = arith.constant 0 : index
    %c5_139 = arith.constant 5 : index
    %c0_140 = arith.constant 0 : index
    %c0_141 = arith.constant 0 : index
    %251 = vector.load %arg1[%c0_138, %c5_139, %c0_140, %c0_141] : memref<1x14x14x128xf32, #tpu.memory_space<vmem>>, vector<1x8x8x128xf32>
    %252 = vector.extract_strided_slice %0 {offsets = [5, 0, 0], sizes = [1, 1, 128], strides = [1, 1, 1]} : vector<7x7x128xf32> to vector<1x1x128xf32>
    %253 = vector.shape_cast %252 : vector<1x1x128xf32> to vector<128xf32>
    %254 = vector.shape_cast %253 : vector<128xf32> to vector<1x1x1x128xf32>
    %255 = vector.broadcast %254 : vector<1x1x1x128xf32> to vector<1x8x8x128xf32>
    %256 = arith.mulf %251, %255 : vector<1x8x8x128xf32>
    %257 = arith.addf %250, %256 : vector<1x8x8x128xf32>
    %c0_142 = arith.constant 0 : index
    %c5_143 = arith.constant 5 : index
    %c1_144 = arith.constant 1 : index
    %c0_145 = arith.constant 0 : index
    %258 = vector.load %arg1[%c0_142, %c5_143, %c1_144, %c0_145] : memref<1x14x14x128xf32, #tpu.memory_space<vmem>>, vector<1x8x8x128xf32>
    %259 = vector.extract_strided_slice %0 {offsets = [5, 1, 0], sizes = [1, 1, 128], strides = [1, 1, 1]} : vector<7x7x128xf32> to vector<1x1x128xf32>
    %260 = vector.shape_cast %259 : vector<1x1x128xf32> to vector<128xf32>
    %261 = vector.shape_cast %260 : vector<128xf32> to vector<1x1x1x128xf32>
    %262 = vector.broadcast %261 : vector<1x1x1x128xf32> to vector<1x8x8x128xf32>
    %263 = arith.mulf %258, %262 : vector<1x8x8x128xf32>
    %264 = arith.addf %257, %263 : vector<1x8x8x128xf32>
    %c0_146 = arith.constant 0 : index
    %c5_147 = arith.constant 5 : index
    %c2_148 = arith.constant 2 : index
    %c0_149 = arith.constant 0 : index
    %265 = vector.load %arg1[%c0_146, %c5_147, %c2_148, %c0_149] : memref<1x14x14x128xf32, #tpu.memory_space<vmem>>, vector<1x8x8x128xf32>
    %266 = vector.extract_strided_slice %0 {offsets = [5, 2, 0], sizes = [1, 1, 128], strides = [1, 1, 1]} : vector<7x7x128xf32> to vector<1x1x128xf32>
    %267 = vector.shape_cast %266 : vector<1x1x128xf32> to vector<128xf32>
    %268 = vector.shape_cast %267 : vector<128xf32> to vector<1x1x1x128xf32>
    %269 = vector.broadcast %268 : vector<1x1x1x128xf32> to vector<1x8x8x128xf32>
    %270 = arith.mulf %265, %269 : vector<1x8x8x128xf32>
    %271 = arith.addf %264, %270 : vector<1x8x8x128xf32>
    %c0_150 = arith.constant 0 : index
    %c5_151 = arith.constant 5 : index
    %c3_152 = arith.constant 3 : index
    %c0_153 = arith.constant 0 : index
    %272 = vector.load %arg1[%c0_150, %c5_151, %c3_152, %c0_153] : memref<1x14x14x128xf32, #tpu.memory_space<vmem>>, vector<1x8x8x128xf32>
    %273 = vector.extract_strided_slice %0 {offsets = [5, 3, 0], sizes = [1, 1, 128], strides = [1, 1, 1]} : vector<7x7x128xf32> to vector<1x1x128xf32>
    %274 = vector.shape_cast %273 : vector<1x1x128xf32> to vector<128xf32>
    %275 = vector.shape_cast %274 : vector<128xf32> to vector<1x1x1x128xf32>
    %276 = vector.broadcast %275 : vector<1x1x1x128xf32> to vector<1x8x8x128xf32>
    %277 = arith.mulf %272, %276 : vector<1x8x8x128xf32>
    %278 = arith.addf %271, %277 : vector<1x8x8x128xf32>
    %c0_154 = arith.constant 0 : index
    %c5_155 = arith.constant 5 : index
    %c4_156 = arith.constant 4 : index
    %c0_157 = arith.constant 0 : index
    %279 = vector.load %arg1[%c0_154, %c5_155, %c4_156, %c0_157] : memref<1x14x14x128xf32, #tpu.memory_space<vmem>>, vector<1x8x8x128xf32>
    %280 = vector.extract_strided_slice %0 {offsets = [5, 4, 0], sizes = [1, 1, 128], strides = [1, 1, 1]} : vector<7x7x128xf32> to vector<1x1x128xf32>
    %281 = vector.shape_cast %280 : vector<1x1x128xf32> to vector<128xf32>
    %282 = vector.shape_cast %281 : vector<128xf32> to vector<1x1x1x128xf32>
    %283 = vector.broadcast %282 : vector<1x1x1x128xf32> to vector<1x8x8x128xf32>
    %284 = arith.mulf %279, %283 : vector<1x8x8x128xf32>
    %285 = arith.addf %278, %284 : vector<1x8x8x128xf32>
    %c0_158 = arith.constant 0 : index
    %c5_159 = arith.constant 5 : index
    %c5_160 = arith.constant 5 : index
    %c0_161 = arith.constant 0 : index
    %286 = vector.load %arg1[%c0_158, %c5_159, %c5_160, %c0_161] : memref<1x14x14x128xf32, #tpu.memory_space<vmem>>, vector<1x8x8x128xf32>
    %287 = vector.extract_strided_slice %0 {offsets = [5, 5, 0], sizes = [1, 1, 128], strides = [1, 1, 1]} : vector<7x7x128xf32> to vector<1x1x128xf32>
    %288 = vector.shape_cast %287 : vector<1x1x128xf32> to vector<128xf32>
    %289 = vector.shape_cast %288 : vector<128xf32> to vector<1x1x1x128xf32>
    %290 = vector.broadcast %289 : vector<1x1x1x128xf32> to vector<1x8x8x128xf32>
    %291 = arith.mulf %286, %290 : vector<1x8x8x128xf32>
    %292 = arith.addf %285, %291 : vector<1x8x8x128xf32>
    %c0_162 = arith.constant 0 : index
    %c5_163 = arith.constant 5 : index
    %c6_164 = arith.constant 6 : index
    %c0_165 = arith.constant 0 : index
    %293 = vector.load %arg1[%c0_162, %c5_163, %c6_164, %c0_165] : memref<1x14x14x128xf32, #tpu.memory_space<vmem>>, vector<1x8x8x128xf32>
    %294 = vector.extract_strided_slice %0 {offsets = [5, 6, 0], sizes = [1, 1, 128], strides = [1, 1, 1]} : vector<7x7x128xf32> to vector<1x1x128xf32>
    %295 = vector.shape_cast %294 : vector<1x1x128xf32> to vector<128xf32>
    %296 = vector.shape_cast %295 : vector<128xf32> to vector<1x1x1x128xf32>
    %297 = vector.broadcast %296 : vector<1x1x1x128xf32> to vector<1x8x8x128xf32>
    %298 = arith.mulf %293, %297 : vector<1x8x8x128xf32>
    %299 = arith.addf %292, %298 : vector<1x8x8x128xf32>
    %c0_166 = arith.constant 0 : index
    %c6_167 = arith.constant 6 : index
    %c0_168 = arith.constant 0 : index
    %c0_169 = arith.constant 0 : index
    %300 = vector.load %arg1[%c0_166, %c6_167, %c0_168, %c0_169] : memref<1x14x14x128xf32, #tpu.memory_space<vmem>>, vector<1x8x8x128xf32>
    %301 = vector.extract_strided_slice %0 {offsets = [6, 0, 0], sizes = [1, 1, 128], strides = [1, 1, 1]} : vector<7x7x128xf32> to vector<1x1x128xf32>
    %302 = vector.shape_cast %301 : vector<1x1x128xf32> to vector<128xf32>
    %303 = vector.shape_cast %302 : vector<128xf32> to vector<1x1x1x128xf32>
    %304 = vector.broadcast %303 : vector<1x1x1x128xf32> to vector<1x8x8x128xf32>
    %305 = arith.mulf %300, %304 : vector<1x8x8x128xf32>
    %306 = arith.addf %299, %305 : vector<1x8x8x128xf32>
    %c0_170 = arith.constant 0 : index
    %c6_171 = arith.constant 6 : index
    %c1_172 = arith.constant 1 : index
    %c0_173 = arith.constant 0 : index
    %307 = vector.load %arg1[%c0_170, %c6_171, %c1_172, %c0_173] : memref<1x14x14x128xf32, #tpu.memory_space<vmem>>, vector<1x8x8x128xf32>
    %308 = vector.extract_strided_slice %0 {offsets = [6, 1, 0], sizes = [1, 1, 128], strides = [1, 1, 1]} : vector<7x7x128xf32> to vector<1x1x128xf32>
    %309 = vector.shape_cast %308 : vector<1x1x128xf32> to vector<128xf32>
    %310 = vector.shape_cast %309 : vector<128xf32> to vector<1x1x1x128xf32>
    %311 = vector.broadcast %310 : vector<1x1x1x128xf32> to vector<1x8x8x128xf32>
    %312 = arith.mulf %307, %311 : vector<1x8x8x128xf32>
    %313 = arith.addf %306, %312 : vector<1x8x8x128xf32>
    %c0_174 = arith.constant 0 : index
    %c6_175 = arith.constant 6 : index
    %c2_176 = arith.constant 2 : index
    %c0_177 = arith.constant 0 : index
    %314 = vector.load %arg1[%c0_174, %c6_175, %c2_176, %c0_177] : memref<1x14x14x128xf32, #tpu.memory_space<vmem>>, vector<1x8x8x128xf32>
    %315 = vector.extract_strided_slice %0 {offsets = [6, 2, 0], sizes = [1, 1, 128], strides = [1, 1, 1]} : vector<7x7x128xf32> to vector<1x1x128xf32>
    %316 = vector.shape_cast %315 : vector<1x1x128xf32> to vector<128xf32>
    %317 = vector.shape_cast %316 : vector<128xf32> to vector<1x1x1x128xf32>
    %318 = vector.broadcast %317 : vector<1x1x1x128xf32> to vector<1x8x8x128xf32>
    %319 = arith.mulf %314, %318 : vector<1x8x8x128xf32>
    %320 = arith.addf %313, %319 : vector<1x8x8x128xf32>
    %c0_178 = arith.constant 0 : index
    %c6_179 = arith.constant 6 : index
    %c3_180 = arith.constant 3 : index
    %c0_181 = arith.constant 0 : index
    %321 = vector.load %arg1[%c0_178, %c6_179, %c3_180, %c0_181] : memref<1x14x14x128xf32, #tpu.memory_space<vmem>>, vector<1x8x8x128xf32>
    %322 = vector.extract_strided_slice %0 {offsets = [6, 3, 0], sizes = [1, 1, 128], strides = [1, 1, 1]} : vector<7x7x128xf32> to vector<1x1x128xf32>
    %323 = vector.shape_cast %322 : vector<1x1x128xf32> to vector<128xf32>
    %324 = vector.shape_cast %323 : vector<128xf32> to vector<1x1x1x128xf32>
    %325 = vector.broadcast %324 : vector<1x1x1x128xf32> to vector<1x8x8x128xf32>
    %326 = arith.mulf %321, %325 : vector<1x8x8x128xf32>
    %327 = arith.addf %320, %326 : vector<1x8x8x128xf32>
    %c0_182 = arith.constant 0 : index
    %c6_183 = arith.constant 6 : index
    %c4_184 = arith.constant 4 : index
    %c0_185 = arith.constant 0 : index
    %328 = vector.load %arg1[%c0_182, %c6_183, %c4_184, %c0_185] : memref<1x14x14x128xf32, #tpu.memory_space<vmem>>, vector<1x8x8x128xf32>
    %329 = vector.extract_strided_slice %0 {offsets = [6, 4, 0], sizes = [1, 1, 128], strides = [1, 1, 1]} : vector<7x7x128xf32> to vector<1x1x128xf32>
    %330 = vector.shape_cast %329 : vector<1x1x128xf32> to vector<128xf32>
    %331 = vector.shape_cast %330 : vector<128xf32> to vector<1x1x1x128xf32>
    %332 = vector.broadcast %331 : vector<1x1x1x128xf32> to vector<1x8x8x128xf32>
    %333 = arith.mulf %328, %332 : vector<1x8x8x128xf32>
    %334 = arith.addf %327, %333 : vector<1x8x8x128xf32>
    %c0_186 = arith.constant 0 : index
    %c6_187 = arith.constant 6 : index
    %c5_188 = arith.constant 5 : index
    %c0_189 = arith.constant 0 : index
    %335 = vector.load %arg1[%c0_186, %c6_187, %c5_188, %c0_189] : memref<1x14x14x128xf32, #tpu.memory_space<vmem>>, vector<1x8x8x128xf32>
    %336 = vector.extract_strided_slice %0 {offsets = [6, 5, 0], sizes = [1, 1, 128], strides = [1, 1, 1]} : vector<7x7x128xf32> to vector<1x1x128xf32>
    %337 = vector.shape_cast %336 : vector<1x1x128xf32> to vector<128xf32>
    %338 = vector.shape_cast %337 : vector<128xf32> to vector<1x1x1x128xf32>
    %339 = vector.broadcast %338 : vector<1x1x1x128xf32> to vector<1x8x8x128xf32>
    %340 = arith.mulf %335, %339 : vector<1x8x8x128xf32>
    %341 = arith.addf %334, %340 : vector<1x8x8x128xf32>
    %c0_190 = arith.constant 0 : index
    %c6_191 = arith.constant 6 : index
    %c6_192 = arith.constant 6 : index
    %c0_193 = arith.constant 0 : index
    %342 = vector.load %arg1[%c0_190, %c6_191, %c6_192, %c0_193] : memref<1x14x14x128xf32, #tpu.memory_space<vmem>>, vector<1x8x8x128xf32>
    %343 = vector.extract_strided_slice %0 {offsets = [6, 6, 0], sizes = [1, 1, 128], strides = [1, 1, 1]} : vector<7x7x128xf32> to vector<1x1x128xf32>
    %344 = vector.shape_cast %343 : vector<1x1x128xf32> to vector<128xf32>
    %345 = vector.shape_cast %344 : vector<128xf32> to vector<1x1x1x128xf32>
    %346 = vector.broadcast %345 : vector<1x1x1x128xf32> to vector<1x8x8x128xf32>
    %347 = arith.mulf %342, %346 : vector<1x8x8x128xf32>
    %348 = arith.addf %341, %347 : vector<1x8x8x128xf32>
    %349 = vector.shape_cast %348 : vector<1x8x8x128xf32> to vector<64x128xf32>
    %c0_194 = arith.constant 0 : index
    %c0_195 = arith.constant 0 : index
    %c0_196 = arith.constant 0 : index
    %c0_197 = arith.constant 0 : index
    %350 = vector.load %arg2[%c0_194, %c0_195, %c0_196, %c0_197] : memref<1x8x8x128xf32, #tpu.memory_space<vmem>>, vector<1x8x8x128xf32>
    %351 = vector.shape_cast %350 : vector<1x8x8x128xf32> to vector<64x128xf32>
    %cst_198 = arith.constant dense<0.000000e+00> : vector<64xf32>
    %352 = vector.multi_reduction <add>, %349, %cst_198 [1] : vector<64x128xf32> to vector<64xf32>
    %353 = vector.shape_cast %352 : vector<64xf32> to vector<64x1xf32>
    %cst_199 = arith.constant 1.280000e+02 : f32
    %354 = vector.broadcast %cst_199 : f32 to vector<64x1xf32>
    %355 = arith.divf %353, %354 : vector<64x1xf32>
    %356 = vector.broadcast %355 : vector<64x1xf32> to vector<64x128xf32>
    %357 = arith.subf %349, %356 : vector<64x128xf32>
    %358 = arith.mulf %357, %357 : vector<64x128xf32>
    %cst_200 = arith.constant dense<0.000000e+00> : vector<64xf32>
    %359 = vector.multi_reduction <add>, %358, %cst_200 [1] : vector<64x128xf32> to vector<64xf32>
    %360 = vector.shape_cast %359 : vector<64xf32> to vector<64x1xf32>
    %cst_201 = arith.constant 1.280000e+02 : f32
    %361 = vector.broadcast %cst_201 : f32 to vector<64x1xf32>
    %362 = arith.divf %360, %361 : vector<64x1xf32>
    %363 = vector.broadcast %355 : vector<64x1xf32> to vector<64x128xf32>
    %364 = arith.subf %349, %363 : vector<64x128xf32>
    %cst_202 = arith.constant 9.99999997E-7 : f32
    %365 = vector.broadcast %cst_202 : f32 to vector<64x1xf32>
    %366 = arith.addf %362, %365 : vector<64x1xf32>
    %367 = math.rsqrt %366 : vector<64x1xf32>
    %368 = vector.broadcast %367 : vector<64x1xf32> to vector<64x128xf32>
    %369 = arith.mulf %364, %368 : vector<64x128xf32>
    %c0_203 = arith.constant 0 : index
    %c0_204 = arith.constant 0 : index
    %370 = vector.load %arg5[%c0_203, %c0_204] : memref<1x128xf32, #tpu.memory_space<vmem>>, vector<1x128xf32>
    %371 = vector.broadcast %370 : vector<1x128xf32> to vector<64x128xf32>
    %372 = arith.mulf %369, %371 : vector<64x128xf32>
    %c0_205 = arith.constant 0 : index
    %c0_206 = arith.constant 0 : index
    %373 = vector.load %arg6[%c0_205, %c0_206] : memref<1x128xf32, #tpu.memory_space<vmem>>, vector<1x128xf32>
    %374 = vector.broadcast %373 : vector<1x128xf32> to vector<64x128xf32>
    %375 = arith.addf %372, %374 : vector<64x128xf32>
    %376 = arith.truncf %375 : vector<64x128xf32> to vector<64x128xbf16>
    %c0_207 = arith.constant 0 : index
    %c0_208 = arith.constant 0 : index
    %377 = vector.load %arg7[%c0_207, %c0_208] : memref<128x512xbf16, #tpu.memory_space<vmem>>, vector<128x512xbf16>
    %cst_209 = arith.constant dense<0.000000e+00> : vector<64x512xf32>
    %378 = tpu.matmul %376, %377, %cst_209 {dimension_numbers = #tpu.dot_dimension_numbers<[1], [0], [0], [1], [0, 0, 1, 1], [], []>} : vector<64x128xbf16>, vector<128x512xbf16>, vector<64x512xf32> -> vector<64x512xf32>
    %c0_210 = arith.constant 0 : index
    %c0_211 = arith.constant 0 : index
    %379 = vector.load %arg8[%c0_210, %c0_211] : memref<1x512xf32, #tpu.memory_space<vmem>>, vector<1x512xf32>
    %380 = vector.broadcast %379 : vector<1x512xf32> to vector<64x512xf32>
    %381 = arith.addf %378, %380 : vector<64x512xf32>
    %382 = arith.mulf %381, %381 : vector<64x512xf32>
    %383 = arith.mulf %381, %382 : vector<64x512xf32>
    %cst_212 = arith.constant 4.471500e-02 : f32
    %384 = vector.broadcast %cst_212 : f32 to vector<64x512xf32>
    %385 = arith.mulf %384, %383 : vector<64x512xf32>
    %386 = arith.addf %381, %385 : vector<64x512xf32>
    %cst_213 = arith.constant 0.797884583 : f32
    %387 = vector.broadcast %cst_213 : f32 to vector<64x512xf32>
    %388 = arith.mulf %387, %386 : vector<64x512xf32>
    %389 = math.tanh %388 : vector<64x512xf32>
    %cst_214 = arith.constant 1.000000e+00 : f32
    %390 = vector.broadcast %cst_214 : f32 to vector<64x512xf32>
    %391 = arith.addf %390, %389 : vector<64x512xf32>
    %cst_215 = arith.constant 5.000000e-01 : f32
    %392 = vector.broadcast %cst_215 : f32 to vector<64x512xf32>
    %393 = arith.mulf %392, %391 : vector<64x512xf32>
    %394 = arith.mulf %381, %393 : vector<64x512xf32>
    %395 = arith.truncf %394 : vector<64x512xf32> to vector<64x512xbf16>
    %c0_216 = arith.constant 0 : index
    %c0_217 = arith.constant 0 : index
    %396 = vector.load %arg9[%c0_216, %c0_217] : memref<512x128xbf16, #tpu.memory_space<vmem>>, vector<512x128xbf16>
    %cst_218 = arith.constant dense<0.000000e+00> : vector<64x128xf32>
    %397 = tpu.matmul %395, %396, %cst_218 {dimension_numbers = #tpu.dot_dimension_numbers<[1], [0], [0], [1], [0, 0, 1, 1], [], []>} : vector<64x512xbf16>, vector<512x128xbf16>, vector<64x128xf32> -> vector<64x128xf32>
    %c0_219 = arith.constant 0 : index
    %c0_220 = arith.constant 0 : index
    %398 = vector.load %arg10[%c0_219, %c0_220] : memref<1x128xf32, #tpu.memory_space<vmem>>, vector<1x128xf32>
    %399 = vector.broadcast %398 : vector<1x128xf32> to vector<64x128xf32>
    %400 = arith.addf %397, %399 : vector<64x128xf32>
    %c0_221 = arith.constant 0 : index
    %c0_222 = arith.constant 0 : index
    %401 = vector.load %arg11[%c0_221, %c0_222] : memref<1x128xf32, #tpu.memory_space<vmem>>, vector<1x128xf32>
    %402 = vector.broadcast %401 : vector<1x128xf32> to vector<64x128xf32>
    %403 = arith.mulf %402, %400 : vector<64x128xf32>
    %404 = arith.addf %351, %403 : vector<64x128xf32>
    %405 = vector.shape_cast %404 : vector<64x128xf32> to vector<1x8x8x128xf32>
    %c0_223 = arith.constant 0 : index
    %c0_224 = arith.constant 0 : index
    %c0_225 = arith.constant 0 : index
    %c0_226 = arith.constant 0 : index
    %406 = vector.load %arg12[%c0_223, %c0_224, %c0_225, %c0_226] : memref<1x8x8x128xf32, #tpu.memory_space<vmem>>, vector<1x8x8x128xf32>
    tpu.vector_store %arg12[%c0_223, %c0_224, %c0_225, %c0_226], %405 {strides = array<i32>} : memref<1x8x8x128xf32, #tpu.memory_space<vmem>>, vector<1x8x8x128xf32>,
    return
  }
  func.func @transform_0(%arg0: i32) -> (i32, i32, i32, i32) {
    %c0_i32 = arith.constant 0 : i32
    %c0_i32_0 = arith.constant 0 : i32
    %c0_i32_1 = arith.constant 0 : i32
    %c0_i32_2 = arith.constant 0 : i32
    return %arg0, %c0_i32, %c0_i32_0, %c0_i32_1 : i32, i32, i32, i32
  }
  func.func @transform_1(%arg0: i32) -> (i32, i32, i32, i32) {
    %c0_i32 = arith.constant 0 : i32
    %c0_i32_0 = arith.constant 0 : i32
    %c0_i32_1 = arith.constant 0 : i32
    %c0_i32_2 = arith.constant 0 : i32
    return %arg0, %c0_i32, %c0_i32_0, %c0_i32_1 : i32, i32, i32, i32
  }
  func.func @transform_2(%arg0: i32) -> (i32, i32, i32) {
    %c0_i32 = arith.constant 0 : i32
    %c0_i32_0 = arith.constant 0 : i32
    %c0_i32_1 = arith.constant 0 : i32
    %c0_i32_2 = arith.constant 0 : i32
    return %c0_i32, %c0_i32_0, %c0_i32_1 : i32, i32, i32
  }
  func.func @transform_3(%arg0: i32) -> (i32, i32) {
    %c0_i32 = arith.constant 0 : i32
    %c0_i32_0 = arith.constant 0 : i32
    %c0_i32_1 = arith.constant 0 : i32
    return %c0_i32, %c0_i32_0 : i32, i32
  }
  func.func @transform_4(%arg0: i32) -> (i32, i32) {
    %c0_i32 = arith.constant 0 : i32
    %c0_i32_0 = arith.constant 0 : i32
    %c0_i32_1 = arith.constant 0 : i32
    return %c0_i32, %c0_i32_0 : i32, i32
  }
  func.func @transform_5(%arg0: i32) -> (i32, i32) {
    %c0_i32 = arith.constant 0 : i32
    %c0_i32_0 = arith.constant 0 : i32
    %c0_i32_1 = arith.constant 0 : i32
    return %c0_i32, %c0_i32_0 : i32, i32
  }
  func.func @transform_6(%arg0: i32) -> (i32, i32) {
    %c0_i32 = arith.constant 0 : i32
    %c0_i32_0 = arith.constant 0 : i32
    %c0_i32_1 = arith.constant 0 : i32
    return %c0_i32, %c0_i32_0 : i32, i32
  }
  func.func @transform_7(%arg0: i32) -> (i32, i32) {
    %c0_i32 = arith.constant 0 : i32
    %c0_i32_0 = arith.constant 0 : i32
    %c0_i32_1 = arith.constant 0 : i32
    return %c0_i32, %c0_i32_0 : i32, i32
  }
  func.func @transform_8(%arg0: i32) -> (i32, i32) {
    %c0_i32 = arith.constant 0 : i32
    %c0_i32_0 = arith.constant 0 : i32
    %c0_i32_1 = arith.constant 0 : i32
    return %c0_i32, %c0_i32_0 : i32, i32
  }
  func.func @transform_9(%arg0: i32) -> (i32, i32) {
    %c0_i32 = arith.constant 0 : i32
    %c0_i32_0 = arith.constant 0 : i32
    %c0_i32_1 = arith.constant 0 : i32
    return %c0_i32, %c0_i32_0 : i32, i32
  }
  func.func @transform_10(%arg0: i32) -> (i32, i32) {
    %c0_i32 = arith.constant 0 : i32
    %c0_i32_0 = arith.constant 0 : i32
    %c0_i32_1 = arith.constant 0 : i32
    return %c0_i32, %c0_i32_0 : i32, i32
  }
  func.func @transform_11(%arg0: i32) -> (i32, i32, i32, i32) {
    %c0_i32 = arith.constant 0 : i32
    %c0_i32_0 = arith.constant 0 : i32
    %c0_i32_1 = arith.constant 0 : i32
    %c0_i32_2 = arith.constant 0 : i32
    return %arg0, %c0_i32, %c0_i32_0, %c0_i32_1 : i32, i32, i32, i32
  }
}

module attributes {stable_mosaic.version = 11 : i64} {
  func.func @head_kernel(%arg0: memref<2x64x128xf32, #tpu.memory_space<vmem>>, %arg1: memref<1x128xf32, #tpu.memory_space<vmem>>, %arg2: memref<1x128xf32, #tpu.memory_space<vmem>>, %arg3: memref<128x3xf32, #tpu.memory_space<vmem>>, %arg4: memref<1x3xf32, #tpu.memory_space<vmem>>, %arg5: memref<2x3xf32, #tpu.memory_space<vmem>>) attributes {dimension_semantics = [], scalar_prefetch = 0 : i64, scratch_operands = 0 : i64, tpu.core_type = #tpu.core_type<tc>} {
    %c0 = arith.constant 0 : index
    %c0_0 = arith.constant 0 : index
    %c0_1 = arith.constant 0 : index
    %0 = vector.load %arg0[%c0, %c0_0, %c0_1] : memref<2x64x128xf32, #tpu.memory_space<vmem>>, vector<2x64x128xf32>
    %cst = arith.constant dense<0.000000e+00> : vector<2x128xf32>
    %1 = vector.multi_reduction <add>, %0, %cst [1] : vector<2x64x128xf32> to vector<2x128xf32>
    %cst_2 = arith.constant 6.400000e+01 : f32
    %2 = vector.broadcast %cst_2 : f32 to vector<2x128xf32>
    %3 = arith.divf %1, %2 : vector<2x128xf32>
    %cst_3 = arith.constant dense<0.000000e+00> : vector<2xf32>
    %4 = vector.multi_reduction <add>, %3, %cst_3 [1] : vector<2x128xf32> to vector<2xf32>
    %5 = vector.shape_cast %4 : vector<2xf32> to vector<2x1xf32>
    %cst_4 = arith.constant 1.280000e+02 : f32
    %6 = vector.broadcast %cst_4 : f32 to vector<2x1xf32>
    %7 = arith.divf %5, %6 : vector<2x1xf32>
    %8 = vector.broadcast %7 : vector<2x1xf32> to vector<2x128xf32>
    %9 = arith.subf %3, %8 : vector<2x128xf32>
    %10 = arith.mulf %9, %9 : vector<2x128xf32>
    %cst_5 = arith.constant dense<0.000000e+00> : vector<2xf32>
    %11 = vector.multi_reduction <add>, %10, %cst_5 [1] : vector<2x128xf32> to vector<2xf32>
    %12 = vector.shape_cast %11 : vector<2xf32> to vector<2x1xf32>
    %cst_6 = arith.constant 1.280000e+02 : f32
    %13 = vector.broadcast %cst_6 : f32 to vector<2x1xf32>
    %14 = arith.divf %12, %13 : vector<2x1xf32>
    %15 = vector.broadcast %7 : vector<2x1xf32> to vector<2x128xf32>
    %16 = arith.subf %3, %15 : vector<2x128xf32>
    %cst_7 = arith.constant 9.99999997E-7 : f32
    %17 = vector.broadcast %cst_7 : f32 to vector<2x1xf32>
    %18 = arith.addf %14, %17 : vector<2x1xf32>
    %19 = math.rsqrt %18 : vector<2x1xf32>
    %20 = vector.broadcast %19 : vector<2x1xf32> to vector<2x128xf32>
    %21 = arith.mulf %16, %20 : vector<2x128xf32>
    %c0_8 = arith.constant 0 : index
    %c0_9 = arith.constant 0 : index
    %22 = vector.load %arg1[%c0_8, %c0_9] : memref<1x128xf32, #tpu.memory_space<vmem>>, vector<1x128xf32>
    %23 = vector.broadcast %22 : vector<1x128xf32> to vector<2x128xf32>
    %24 = arith.mulf %21, %23 : vector<2x128xf32>
    %c0_10 = arith.constant 0 : index
    %c0_11 = arith.constant 0 : index
    %25 = vector.load %arg2[%c0_10, %c0_11] : memref<1x128xf32, #tpu.memory_space<vmem>>, vector<1x128xf32>
    %26 = vector.broadcast %25 : vector<1x128xf32> to vector<2x128xf32>
    %27 = arith.addf %24, %26 : vector<2x128xf32>
    %c0_12 = arith.constant 0 : index
    %c0_13 = arith.constant 0 : index
    %28 = vector.load %arg3[%c0_12, %c0_13] : memref<128x3xf32, #tpu.memory_space<vmem>>, vector<128x3xf32>
    %cst_14 = arith.constant dense<0.000000e+00> : vector<2x3xf32>
    %29 = tpu.matmul %27, %28, %cst_14 {dimension_numbers = #tpu.dot_dimension_numbers<[1], [0], [0], [1], [0, 0, 1, 1], [], []>} : vector<2x128xf32>, vector<128x3xf32>, vector<2x3xf32> -> vector<2x3xf32>
    %c0_15 = arith.constant 0 : index
    %c0_16 = arith.constant 0 : index
    %30 = vector.load %arg4[%c0_15, %c0_16] : memref<1x3xf32, #tpu.memory_space<vmem>>, vector<1x3xf32>
    %31 = vector.broadcast %30 : vector<1x3xf32> to vector<2x3xf32>
    %32 = arith.addf %29, %31 : vector<2x3xf32>
    %c0_17 = arith.constant 0 : index
    %c0_18 = arith.constant 0 : index
    %33 = vector.load %arg5[%c0_17, %c0_18] : memref<2x3xf32, #tpu.memory_space<vmem>>, vector<2x3xf32>
    tpu.vector_store %arg5[%c0_17, %c0_18], %32 {strides = array<i32>} : memref<2x3xf32, #tpu.memory_space<vmem>>, vector<2x3xf32>,
    return
  }
}

</mosaic_0001>

<bundles_post_ra>
// kernel: base_model_forward.3
= control target key start
LH: loop header
LB: loop body
LE: loop exit
PB: predicated region body
PF: predicated region fallthrough
CT: control target
= control target key end

     0   :  { %s646_s18 = smov 0   ;;  %s742_s0 = inlined_call_operand.vmem [shape: f32[128,48], index: 0, kind: input, shape index: {}]   ;;  %s743_s1 = inlined_call_operand.vmem [shape: bf16[48,128], index: 1, kind: input, shape index: {}]   ;;  %s744_s2 = inlined_call_operand.vmem [shape: f32[1,128], index: 2, kind: input, shape index: {}]   ;;  %s745_s3 = inlined_call_operand.vmem [shape: f32[1,128], index: 3, kind: input, shape index: {}]   ;;  %s746_s4 = inlined_call_operand.vmem [shape: f32[1,128], index: 4, kind: input, shape index: {}]   ;;  %s747_s5 = inlined_call_operand.vmem [shape: f32[128,128], index: 5, kind: output, shape index: {}]  }
   0x1 LB: > { %s533_s19 = sadd.s32 4294967295, %s614_s18   ;;  %p537_p0 = scmp.ge.s32.totalorder %s614_s18, 1  ;;  %s614_s18 = sphi %s646_s18, %s15_s18  }
   0x2   : > { %p188_p1 = scmp.lt.s32.totalorder %s614_s18, 3 }
   0x4   : > { %p189_p2 = pnand %p537_p0, %p188_p1 }
   0x5   : > { %s538_s22 = sshll.u32 (!%p189_p2), %s533_s19, 3 }
   0x6   : > { %192 = sbr.rel (%p189_p2) target bundleno = 544 (0x220), region = 40  ;;  %p217_p3 = scmp.lt.s32.totalorder (!%p189_p2), %s538_s22, 15 }
   0xb   : > { %v589_v0 = vld [vmem:[%s743_s1 + $0x10] sm:$0xff]   ;;  %v590_v1 = vld [vmem:[%s743_s1 + $0x8] sm:$0xff]   ;;  %s749_s22 = smov (!%p217_p3, %s538_s22), 15  ;;  %v591_v2 = vld [vmem:[%s743_s1] sm:$0xff]   ;;  %vm272_vm0 = vcmask 392192  }
   0xc   : > { %561 = vmatprep.subr.bf16.mxu0 %v589_v0  ;;  %575 = vmatprep.subr.bf16.mxu1 %v589_v0  ;;  %s539_s27 = sshll.u32 %s749_s22, 3  ;;  %v542_v15 = vld [vmem:[%s744_s2] ss:$0 sm:$0xff] }
   0xd   : > { %562 = vmatpush3.bf16.msra.mxu0 %v589_v0  ;;  %578 = vmatpush3.bf16.msra.mxu1 %v589_v0  ;;  %s220_s30 = scalar_lea.vmem %s742_s0, %s539_s27  ;;  %s722_s14 = scalar_lea.vmem %s747_s5, %s539_s27 }
   0xe   : > { %563 = vmatprep.subr.bf16.mxu0 %v590_v1  ;;  %576 = vmatprep.subr.bf16.mxu1 %v590_v1  ;;  %v229_v3 = vld [vmem:[%s220_s30] sm:$0xff]  ;;  %v230_v4 = vld [vmem:[%s220_s30 + $0x8] sm:$0xff]  ;;  %v231_v8 = vld [vmem:[%s220_s30 + $0x10] sm:$0xff] }
   0xf   : > { %v233_v5 = vld [vmem:[%s220_s30 + $0x20] sm:$0xff]  ;;  %v237_v6 = vpack.c.bf16 %v230_v4, %v229_v3  ;;  %v234_v7 = vld [vmem:[%s220_s30 + $0x28] sm:$0xff]  ;;  %v232_v9 = vld [vmem:[%s220_s30 + $0x18] sm:$0xff] }
  0x10   : > { %v239_v10 = vpack.c.bf16 %v234_v7, %v233_v5  ;;  %v235_v11 = vld [vmem:[%s220_s30 + $0x30] sm:$0xff]  ;;  %v236_v12 = vld [vmem:[%s220_s30 + $0x38] sm:$0xff]  ;;  %v238_v13 = vpack.c.bf16 %v232_v9, %v231_v8 }
  0x11   : > { %564 = vmatpush3.bf16.msra.mxu0 %v590_v1  ;;  %579 = vmatpush3.bf16.msra.mxu1 %v590_v1  ;;  %v240_v14 = vpack.c.bf16 %v236_v12, %v235_v11 }
  0x12   : > { %565 = vmatprep.subr.bf16.mxu0 %v591_v2  ;;  %577 = vmatprep.subr.bf16.mxu1 %v591_v2 }
  0x13   : > { %567 = vmatprep.mubr.msk.bf16.mxu0 %vm272_vm0, %v237_v6  ;;  %571 = vmatprep.mubr.msk.bf16.mxu1 %vm272_vm0, %v239_v10 }
  0x15   : > { %566 = vmatpush3.bf16.msra.mxu0 %v591_v2  ;;  %580 = vmatpush3.bf16.msra.mxu1 %v591_v2 }
  0x18   : > { %568 = vmatmul.mubr.msk.bf16.vlgmr.msra.gmra.mxu0 %vm272_vm0, %v238_v13  ;;  %572 = vmatmul.mubr.msk.bf16.vlgmr.msra.gmra.mxu1 %vm272_vm0, %v240_v14 }
  0xd8   : > { %v569_v16 = vpop.f32.mrf.mxu0  ;;  %v573_v17 = vpop.f32.mrf.mxu1 }
  0xd9   : > { %v328_v18 = vadd.f32 %v569_v16, %v542_v15  ;;  %v344_v31 = vadd.f32 %v573_v17, %v542_v15 }
  0xda   : > { %v319_v19 = vpop.f32.mrf.mxu0  ;;  %v335_v20 = vpop.f32.mrf.mxu1 }
  0xdb   : > { %v320_v21 = vadd.f32 %v542_v15, %v319_v19  ;;  %354 = vadd.xlane.f32.xlu1 %v328_v18  ;;  %v336_v26 = vadd.f32 %v542_v15, %v335_v20 }
  0xdc   : > { %v570_v22 = vpop.f32.mrf.mxu0  ;;  %v574_v23 = vpop.f32.mrf.mxu1 }
  0xdd   : > { %v331_v24 = vadd.f32 %v570_v22, %v542_v15  ;;  %350 = vadd.xlane.f32.xlu0 %v320_v21  ;;  %v347_v30 = vadd.f32 %v574_v23, %v542_v15  ;;  %v550_v22 = vld [vmem:[%s745_s3] ss:$0 sm:$0xff] }
  0xde   : > { %v338_v25 = vpop.f32.mrf.mxu1  ;;  %v322_v27 = vpop.f32.mrf.mxu0 }
  0xdf   : > { %356 = vadd.xlane.f32.xlu1 %v331_v24  ;;  %v339_v28 = vadd.f32 %v542_v15, %v338_v25  ;;  %v323_v29 = vadd.f32 %v542_v15, %v322_v27 }
  0xe1   : > { %358 = vadd.xlane.f32.xlu0 %v336_v26 }
  0xe3   : > { %360 = vadd.xlane.f32.xlu1 %v339_v28 }
  0xe5   : > { %352 = vadd.xlane.f32.xlu0 %v323_v29 }
  0xe7   : > { %364 = vadd.xlane.f32.xlu1 %v347_v30 }
  0xe9   : > { %362 = vadd.xlane.f32.xlu0 %v344_v31 }
 0x164   : > { %v355_v32 = vpop.xlane.xlu1 %354 }
 0x165   : > { %v369_v33 = vmul.f32 0.0078125, %v355_v32 }
 0x166   : > { %v351_v34 = vpop.xlane.xlu0 %350 }
 0x167   : > { %v678_v35 = vsub.f32 %v328_v18, %v369_v33  ;;  %v367_v36 = vmul.f32 0.0078125, %v351_v34 }
 0x168   : > { %v357_v37 = vpop.xlane.xlu1 %356 }
 0x169   : > { %v680_v38 = vsub.f32 %v320_v21, %v367_v36  ;;  %v370_v39 = vmul.f32 0.0078125, %v357_v37  ;;  %v385_v40 = vmul.f32 %v678_v35, %v678_v35 }
 0x16a   : > { %v359_v41 = vpop.xlane.xlu0 %358 }
 0x16b   : > { %v684_v42 = vsub.f32 %v331_v24, %v370_v39  ;;  %v371_v43 = vmul.f32 0.0078125, %v359_v41  ;;  %395 = vadd.xlane.f32.xlu0 %v385_v40  ;;  %v383_v47 = vmul.f32 %v680_v38, %v680_v38 }
 0x16c   : > { %v361_v44 = vpop.xlane.xlu1 %360 }
 0x16d   : > { %v686_v45 = vsub.f32 %v336_v26, %v371_v43  ;;  %v386_v46 = vmul.f32 %v684_v42, %v684_v42  ;;  %v372_v49 = vmul.f32 0.0078125, %v361_v44  ;;  %v551_v26 = vld [vmem:[%s746_s4] ss:$0 sm:$0xff] }
 0x16e   : > { %v353_v48 = vpop.xlane.xlu0 %352 }
 0x16f   : > { %v368_v50 = vmul.f32 0.0078125, %v353_v48  ;;  %397 = vadd.xlane.f32.xlu1 %v386_v46  ;;  %391 = vadd.xlane.f32.xlu0 %v383_v47  ;;  %v387_v53 = vmul.f32 %v686_v45, %v686_v45  ;;  %v696_v55 = vsub.f32 %v339_v28, %v372_v49 }
 0x170   : > { %v365_v51 = vpop.xlane.xlu1 %364 }
 0x171   : > { %v692_v52 = vsub.f32 %v323_v29, %v368_v50  ;;  %v374_v56 = vmul.f32 0.0078125, %v365_v51  ;;  %v388_v61 = vmul.f32 %v696_v55, %v696_v55 }
 0x172   : > { %v363_v54 = vpop.xlane.xlu0 %362 }
 0x173   : > { %v373_v57 = vmul.f32 0.0078125, %v363_v54  ;;  %399 = vadd.xlane.f32.xlu0 %v387_v53  ;;  %v384_v58 = vmul.f32 %v692_v52, %v692_v52  ;;  %v702_v60 = vsub.f32 %v347_v30, %v374_v56 }
 0x175   : > { %v700_v59 = vsub.f32 %v344_v31, %v373_v57  ;;  %393 = vadd.xlane.f32.xlu1 %v384_v58  ;;  %v390_v63 = vmul.f32 %v702_v60, %v702_v60 }
 0x177   : > { %v389_v62 = vmul.f32 %v700_v59, %v700_v59 }
 0x179   : > { %401 = vadd.xlane.f32.xlu1 %v388_v61  ;;  %403 = vadd.xlane.f32.xlu0 %v389_v62 }
 0x17d   : > { %405 = vadd.xlane.f32.xlu1 %v390_v63 }
 0x1f4   : > { %v396_v0 = vpop.xlane.xlu0 %395 }
 0x1f5   : > { %v409_v1 = vmul.f32 0.0078125, %v396_v0 }
 0x1f7   : > { %v417_v2 = vadd.f32 1e-06, %v409_v1 }
 0x1f8   : > { %v398_v3 = vpop.xlane.xlu1 %397  ;;  %v392_v4 = vpop.xlane.xlu0 %391 }
 0x1f9   : > { %592 = vrsqrt.f32 %v417_v2  ;;  %v410_v5 = vmul.f32 0.0078125, %v398_v3  ;;  %v407_v6 = vmul.f32 0.0078125, %v392_v4 }
 0x1fb   : > { %v418_v7 = vadd.f32 1e-06, %v410_v5  ;;  %v415_v8 = vadd.f32 1e-06, %v407_v6 }
 0x1fc   : > { %v400_v9 = vpop.xlane.xlu0 %399 }
 0x1fd   : > { %594 = vrsqrt.f32 %v418_v7  ;;  %v411_v10 = vmul.f32 0.0078125, %v400_v9 }
 0x1fe   : > { %596 = vrsqrt.f32 %v415_v8  ;;  %v394_v11 = vpop.xlane.xlu1 %393 }
 0x1ff   : > { %v419_v12 = vadd.f32 1e-06, %v411_v10  ;;  %v408_v13 = vmul.f32 0.0078125, %v394_v11 }
 0x201   : > { %598 = vrsqrt.f32 %v419_v12  ;;  %v416_v14 = vadd.f32 1e-06, %v408_v13 }
 0x202   : > { %v402_v15 = vpop.xlane.xlu1 %401  ;;  %v404_v16 = vpop.xlane.xlu0 %403 }
 0x203   : > { %600 = vrsqrt.f32 %v416_v14  ;;  %v412_v17 = vmul.f32 0.0078125, %v402_v15  ;;  %v413_v18 = vmul.f32 0.0078125, %v404_v16 }
 0x205   : > { %v420_v19 = vadd.f32 1e-06, %v412_v17  ;;  %v421_v20 = vadd.f32 1e-06, %v413_v18 }
 0x206   : > { %v593_v21 = vpop.eup %592  ;;  %v406_v23 = vpop.xlane.xlu1 %405 }
 0x207   : > { %v433_v24 = vmul.f32 %v593_v21, %v678_v35  ;;  %602 = vrsqrt.f32 %v420_v19  ;;  %v414_v25 = vmul.f32 0.0078125, %v406_v23 }
 0x208   : > { %604 = vrsqrt.f32 %v421_v20 }
 0x209   : > { %v448_v27 = vmul.f32 %v550_v22, %v433_v24  ;;  %v422_v28 = vadd.f32 1e-06, %v414_v25 }
 0x20a   : > { %v595_v29 = vpop.eup %594 }
 0x20b   : > { %v597_v30 = vpop.eup %596  ;;  %v463_v31 = vadd.f32 %v551_v26, %v448_v27  ;;  %v434_v32 = vmul.f32 %v595_v29, %v684_v42  ;;  %606 = vrsqrt.f32 %v422_v28 }
 0x20c   : > { %v431_v33 = vmul.f32 %v597_v30, %v680_v38 }
 0x20d   : > { %471 = vst [vmem:[%s722_s14 + $0x10] sm:$0xff] %v463_v31  ;;  %v449_v34 = vmul.f32 %v550_v22, %v434_v32 }
 0x20e   : > { %v599_v35 = vpop.eup %598  ;;  %v446_v36 = vmul.f32 %v550_v22, %v431_v33 }
 0x20f   : > { %v464_v37 = vadd.f32 %v551_v26, %v449_v34  ;;  %v435_v39 = vmul.f32 %v599_v35, %v686_v45 }
 0x210   : > { %v601_v40 = vpop.eup %600  ;;  %v461_v41 = vadd.f32 %v551_v26, %v446_v36 }
 0x211   : > { %472 = vst [vmem:[%s722_s14 + $0x18] sm:$0xff] %v464_v37  ;;  %v450_v43 = vmul.f32 %v550_v22, %v435_v39  ;;  %v432_v44 = vmul.f32 %v601_v40, %v692_v52 }
 0x212   : > { %469 = vst [vmem:[%s722_s14] sm:$0xff] %v461_v41 }
 0x213   : > { %v465_v42 = vadd.f32 %v551_v26, %v450_v43  ;;  %v447_v46 = vmul.f32 %v550_v22, %v432_v44 }
 0x214   : > { %v603_v38 = vpop.eup %602 }
 0x215   : > { %v605_v47 = vpop.eup %604  ;;  %473 = vst [vmem:[%s722_s14 + $0x20] sm:$0xff] %v465_v42  ;;  %v462_v48 = vadd.f32 %v551_v26, %v447_v46  ;;  %v436_v49 = vmul.f32 %v603_v38, %v696_v55 }
 0x216   : > { %v437_v45 = vmul.f32 %v605_v47, %v700_v59 }
 0x217   : > { %470 = vst [vmem:[%s722_s14 + $0x8] sm:$0xff] %v462_v48  ;;  %v451_v50 = vmul.f32 %v550_v22, %v436_v49 }
 0x218   : > { %v607_v51 = vpop.eup %606  ;;  %v452_v53 = vmul.f32 %v550_v22, %v437_v45 }
 0x219   : > { %v466_v54 = vadd.f32 %v551_v26, %v451_v50  ;;  %v438_v52 = vmul.f32 %v607_v51, %v702_v60 }
 0x21a   : > { %v467_v56 = vadd.f32 %v551_v26, %v452_v53 }
 0x21b   : > { %474 = vst [vmem:[%s722_s14 + $0x28] sm:$0xff] %v466_v54  ;;  %v453_v57 = vmul.f32 %v550_v22, %v438_v52 }
 0x21c   : > { %475 = vst [vmem:[%s722_s14 + $0x30] sm:$0xff] %v467_v56 }
 0x21d   : > { %v468_v58 = vadd.f32 %v551_v26, %v453_v57 }
 0x21f   : > { %476 = vst [vmem:[%s722_s14 + $0x38] sm:$0xff] %v468_v58 }
 0x220 PF: > { %s15_s18 = sadd.s32 1, %s614_s18  }
 0x221   : > { %p12_p4 = scmp.ge.s32.totalorder %s15_s18, 4  }
 0x223   :  { %14 = sbr.rel (!%p12_p4) target bundleno = 1 (0x1), region = 70 }

// kernel: base_model_forward.5
= control target key start
LH: loop header
LB: loop body
LE: loop exit
PB: predicated region body
PF: predicated region fallthrough
CT: control target
= control target key end

     0   :  { %s462_s0 = inlined_call_operand.vmem [shape: f32[2,64,128], index: 0, kind: input, shape index: {}]   ;;  %s463_s1 = inlined_call_operand.vmem [shape: f32[1,128], index: 1, kind: input, shape index: {}]   ;;  %s464_s2 = inlined_call_operand.vmem [shape: f32[1,128], index: 2, kind: input, shape index: {}]   ;;  %s465_s3 = inlined_call_operand.vmem [shape: f32[128,3], index: 3, kind: input, shape index: {}]   ;;  %s466_s4 = inlined_call_operand.vmem [shape: f32[1,3], index: 4, kind: input, shape index: {}]   ;;  %s467_s5 = inlined_call_operand.hbm [shape: f32[2,3], index: 5, kind: output, shape index: {}]  }
   0x1   :  { %v21_v0 = vld [vmem:[%s462_s0] sm:$0xff]  ;;  %v22_v1 = vld [vmem:[%s462_s0 + $0x8] sm:$0xff]  ;;  %v23_v2 = vld [vmem:[%s462_s0 + $0x10] sm:$0xff] }
   0x2   :  { %v37_v3 = vadd.f32 %v22_v1, %v21_v0  ;;  %v24_v4 = vld [vmem:[%s462_s0 + $0x18] sm:$0xff]  ;;  %v29_v5 = vld [vmem:[%s462_s0 + $0x40] sm:$0xff]  ;;  %v30_v6 = vld [vmem:[%s462_s0 + $0x48] sm:$0xff] }
   0x3   :  { %v31_v7 = vld [vmem:[%s462_s0 + $0x50] sm:$0xff]  ;;  %v25_v9 = vld [vmem:[%s462_s0 + $0x20] sm:$0xff]  ;;  %v50_v10 = vadd.f32 %v30_v6, %v29_v5  ;;  %v32_v11 = vld [vmem:[%s462_s0 + $0x58] sm:$0xff] }
   0x4   :  { %v38_v8 = vadd.f32 %v37_v3, %v23_v2 }
   0x6   :  { %v39_v12 = vadd.f32 %v38_v8, %v24_v4 }
   0x7   :  { %10 = vsyncpa [#allocation3], 0  ;;  %v26_v13 = vld [vmem:[%s462_s0 + $0x28] sm:$0xff]  ;;  %v51_v14 = vadd.f32 %v50_v10, %v31_v7  ;;  %v33_v15 = vld [vmem:[%s462_s0 + $0x60] sm:$0xff]  ;;  %vm68_vm0 = vcmask 1041409   ;;  %vm71_vm1 = vcmask 1041408  }
   0x8   :  { %v40_v16 = vadd.f32 %v39_v12, %v25_v9  ;;  %v27_v17 = vld [vmem:[%s462_s0 + $0x30] sm:$0xff]  ;;  %v34_v19 = vld [vmem:[%s462_s0 + $0x68] sm:$0xff]  ;;  %v28_v21 = vld [vmem:[%s462_s0 + $0x38] sm:$0xff]  ;;  %v316_v47 = vmov 0.0   ;;  %vm317_vm2 = vmmov 0   ;;  %s318_s10 = smov [#allocation2]  }
   0x9   :  { %v52_v18 = vadd.f32 %v51_v14, %v32_v11  ;;  %v35_v23 = vld [vmem:[%s462_s0 + $0x70] sm:$0xff]  ;;  %v36_v26 = vld [vmem:[%s462_s0 + $0x78] sm:$0xff]  ;;  %254 = vmatprep.subr.mxu0 %v316_v47  ;;  %v133_v59 = vld [vmem:[%s465_s3 + $0x68] sm:$0xff]  ;;  %286 = vmatprep.mubr.msk.f32.mxu0 %vm317_vm2, %v316_v47  ;;  %s226_s11 = sshll.u32 %s318_s10, 4  ;;  %vm218_vm3 = vcmask 17408   ;;  %s227_s11 = int_to_ptr.vmem [resolvable:$true] %s226_s11 }
   0xa   :  { %v41_v20 = vadd.f32 %v40_v16, %v26_v13  ;;  %v135_v46 = vld [vmem:[%s465_s3 + $0x78] sm:$0xff]  ;;  %v134_v58 = vld [vmem:[%s465_s3 + $0x70] sm:$0xff]  ;;  %v132_v60 = vld [vmem:[%s465_s3 + $0x60] sm:$0xff]  ;;  %p299_p1 = scmp.lt.s32.totalorder %s227_s11, %s227_s11 }
   0xb   :  { %v53_v22 = vadd.f32 %v52_v18, %v33_v15  ;;  %255 = vmatpush3.msra.mxu0 %v135_v46  ;;  %v131_v61 = vld [vmem:[%s465_s3 + $0x58] sm:$0xff]  ;;  %v130_v62 = vld [vmem:[%s465_s3 + $0x50] sm:$0xff]  ;;  %v129_v63 = vld [vmem:[%s465_s3 + $0x48] sm:$0xff] }
   0xc   :  { %v42_v24 = vadd.f32 %v41_v20, %v27_v17  ;;  %256 = vmatprep.subr.mxu0 %v316_v47  ;;  %v128_v0 = vld [vmem:[%s465_s3 + $0x40] sm:$0xff]  ;;  %v127_v1 = vld [vmem:[%s465_s3 + $0x38] sm:$0xff]  ;;  %v126_v2 = vld [vmem:[%s465_s3 + $0x30] sm:$0xff] }
   0xd   :  { %v54_v25 = vadd.f32 %v53_v22, %v34_v19  ;;  %257 = vmatpush3.msra.mxu0 %v134_v58  ;;  %v125_v3 = vld [vmem:[%s465_s3 + $0x28] sm:$0xff]  ;;  %v124_v4 = vld [vmem:[%s465_s3 + $0x20] sm:$0xff]  ;;  %v123_v5 = vld [vmem:[%s465_s3 + $0x18] sm:$0xff] }
   0xe   :  { %v43_v27 = vadd.f32 %v42_v24, %v28_v21  ;;  %258 = vmatprep.subr.mxu0 %v316_v47  ;;  %v122_v6 = vld [vmem:[%s465_s3 + $0x10] sm:$0xff]  ;;  %v121_v7 = vld [vmem:[%s465_s3 + $0x8] sm:$0xff]  ;;  %v120_v8 = vld [vmem:[%s465_s3] sm:$0xff] }
   0xf   :  { %v55_v28 = vadd.f32 %v54_v25, %v35_v23  ;;  %259 = vmatpush3.msra.mxu0 %v133_v59  ;;  %v234_v15 = vld [vmem:[%s463_s1] ss:$0 sm:$0xff]  ;;  %s294_s1 = scalar_lea.vmem %s227_s11, 32 }
  0x10   :  { %v44_v29 = vrot.slane %v43_v27, 4  ;;  %260 = vmatprep.subr.mxu0 %v316_v47  ;;  %v235_v19 = vld [vmem:[%s464_s2] ss:$0 sm:$0xff]  ;;  %p295_p0 = scmp.ne.s32.totalorder %s227_s11, %s294_s1  ;;  %p300_p2 = scmp.lt.s32.totalorder %s294_s1, %s294_s1 }
  0x11   :  { %v56_v30 = vadd.f32 %v55_v28, %v36_v26  ;;  %261 = vmatpush3.msra.mxu0 %v132_v60  ;;  %v236_v24 = vld [vmem:[%s466_s4] ss:$0 sm:$0xff] }
  0x12   :  { %v45_v31 = vadd.f32 %v44_v29, %v43_v27  ;;  %262 = vmatprep.subr.mxu0 %v316_v47  ;;  %p301_p3 = por %p300_p2, %p299_p1 }
  0x13   :  { %v57_v32 = vrot.slane %v56_v30, 4  ;;  %263 = vmatpush3.msra.mxu0 %v131_v61 }
  0x14   :  { %v46_v33 = vrot.slane %v45_v31, 2  ;;  %264 = vmatprep.subr.mxu0 %v316_v47  ;;  %p302_p4 = pnand %p301_p3, %p295_p0 }
  0x15   :  { %v58_v34 = vadd.f32 %v57_v32, %v56_v30  ;;  %265 = vmatpush3.msra.mxu0 %v130_v62 }
  0x16   :  { %v47_v35 = vadd.f32 %v46_v33, %v45_v31  ;;  %266 = vmatprep.subr.mxu0 %v316_v47 }
  0x17   :  { %v59_v36 = vrot.slane %v58_v34, 2  ;;  %267 = vmatpush3.msra.mxu0 %v129_v63 }
  0x18   :  { %v48_v37 = vrot.slane %v47_v35, 1  ;;  %268 = vmatprep.subr.mxu0 %v316_v47 }
  0x19   :  { %v60_v38 = vadd.f32 %v59_v36, %v58_v34  ;;  %269 = vmatpush3.msra.mxu0 %v128_v0 }
  0x1a   :  { %v49_v39 = vadd.f32 %v48_v37, %v47_v35  ;;  %270 = vmatprep.subr.mxu0 %v316_v47 }
  0x1b   :  { %v61_v40 = vrot.slane %v60_v38, 1  ;;  %271 = vmatpush3.msra.mxu0 %v127_v1 }
  0x1c   :  { %v64_v42 = vmul.f32 0.015625, %v49_v39  ;;  %272 = vmatprep.subr.mxu0 %v316_v47 }
  0x1d   :  { %v62_v41 = vadd.f32 %v61_v40, %v60_v38  ;;  %273 = vmatpush3.msra.mxu0 %v126_v2 }
  0x1e   :  { %274 = vmatprep.subr.mxu0 %v316_v47 }
  0x1f   :  { %v65_v43 = vmul.f32 0.015625, %v62_v41  ;;  %275 = vmatpush3.msra.mxu0 %v125_v3 }
  0x20   :  { %276 = vmatprep.subr.mxu0 %v316_v47 }
  0x21   :  { %v69_v44 = vsel %vm68_vm0, %v65_v43, %v64_v42  ;;  %277 = vmatpush3.msra.mxu0 %v124_v4 }
  0x22   :  { %v72_v45 = vsel %vm71_vm1, %v69_v44, 0.0  ;;  %278 = vmatprep.subr.mxu0 %v316_v47 }
  0x23   :  { %73 = vadd.xlane.f32.xlu0 %v72_v45  ;;  %279 = vmatpush3.msra.mxu0 %v123_v5 }
  0x24   :  { %280 = vmatprep.subr.mxu0 %v316_v47 }
  0x25   :  { %281 = vmatpush3.msra.mxu0 %v122_v6 }
  0x26   :  { %282 = vmatprep.subr.mxu0 %v316_v47 }
  0x27   :  { %283 = vmatpush3.msra.mxu0 %v121_v7 }
  0x28   :  { %284 = vmatprep.subr.mxu0 %v316_v47 }
  0x29   :  { %285 = vmatpush3.msra.mxu0 %v120_v8 }
  0xac   :  { %v74_v48 = vpop.xlane.xlu0 %73 }
  0xad   :  { %v76_v49 = vmul.f32 0.0078125, %v74_v48 }
  0xaf   :  { %v78_v50 = vrot.slane %v76_v49, 1  ;;  %v81_v51 = vsub.f32 %v64_v42, %v76_v49 }
  0xb1   :  { %v82_v52 = vsub.f32 %v65_v43, %v78_v50  ;;  %v83_v54 = vmul.f32 %v81_v51, %v81_v51 }
  0xb3   :  { %v84_v53 = vmul.f32 %v82_v52, %v82_v52 }
  0xb5   :  { %v87_v55 = vrot.slane %v84_v53, 7 }
  0xb7   :  { %v88_v56 = vsel %vm68_vm0, %v87_v55, %v83_v54 }
  0xb8   :  { %v90_v57 = vsel %vm71_vm1, %v88_v56, 0.0 }
  0xb9   :  { %91 = vadd.xlane.f32.xlu0 %v90_v57 }
 0x142   :  { %v92_v9 = vpop.xlane.xlu0 %91 }
 0x143   :  { %v93_v10 = vmul.f32 0.0078125, %v92_v9 }
 0x145   :  { %v94_v11 = vadd.f32 1e-06, %v93_v10 }
 0x147   :  { %292 = vrsqrt.f32 %v94_v11 }
 0x154   :  { %v293_v12 = vpop.eup %292 }
 0x155   :  { %v97_v13 = vrot.slane %v293_v12, 1  ;;  %v100_v14 = vmul.f32 %v293_v12, %v81_v51 }
 0x157   :  { %v101_v16 = vmul.f32 %v97_v13, %v82_v52  ;;  %v109_v17 = vmul.f32 %v234_v15, %v100_v14 }
 0x159   :  { %v110_v18 = vmul.f32 %v234_v15, %v101_v16  ;;  %v118_v21 = vadd.f32 %v235_v19, %v109_v17 }
 0x15b   :  { %v119_v20 = vadd.f32 %v235_v19, %v110_v18 }
 0x15d   :  { %v145_v22 = vrot.slane %v119_v20, 7 }
 0x15f   :  { %v146_v23 = vsel %vm68_vm0, %v145_v22, %v118_v21 }
 0x160   :  { %287 = vmatmul.mubr.f32.vlgmr.msra.gmra.mxu0 %v146_v23 }
 0x220   :  { %v214_v25 = vpop.f32.mrf.mxu0 }
 0x221   :  { %v215_v26 = vadd.f32 %v236_v24, %v214_v25 }
 0x222   :  { %v288_v27 = vpop.f32.mrf.mxu0 }
 0x223   :  { %219 = vst.msk [vmem:[#allocation2] sm:$0x3] %vm218_vm3, %v215_v26 }
 0x224   :  { %305 = shalt.err (!%p302_p4)
}
 0x225   :  { %229 = dma.vmem_to_hbm [thread:$0]  %s227_s11, 32, %s467_s5, [#allocation3]  }
 0x226   :  { %314 = dma.done.wait [#allocation3], 32  }
 0x227   :  { %315 = vsyncadd [#allocation3], 4294967264 }
 0x228   :  { %233 = vsyncpa [#allocation3], 1 }

// kernel: base_model_forward.4
= control target key start
LH: loop header
LB: loop body
LE: loop exit
PB: predicated region body
PF: predicated region fallthrough
CT: control target
= control target key end

     0   :  { %s3826_s17 = smov 0   ;;  %s5907_s0 = inlined_call_operand.vmem [shape: f32[2,14,14,128], index: 0, kind: input, shape index: {}]   ;;  %s5908_s1 = inlined_call_operand.vmem [shape: f32[2,8,8,128], index: 1, kind: input, shape index: {}]   ;;  %s5909_s2 = inlined_call_operand.vmem [shape: f32[7,7,128], index: 2, kind: input, shape index: {}]   ;;  %s5910_s3 = inlined_call_operand.vmem [shape: f32[1,128], index: 3, kind: input, shape index: {}]   ;;  %s5911_s4 = inlined_call_operand.vmem [shape: f32[1,128], index: 4, kind: input, shape index: {}]   ;;  %s5912_s5 = inlined_call_operand.vmem [shape: f32[1,128], index: 5, kind: input, shape index: {}]   ;;  %s5913_s6 = inlined_call_operand.vmem [shape: bf16[128,512], index: 6, kind: input, shape index: {}]   ;;  %s5914_s7 = inlined_call_operand.vmem [shape: f32[1,512], index: 7, kind: input, shape index: {}]   ;;  %s5915_s8 = inlined_call_operand.vmem [shape: bf16[512,128], index: 8, kind: input, shape index: {}]   ;;  %s5916_s9 = inlined_call_operand.vmem [shape: f32[1,128], index: 9, kind: input, shape index: {}]   ;;  %s5917_s10 = inlined_call_operand.vmem [shape: f32[1,128], index: 10, kind: input, shape index: {}]   ;;  %s5918_s11 = inlined_call_operand.vmem [shape: f32[2,8,8,128], index: 11, kind: output, shape index: {}]  }
   0x1 LB: > { %s3087_s18 = sadd.s32 4294967295, %s3763_s17   ;;  %p3091_p0 = scmp.ge.s32.totalorder %s3763_s17, 1  ;;  %s3763_s17 = sphi %s3826_s17, %s21_s17  }
   0x2   : > { %p347_p1 = scmp.lt.s32.totalorder %s3763_s17, 3 }
   0x4   : > { %p348_p2 = pnand %p3091_p0, %p347_p1 }
   0x6   : > { %351 = sbr.rel (%p348_p2) target bundleno = 1047 (0x417), region = 64 }
   0xb   : > { %p392_p3 = scmp.lt.s32.totalorder %s3087_s18, 1  ;;  %v431_v0 = vlaneseq  ;;  %v408_v2 = vld [vmem:[%s5909_s2] sm:$0x7f]  ;;  %v409_v28 = vld [vmem:[%s5909_s2 + $0x8] sm:$0x7f] }
   0xc   : > { %v3851_v7 = vld [vmem:[%s5910_s3] ss:$0 sm:$0xff]  ;;  %v410_v52 = vld [vmem:[%s5909_s2 + $0x10] sm:$0x7f] }
   0xd   : > { %s6523_s18 = smov (!%p392_p3, %s3087_s18), 1  ;;  %v432_v1 = vshrl.u32 %v431_v0, 7 }
   0xe   : > { %s3586_s21 = smul.u32 224, %s6523_s18  ;;  %s3504_s24 = sshll.u32 %s6523_s18, 6 }
   0xf   : > { %v3840_v3 = vsub.s32 0, %v432_v1  ;;  %v3842_v4 = vsub.s32 1, %v432_v1  ;;  %v3844_v5 = vsub.s32 2, %v432_v1  ;;  %v3846_v6 = vsub.s32 3, %v432_v1  ;;  %s5861_s27 = scalar_lea.vmem %s5908_s1, %s3504_s24  ;;  %s5874_s12 = scalar_lea.vmem %s5918_s11, %s3504_s24 }
  0x10   : > { %s3856_s26 = scalar_lea.vmem %s5907_s0, %s3586_s21  ;;  %v3867_v11 = vsub.s32 4, %v432_v1  ;;  %v3877_v18 = vsub.s32 5, %v432_v1  ;;  %v3885_v23 = vsub.s32 6, %v432_v1 }
  0x11   : > { %6143 = vst [vmem:[#allocation2_spill] sm:$0xff] %v3840_v3  ;;  %6144 = vst [vmem:[#allocation3_spill] sm:$0xff] %v3842_v4  ;;  %v3859_v8 = vrot.slane %v408_v2, %v3840_v3  ;;  %v3862_v9 = vrot.slane %v408_v2, %v3842_v4  ;;  %v3865_v10 = vrot.slane %v408_v2, %v3844_v5  ;;  %v423_v12 = vld [vmem:[%s3856_s26] sm:$0xff]  ;;  %v3910_v40 = vld [vmem:[%s3856_s26 + $0x10] sm:$0xff] }
  0x12   : > { %6145 = vst [vmem:[#allocation4_spill] sm:$0xff] %v3844_v5  ;;  %6146 = vst [vmem:[#allocation5_spill] sm:$0xff] %v3846_v6  ;;  %v451_v13 = vld [vmem:[%s3856_s26 + $0x1] sm:$0xff]  ;;  %v3875_v17 = vrot.slane %v408_v2, %v3846_v6  ;;  %v3883_v22 = vrot.slane %v408_v2, %v3867_v11  ;;  %v3890_v27 = vrot.slane %v408_v2, %v3877_v18  ;;  %v3918_v44 = vld [vmem:[%s3856_s26 + $0x11] sm:$0xff] }
  0x13   : > { %6147 = vst [vmem:[#allocation6_spill] sm:$0xff] %v3859_v8  ;;  %6148 = vst [vmem:[#allocation7_spill] sm:$0xff] %v3862_v9  ;;  %v479_v14 = vld [vmem:[%s3856_s26 + $0x2] sm:$0xff]  ;;  %v435_v15 = vmul.f32 %v3859_v8, %v423_v12  ;;  %v463_v16 = vmul.f32 %v3862_v9, %v451_v13  ;;  %v3898_v32 = vrot.slane %v408_v2, %v3885_v23  ;;  %v3926_v48 = vld [vmem:[%s3856_s26 + $0x12] sm:$0xff] }
  0x14   : > { %6149 = vst [vmem:[#allocation8_spill] sm:$0xff] %v3865_v10  ;;  %v507_v19 = vld [vmem:[%s3856_s26 + $0x3] sm:$0xff]  ;;  %v491_v21 = vmul.f32 %v3865_v10, %v479_v14  ;;  %6150 = vst [vmem:[#allocation9_spill] sm:$0xff] %v3890_v27  ;;  %v3903_v36 = vrot.slane %v409_v28, %v3840_v3  ;;  %v3907_v39 = vrot.slane %v409_v28, %v3842_v4  ;;  %v3937_v53 = vld [vmem:[%s3856_s26 + $0x13] sm:$0xff] }
  0x15   : > { %v443_v20 = vadd.f32 %v3851_v7, %v435_v15  ;;  %v535_v24 = vld [vmem:[%s3856_s26 + $0x4] sm:$0xff]  ;;  %v519_v26 = vmul.f32 %v3875_v17, %v507_v19  ;;  %6151 = vst [vmem:[#allocation10_spill] sm:$0xff] %v3898_v32  ;;  %v3915_v43 = vrot.slane %v409_v28, %v3844_v5  ;;  %v3923_v47 = vrot.slane %v409_v28, %v3846_v6  ;;  %v3945_v57 = vld [vmem:[%s3856_s26 + $0x14] sm:$0xff] }
  0x16   : > { %v563_v29 = vld [vmem:[%s3856_s26 + $0x5] sm:$0xff]  ;;  %v547_v31 = vmul.f32 %v3883_v22, %v535_v24  ;;  %6152 = vst [vmem:[#allocation11_spill] sm:$0xff] %v3903_v36  ;;  %6153 = vst [vmem:[#allocation12_spill] sm:$0xff] %v3907_v39  ;;  %v632_v42 = vmul.f32 %v3910_v40, %v3903_v36  ;;  %v660_v46 = vmul.f32 %v3918_v44, %v3907_v39  ;;  %v3956_v62 = vld [vmem:[%s3856_s26 + $0x15] sm:$0xff] }
  0x17   : > { %v471_v25 = vadd.f32 %v463_v16, %v443_v20  ;;  %v591_v33 = vld [vmem:[%s3856_s26 + $0x6] sm:$0xff]  ;;  %v575_v35 = vmul.f32 %v3890_v27, %v563_v29  ;;  %6154 = vst [vmem:[#allocation13_spill] sm:$0xff] %v3915_v43  ;;  %6155 = vst [vmem:[#allocation14_spill] sm:$0xff] %v3923_v47  ;;  %v688_v50 = vmul.f32 %v3926_v48, %v3915_v43  ;;  %v411_v12 = vld [vmem:[%s5909_s2 + $0x18] sm:$0x7f] }
  0x18   : > { %v603_v38 = vmul.f32 %v3898_v32, %v591_v33  ;;  %v3931_v51 = vrot.slane %v409_v28, %v3867_v11  ;;  %v716_v55 = vmul.f32 %v3937_v53, %v3923_v47  ;;  %v3942_v56 = vrot.slane %v409_v28, %v3877_v18  ;;  %6160 = vst [vmem:[#allocation19_spill] sm:$0xff] %v3956_v62  ;;  %v3959_v63 = vld [vmem:[%s3856_s26 + $0x20] sm:$0xff]  ;;  %v3976_v15 = vld [vmem:[%s3856_s26 + $0x16] sm:$0xff] }
  0x19   : > { %v499_v30 = vadd.f32 %v491_v21, %v471_v25  ;;  %v3948_v58 = vrot.slane %v409_v28, %v3885_v23  ;;  %v3953_v61 = vrot.slane %v410_v52, %v3840_v3  ;;  %6161 = vst [vmem:[#allocation20_spill] sm:$0xff] %v3959_v63  ;;  %v3962_v0 = vld [vmem:[%s3856_s26 + $0x21] sm:$0xff]  ;;  %v3965_v1 = vrot.slane %v410_v52, %v3842_v4 }
  0x1a   : > { %6156 = vst [vmem:[#allocation15_spill] sm:$0xff] %v3931_v51  ;;  %6157 = vst [vmem:[#allocation16_spill] sm:$0xff] %v3942_v56  ;;  %v744_v60 = vmul.f32 %v3945_v57, %v3931_v51  ;;  %v3968_v2 = vrot.slane %v410_v52, %v3844_v5  ;;  %v772_v14 = vmul.f32 %v3956_v62, %v3942_v56  ;;  %v3981_v19 = vld [vmem:[%s3856_s26 + $0x22] sm:$0xff] }
  0x1b   : > { %v527_v34 = vadd.f32 %v519_v26, %v499_v30  ;;  %6158 = vst [vmem:[#allocation17_spill] sm:$0xff] %v3948_v58  ;;  %6159 = vst [vmem:[#allocation18_spill] sm:$0xff] %v3953_v61  ;;  %v800_v16 = vmul.f32 %v3976_v15, %v3948_v58  ;;  %v3984_v20 = vrot.slane %v410_v52, %v3846_v6  ;;  %v4003_v33 = vld [vmem:[%s3856_s26 + $0x23] sm:$0xff]  ;;  %v4186_v58 = vld [vmem:[%s3856_s26 + $0x51] sm:$0xff] }
  0x1c   : > { %6162 = vst [vmem:[#allocation21_spill] sm:$0xff] %v3962_v0  ;;  %6163 = vst [vmem:[#allocation22_spill] sm:$0xff] %v3965_v1  ;;  %v3987_v21 = vrot.slane %v410_v52, %v3867_v11  ;;  %v3990_v24 = vrot.slane %v410_v52, %v3877_v18  ;;  %v829_v26 = vmul.f32 %v3959_v63, %v3953_v61  ;;  %v4162_v61 = vld [vmem:[%s3856_s26 + $0x46] sm:$0xff] }
  0x1d   : > { %v555_v37 = vadd.f32 %v547_v31, %v527_v34  ;;  %6164 = vst [vmem:[#allocation23_spill] sm:$0xff] %v3968_v2  ;;  %6165 = vst [vmem:[#allocation24_spill] sm:$0xff] %v3976_v15  ;;  %v437_v28 = vmul.f32 %v3959_v63, %v3859_v8  ;;  %v465_v29 = vmul.f32 %v3962_v0, %v3862_v9 }
  0x1e   : > { %6166 = vst [vmem:[#allocation25_spill] sm:$0xff] %v3981_v19  ;;  %6167 = vst [vmem:[#allocation26_spill] sm:$0xff] %v3984_v20  ;;  %v857_v30 = vmul.f32 %v3962_v0, %v3965_v1  ;;  %v885_v31 = vmul.f32 %v3981_v19, %v3968_v2  ;;  %v4006_v34 = vrot.slane %v410_v52, %v3885_v23  ;;  %v4106_v2 = vld [vmem:[%s3856_s26 + $0x36] sm:$0xff] }
  0x1f   : > { %v583_v41 = vadd.f32 %v575_v35, %v555_v37  ;;  %6168 = vst [vmem:[#allocation27_spill] sm:$0xff] %v3987_v21  ;;  %6169 = vst [vmem:[#allocation28_spill] sm:$0xff] %v3990_v24  ;;  %v4009_v35 = vrot.slane %v411_v12, %v3840_v3 }
  0x20   : > { %6170 = vst [vmem:[#allocation29_spill] sm:$0xff] %v4003_v33  ;;  %6171 = vst [vmem:[#allocation30_spill] sm:$0xff] %v4006_v34 }
  0x21   : > { %v611_v45 = vadd.f32 %v603_v38, %v583_v41  ;;  %6172 = vst [vmem:[#allocation31_spill] sm:$0xff] %v4009_v35  ;;  %v4012_v38 = vld [vmem:[%s3856_s26 + $0x24] sm:$0xff]  ;;  %6188 = vst [vmem:[#allocation47_spill] sm:$0xff] %v4106_v2 }
  0x22   : > { %6173 = vst [vmem:[#allocation32_spill] sm:$0xff] %v4012_v38  ;;  %v4015_v41 = vld [vmem:[%s3856_s26 + $0x25] sm:$0xff]  ;;  %6204 = vst [vmem:[#allocation63_spill] sm:$0xff] %v4162_v61 }
  0x23   : > { %v640_v49 = vadd.f32 %v632_v42, %v611_v45  ;;  %6174 = vst [vmem:[#allocation33_spill] sm:$0xff] %v4015_v41  ;;  %v4018_v42 = vrot.slane %v411_v12, %v3842_v4  ;;  %v445_v45 = vadd.f32 %v3851_v7, %v437_v28  ;;  %v4029_v52 = vmul.f32 %v4015_v41, %v3990_v24 }
  0x24   : > { %v4053_v24 = vrot.slane %v411_v12, %v3867_v11  ;;  %v577_v1 = vmul.f32 %v4015_v41, %v3890_v27  ;;  %6209 = vst [vmem:[#allocation68_spill] sm:$0xff] %v4186_v58 }
  0x25   : > { %v668_v54 = vadd.f32 %v660_v46, %v640_v49  ;;  %6175 = vst [vmem:[#allocation34_spill] sm:$0xff] %v4018_v42  ;;  %v493_v46 = vmul.f32 %v3981_v19, %v3865_v10  ;;  %v913_v49 = vmul.f32 %v4003_v33, %v3984_v20  ;;  %v4050_v19 = vld [vmem:[%s3856_s26 + $0x30] sm:$0xff]  ;;  %v549_v20 = vmul.f32 %v4012_v38, %v3883_v22 }
  0x26   : > { %6179 = vst [vmem:[#allocation38_spill] sm:$0xff] %v4050_v19  ;;  %6180 = vst [vmem:[#allocation39_spill] sm:$0xff] %v4053_v24  ;;  %v634_v27 = vmul.f32 %v4050_v19, %v3903_v36 }
  0x27   : > { %v696_v59 = vadd.f32 %v688_v50, %v668_v54  ;;  %v941_v50 = vmul.f32 %v4012_v38, %v3987_v21  ;;  %v4032_v54 = vrot.slane %v411_v12, %v3844_v5 }
  0x29   : > { %v724_v13 = vadd.f32 %v716_v55, %v696_v59  ;;  %6176 = vst [vmem:[#allocation35_spill] sm:$0xff] %v4032_v54  ;;  %v412_v55 = vld [vmem:[%s5909_s2 + $0x20] sm:$0x7f] }
  0x2a   : > { %v4123_v15 = vrot.slane %v412_v55, %v3844_v5  ;;  %v4129_v41 = vrot.slane %v412_v55, %v3846_v6 }
  0x2b   : > { %v752_v25 = vadd.f32 %v744_v60, %v724_v13  ;;  %v4038_v60 = vld [vmem:[%s3856_s26 + $0x26] sm:$0xff]  ;;  %v4041_v13 = vrot.slane %v411_v12, %v3846_v6 }
  0x2c   : > { %6177 = vst [vmem:[#allocation36_spill] sm:$0xff] %v4038_v60  ;;  %v4047_v28 = vmul.f32 %v4038_v60, %v4006_v34  ;;  %v4069_v34 = vld [vmem:[%s3856_s26 + $0x32] sm:$0xff]  ;;  %6192 = vst [vmem:[#allocation51_spill] sm:$0xff] %v4123_v15 }
  0x2d   : > { %v780_v37 = vadd.f32 %v772_v14, %v752_v25  ;;  %6178 = vst [vmem:[#allocation37_spill] sm:$0xff] %v4041_v13  ;;  %v473_v14 = vadd.f32 %v465_v29, %v445_v45  ;;  %v521_v25 = vmul.f32 %v4003_v33, %v3875_v17  ;;  %v4063_v45 = vmul.f32 %v4050_v19, %v4009_v35  ;;  %v4066_v33 = vld [vmem:[%s3856_s26 + $0x31] sm:$0xff] }
  0x2e   : > { %v4087_v35 = vld [vmem:[%s3856_s26 + $0x33] sm:$0xff]  ;;  %6194 = vst [vmem:[#allocation53_spill] sm:$0xff] %v4129_v41 }
  0x2f   : > { %v808_v59 = vadd.f32 %v800_v16, %v780_v37  ;;  %v4056_v16 = vrot.slane %v411_v12, %v3877_v18  ;;  %v4059_v37 = vrot.slane %v411_v12, %v3885_v23  ;;  %v501_v21 = vadd.f32 %v493_v46, %v473_v14  ;;  %v4076_v12 = vld [vmem:[%s5909_s2 + $0x28] sm:$0x7f] }
  0x30   : > { %v4090_v46 = vrot.slane %v412_v55, %v3840_v3  ;;  %v4093_v14 = vrot.slane %v412_v55, %v3842_v4  ;;  %v4097_v0 = vmul.f32 %v4087_v35, %v4041_v13  ;;  %v4169_v62 = vrot.slane %v4076_v12, %v3842_v4 }
  0x31   : > { %6181 = vst [vmem:[#allocation40_spill] sm:$0xff] %v4056_v16  ;;  %6182 = vst [vmem:[#allocation41_spill] sm:$0xff] %v4059_v37  ;;  %v837_v29 = vadd.f32 %v829_v26, %v808_v59  ;;  %v4080_v26 = vmul.f32 %v4066_v33, %v4018_v42  ;;  %v4084_v59 = vmul.f32 %v4069_v34, %v4032_v54  ;;  %v4100_v42 = vld [vmem:[%s3856_s26 + $0x34] sm:$0xff] }
  0x32   : > { %6183 = vst [vmem:[#allocation42_spill] sm:$0xff] %v4090_v46  ;;  %6184 = vst [vmem:[#allocation43_spill] sm:$0xff] %v4093_v14  ;;  %v4103_v54 = vld [vmem:[%s3856_s26 + $0x35] sm:$0xff]  ;;  %v529_v63 = vadd.f32 %v521_v25, %v501_v21  ;;  %v4120_v13 = vmul.f32 %v4106_v2, %v4059_v37  ;;  %v4126_v25 = vld [vmem:[%s3856_s26 + $0x40] sm:$0xff] }
  0x33   : > { %v865_v38 = vadd.f32 %v857_v30, %v837_v29  ;;  %6185 = vst [vmem:[#allocation44_spill] sm:$0xff] %v4097_v0  ;;  %6186 = vst [vmem:[#allocation45_spill] sm:$0xff] %v4100_v42  ;;  %v4112_v30 = vmul.f32 %v4100_v42, %v4053_v24  ;;  %v4116_v29 = vmul.f32 %v4103_v54, %v4056_v16  ;;  %v4137_v37 = vld [vmem:[%s3856_s26 + $0x42] sm:$0xff]  ;;  %v4165_v0 = vld [vmem:[%s3856_s26 + $0x50] sm:$0xff] }
  0x34   : > { %6187 = vst [vmem:[#allocation46_spill] sm:$0xff] %v4103_v54  ;;  %6191 = vst [vmem:[#allocation50_spill] sm:$0xff] %v4120_v13  ;;  %v557_v24 = vadd.f32 %v549_v20, %v529_v63  ;;  %v605_v16 = vmul.f32 %v4038_v60, %v3898_v32  ;;  %v4140_v13 = vld [vmem:[%s3856_s26 + $0x43] sm:$0xff]  ;;  %v4153_v63 = vrot.slane %v4076_v12, %v3840_v3 }
  0x35   : > { %6189 = vst [vmem:[#allocation48_spill] sm:$0xff] %v4112_v30  ;;  %6190 = vst [vmem:[#allocation49_spill] sm:$0xff] %v4116_v29  ;;  %v893_v21 = vadd.f32 %v885_v31, %v865_v38  ;;  %v4134_v29 = vld [vmem:[%s3856_s26 + $0x41] sm:$0xff]  ;;  %v4143_v30 = vrot.slane %v412_v55, %v3867_v11  ;;  %v4146_v31 = vrot.slane %v412_v55, %v3877_v18 }
  0x36   : > { %6193 = vst [vmem:[#allocation52_spill] sm:$0xff] %v4126_v25  ;;  %6195 = vst [vmem:[#allocation54_spill] sm:$0xff] %v4134_v29  ;;  %v4149_v38 = vrot.slane %v412_v55, %v3885_v23  ;;  %v4156_v60 = vld [vmem:[%s3856_s26 + $0x44] sm:$0xff]  ;;  %v585_v55 = vadd.f32 %v577_v1, %v557_v24  ;;  %v4175_v2 = vmul.f32 %v4126_v25, %v4090_v46  ;;  %v4197_v46 = vld [vmem:[%s3856_s26 + $0x52] sm:$0xff] }
  0x37   : > { %6196 = vst [vmem:[#allocation55_spill] sm:$0xff] %v4137_v37  ;;  %6197 = vst [vmem:[#allocation56_spill] sm:$0xff] %v4140_v13  ;;  %v921_v20 = vadd.f32 %v913_v49, %v893_v21  ;;  %v4159_v32 = vld [vmem:[%s3856_s26 + $0x45] sm:$0xff]  ;;  %v4179_v49 = vmul.f32 %v4134_v29, %v4093_v14  ;;  %v4183_v21 = vmul.f32 %v4137_v37, %v4123_v15  ;;  %v414_v15 = vld [vmem:[%s5909_s2 + $0x30] sm:$0x7f] }
  0x38   : > { %6198 = vst [vmem:[#allocation57_spill] sm:$0xff] %v4143_v30  ;;  %6199 = vst [vmem:[#allocation58_spill] sm:$0xff] %v4146_v31  ;;  %v4190_v1 = vrot.slane %v4076_v12, %v3844_v5  ;;  %v4194_v19 = vmul.f32 %v4140_v13, %v4129_v41  ;;  %v662_v14 = vmul.f32 %v4066_v33, %v3907_v39 }
  0x39   : > { %6200 = vst [vmem:[#allocation59_spill] sm:$0xff] %v4149_v38  ;;  %6201 = vst [vmem:[#allocation60_spill] sm:$0xff] %v4153_v63  ;;  %v949_v24 = vadd.f32 %v941_v50, %v921_v20  ;;  %v4210_v50 = vmul.f32 %v4159_v32, %v4146_v31  ;;  %v4218_v20 = vmul.f32 %v4165_v0, %v4153_v63 }
  0x3a   : > { %6202 = vst [vmem:[#allocation61_spill] sm:$0xff] %v4156_v60  ;;  %6203 = vst [vmem:[#allocation62_spill] sm:$0xff] %v4159_v32  ;;  %v4223_v41 = vmul.f32 %v4186_v58, %v4169_v62  ;;  %v690_v31 = vmul.f32 %v4069_v34, %v3915_v43 }
  0x3b   : > { %6205 = vst [vmem:[#allocation64_spill] sm:$0xff] %v4165_v0  ;;  %6206 = vst [vmem:[#allocation65_spill] sm:$0xff] %v4169_v62  ;;  %v4254_v62 = vrot.slane %v4076_v12, %v3877_v18 }
  0x3c   : > { %6207 = vst [vmem:[#allocation66_spill] sm:$0xff] %v4175_v2  ;;  %6208 = vst [vmem:[#allocation67_spill] sm:$0xff] %v4183_v21  ;;  %v613_v2 = vadd.f32 %v605_v16, %v585_v55  ;;  %v4206_v21 = vmul.f32 %v4156_v60, %v4143_v30  ;;  %v4214_v16 = vmul.f32 %v4162_v61, %v4149_v38 }
  0x3d   : > { %6210 = vst [vmem:[#allocation69_spill] sm:$0xff] %v4190_v1  ;;  %6211 = vst [vmem:[#allocation70_spill] sm:$0xff] %v4197_v46  ;;  %v977_v55 = vadd.f32 %v4029_v52, %v949_v24  ;;  %v4237_v52 = vrot.slane %v4076_v12, %v3867_v11  ;;  %v436_v24 = vmul.f32 %v3910_v40, %v3859_v8 }
  0x3e   : > { %6212 = vst [vmem:[#allocation71_spill] sm:$0xff] %v4210_v50  ;;  %6213 = vst [vmem:[#allocation72_spill] sm:$0xff] %v4214_v16  ;;  %v642_v30 = vadd.f32 %v634_v27, %v613_v2  ;;  %v4229_v50 = vmul.f32 %v4197_v46, %v4190_v1  ;;  %v4233_v16 = vrot.slane %v4076_v12, %v3846_v6  ;;  %v4243_v2 = vld [vmem:[%s3856_s26 + $0x53] sm:$0xff] }
  0x3f   : > { %6214 = vst [vmem:[#allocation73_spill] sm:$0xff] %v4218_v20  ;;  %6215 = vst [vmem:[#allocation74_spill] sm:$0xff] %v4223_v41  ;;  %v1005_v27 = vadd.f32 %v4047_v28, %v977_v55  ;;  %v718_v1 = vmul.f32 %v4087_v35, %v3923_v47  ;;  %v4250_v20 = vld [vmem:[%s3856_s26 + $0x54] sm:$0xff]  ;;  %v4258_v40 = vrot.slane %v4076_v12, %v3885_v23 }
  0x40   : > { %6216 = vst [vmem:[#allocation75_spill] sm:$0xff] %v4229_v50  ;;  %6217 = vst [vmem:[#allocation76_spill] sm:$0xff] %v4233_v16  ;;  %v670_v41 = vadd.f32 %v662_v14, %v642_v30  ;;  %v464_v50 = vmul.f32 %v3918_v44, %v3862_v9  ;;  %v444_v28 = vadd.f32 %v3851_v7, %v436_v24  ;;  %v4265_v55 = vld [vmem:[%s3856_s26 + $0x55] sm:$0xff] }
  0x41   : > { %6218 = vst [vmem:[#allocation77_spill] sm:$0xff] %v4237_v52  ;;  %6219 = vst [vmem:[#allocation78_spill] sm:$0xff] %v4243_v2  ;;  %v492_v14 = vmul.f32 %v3926_v48, %v3865_v10  ;;  %v1034_v30 = vadd.f32 %v4063_v45, %v1005_v27  ;;  %v4268_v44 = vrot.slane %v414_v15, %v3840_v3 }
  0x42   : > { %6220 = vst [vmem:[#allocation79_spill] sm:$0xff] %v4250_v20  ;;  %6221 = vst [vmem:[#allocation80_spill] sm:$0xff] %v4254_v62  ;;  %v698_v63 = vadd.f32 %v690_v31, %v670_v41  ;;  %v746_v38 = vmul.f32 %v4100_v42, %v3931_v51  ;;  %v4274_v12 = vmul.f32 %v4243_v2, %v4233_v16  ;;  %v4287_v31 = vld [vmem:[%s3856_s26 + $0x56] sm:$0xff]  ;;  %v6253_v42 = vld [vmem:[#allocation22_spill] sm:$0xff] }
  0x43   : > { %6222 = vst [vmem:[#allocation81_spill] sm:$0xff] %v4258_v40  ;;  %6223 = vst [vmem:[#allocation82_spill] sm:$0xff] %v4265_v55  ;;  %v4277_v24 = vrot.slane %v414_v15, %v3842_v4  ;;  %v472_v48 = vadd.f32 %v464_v50, %v444_v28  ;;  %v520_v45 = vmul.f32 %v3937_v53, %v3875_v17 }
  0x44   : > { %6224 = vst [vmem:[#allocation83_spill] sm:$0xff] %v4268_v44  ;;  %6225 = vst [vmem:[#allocation84_spill] sm:$0xff] %v4274_v12  ;;  %v1062_v27 = vadd.f32 %v4080_v26, %v1034_v30  ;;  %v4284_v41 = vmul.f32 %v4250_v20, %v4237_v52  ;;  %v726_v3 = vadd.f32 %v718_v1, %v698_v63  ;;  %v4306_v1 = vld [vmem:[%s3856_s26 + $0x60] sm:$0xff] }
  0x45   : > { %6226 = vst [vmem:[#allocation85_spill] sm:$0xff] %v4277_v24  ;;  %6228 = vst [vmem:[#allocation87_spill] sm:$0xff] %v4287_v31  ;;  %v774_v12 = vmul.f32 %v4103_v54, %v3942_v56  ;;  %v4293_v50 = vmul.f32 %v4265_v55, %v4254_v62  ;;  %v4296_v53 = vrot.slane %v414_v15, %v3844_v5 }
  0x46   : > { %6227 = vst [vmem:[#allocation86_spill] sm:$0xff] %v4284_v41  ;;  %v500_v26 = vadd.f32 %v492_v14, %v472_v48  ;;  %v548_v28 = vmul.f32 %v3945_v57, %v3883_v22  ;;  %v1090_v30 = vadd.f32 %v4084_v59, %v1062_v27  ;;  %v4303_v63 = vmul.f32 %v4287_v31, %v4258_v40  ;;  %v6233_v41 = vld [vmem:[#allocation17_spill] sm:$0xff]  ;;  %v4315_v14 = vld [vmem:[%s3856_s26 + $0x61] sm:$0xff]  ;;  %v6240_v40 = vld [vmem:[#allocation44_spill] sm:$0xff] }
  0x47   : > { %6229 = vst [vmem:[#allocation88_spill] sm:$0xff] %v4293_v50  ;;  %6230 = vst [vmem:[#allocation89_spill] sm:$0xff] %v4296_v53  ;;  %v754_v4 = vadd.f32 %v746_v38, %v726_v3  ;;  %v6234_v50 = vld [vmem:[#allocation47_spill] sm:$0xff]  ;;  %v4312_v5 = vmul.f32 %v4306_v1, %v4268_v44  ;;  %v4318_v57 = vrot.slane %v414_v15, %v3846_v6  ;;  %v6238_v48 = vld [vmem:[#allocation9_spill] sm:$0xff] }
  0x48   : > { %6231 = vst [vmem:[#allocation90_spill] sm:$0xff] %v4303_v63  ;;  %6232 = vst [vmem:[#allocation91_spill] sm:$0xff] %v4306_v1  ;;  %v802_v62 = vmul.f32 %v6234_v50, %v6233_v41  ;;  %v528_v59 = vadd.f32 %v520_v45, %v500_v26  ;;  %v6239_v27 = vld [vmem:[#allocation19_spill] sm:$0xff]  ;;  %v1118_v52 = vadd.f32 %v6240_v40, %v1090_v30  ;;  %v6244_v44 = vld [vmem:[#allocation18_spill] sm:$0xff] }
  0x49   : > { %6235 = vst [vmem:[#allocation92_spill] sm:$0xff] %v4312_v5  ;;  %6236 = vst [vmem:[#allocation93_spill] sm:$0xff] %v4315_v14  ;;  %v576_v63 = vmul.f32 %v6239_v27, %v6238_v48  ;;  %v4324_v3 = vld [vmem:[%s3856_s26 + $0x62] sm:$0xff]  ;;  %v4330_v16 = vrot.slane %v414_v15, %v3867_v11  ;;  %v782_v5 = vadd.f32 %v774_v12, %v754_v4  ;;  %v6249_v27 = vld [vmem:[#allocation24_spill] sm:$0xff] }
  0x4a   : > { %6237 = vst [vmem:[#allocation94_spill] sm:$0xff] %v4318_v57  ;;  %6241 = vst [vmem:[#allocation19_spill] sm:$0xff] %v4324_v3  ;;  %v4327_v38 = vld [vmem:[%s3856_s26 + $0x63] sm:$0xff]  ;;  %v831_v50 = vmul.f32 %v4126_v25, %v6244_v44  ;;  %v4338_v45 = vrot.slane %v414_v15, %v3877_v18  ;;  %v4341_v26 = vrot.slane %v414_v15, %v3885_v23  ;;  %v6250_v48 = vld [vmem:[#allocation48_spill] sm:$0xff] }
  0x4b   : > { %6242 = vst [vmem:[#allocation44_spill] sm:$0xff] %v4327_v38  ;;  %6243 = vst [vmem:[#allocation95_spill] sm:$0xff] %v4330_v16  ;;  %v4335_v6 = vld [vmem:[%s3856_s26 + $0x64] sm:$0xff]  ;;  %v556_v40 = vadd.f32 %v548_v28, %v528_v59  ;;  %v1146_v11 = vadd.f32 %v6250_v48, %v1118_v52  ;;  %v4348_v4 = vmul.f32 %v4315_v14, %v4277_v24  ;;  %v6256_v52 = vld [vmem:[#allocation20_spill] sm:$0xff] }
  0x4c   : > { %6245 = vst [vmem:[#allocation96_spill] sm:$0xff] %v4335_v6  ;;  %6246 = vst [vmem:[#allocation97_spill] sm:$0xff] %v4338_v45  ;;  %v6248_v30 = vld [vmem:[#allocation10_spill] sm:$0xff]  ;;  %v810_v25 = vadd.f32 %v802_v62, %v782_v5  ;;  %v859_v18 = vmul.f32 %v4134_v29, %v6253_v42  ;;  %v4357_v23 = vmul.f32 %v4324_v3, %v4296_v53  ;;  %v6257_v48 = vld [vmem:[#allocation49_spill] sm:$0xff] }
  0x4d   : > { %6247 = vst [vmem:[#allocation98_spill] sm:$0xff] %v4341_v26  ;;  %v604_v54 = vmul.f32 %v6249_v27, %v6248_v30  ;;  %6251 = vst [vmem:[#allocation10_spill] sm:$0xff] %v4348_v4  ;;  %v4351_v12 = vld [vmem:[%s3856_s26 + $0x65] sm:$0xff]  ;;  %v4361_v15 = vmul.f32 %v4327_v38, %v4318_v57  ;;  %v584_v28 = vadd.f32 %v576_v63, %v556_v40 }
  0x4e   : > { %6252 = vst [vmem:[#allocation24_spill] sm:$0xff] %v4351_v12  ;;  %6254 = vst [vmem:[#allocation48_spill] sm:$0xff] %v4357_v23  ;;  %v633_v59 = vmul.f32 %v6256_v52, %v3903_v36  ;;  %v1174_v27 = vadd.f32 %v6257_v48, %v1146_v11  ;;  %v4368_v5 = vmul.f32 %v4335_v6, %v4330_v16  ;;  %v4371_v62 = vld [vmem:[%s3856_s26 + $0x66] sm:$0xff]  ;;  %v6263_v11 = vld [vmem:[#allocation21_spill] sm:$0xff] }
  0x4f   : > { %6255 = vst [vmem:[#allocation99_spill] sm:$0xff] %v4361_v15  ;;  %6259 = vst [vmem:[#allocation49_spill] sm:$0xff] %v4371_v62  ;;  %v839_v4 = vadd.f32 %v831_v50, %v810_v25  ;;  %v6260_v24 = vld [vmem:[#allocation23_spill] sm:$0xff]  ;;  %v4377_v57 = vmul.f32 %v4351_v12, %v4338_v45  ;;  %v4381_v63 = vmul.f32 %v4371_v62, %v4341_v26  ;;  %v6264_v48 = vld [vmem:[#allocation50_spill] sm:$0xff] }
  0x50   : > { %6258 = vst [vmem:[#allocation20_spill] sm:$0xff] %v4368_v5  ;;  %v887_v23 = vmul.f32 %v4137_v37, %v6260_v24  ;;  %v612_v40 = vadd.f32 %v604_v54, %v584_v28  ;;  %v661_v52 = vmul.f32 %v6263_v11, %v3907_v39  ;;  %v1202_v5 = vadd.f32 %v6264_v48, %v1174_v27  ;;  %v6265_v16 = vld [vmem:[#allocation26_spill] sm:$0xff]  ;;  %v6266_v50 = vld [vmem:[#allocation27_spill] sm:$0xff]  ;;  %v6267_v37 = vld [vmem:[#allocation28_spill] sm:$0xff] }
  0x51   : > { %6261 = vst [vmem:[#allocation100_spill] sm:$0xff] %v4377_v57  ;;  %6262 = vst [vmem:[#allocation101_spill] sm:$0xff] %v4381_v63  ;;  %v867_v15 = vadd.f32 %v859_v18, %v839_v4  ;;  %v915_v25 = vmul.f32 %v4140_v13, %v6265_v16  ;;  %v943_v53 = vmul.f32 %v4156_v60, %v6266_v50  ;;  %v6268_v45 = vld [vmem:[#allocation30_spill] sm:$0xff]  ;;  %v6269_v54 = vld [vmem:[#allocation25_spill] sm:$0xff] }
  0x52   : > { %v971_v57 = vmul.f32 %v4159_v32, %v6267_v37  ;;  %v999_v26 = vmul.f32 %v4162_v61, %v6268_v45  ;;  %v641_v63 = vadd.f32 %v633_v59, %v612_v40  ;;  %v689_v28 = vmul.f32 %v6269_v54, %v3915_v43  ;;  %v6270_v11 = vld [vmem:[#allocation66_spill] sm:$0xff]  ;;  %v6271_v4 = vld [vmem:[#allocation31_spill] sm:$0xff]  ;;  %v6274_v32 = vld [vmem:[#allocation37_spill] sm:$0xff] }
  0x53   : > { %v1231_v29 = vadd.f32 %v6270_v11, %v1202_v5  ;;  %v895_v27 = vadd.f32 %v887_v23, %v867_v15  ;;  %v1028_v18 = vmul.f32 %v4165_v0, %v6271_v4  ;;  %v6272_v48 = vld [vmem:[#allocation34_spill] sm:$0xff]  ;;  %v6273_v60 = vld [vmem:[#allocation35_spill] sm:$0xff]  ;;  %v4405_v37 = vmul.f32 %v4243_v2, %v6274_v32  ;;  %v6275_v40 = vld [vmem:[#allocation29_spill] sm:$0xff] }
  0x54   : > { %v1056_v13 = vmul.f32 %v4186_v58, %v6272_v48  ;;  %v1084_v39 = vmul.f32 %v4197_v46, %v6273_v60  ;;  %v669_v59 = vadd.f32 %v661_v52, %v641_v63  ;;  %v717_v54 = vmul.f32 %v6275_v40, %v3923_v47  ;;  %v6276_v15 = vld [vmem:[#allocation39_spill] sm:$0xff]  ;;  %v6277_v0 = vld [vmem:[#allocation40_spill] sm:$0xff]  ;;  %v6279_v63 = vld [vmem:[#allocation38_spill] sm:$0xff] }
  0x55   : > { %v1259_v5 = vadd.f32 %v4179_v49, %v1231_v29  ;;  %v923_v23 = vadd.f32 %v915_v25, %v895_v27  ;;  %v4412_v11 = vmul.f32 %v4250_v20, %v6276_v15  ;;  %v4416_v58 = vmul.f32 %v4265_v55, %v6277_v0  ;;  %v6278_v61 = vld [vmem:[#allocation32_spill] sm:$0xff]  ;;  %v6280_v29 = vld [vmem:[#allocation67_spill] sm:$0xff]  ;;  %v6281_v27 = vld [vmem:[#allocation41_spill] sm:$0xff] }
  0x56   : > { %v697_v46 = vadd.f32 %v689_v28, %v669_v59  ;;  %v745_v2 = vmul.f32 %v6278_v61, %v3931_v51  ;;  %v438_v52 = vmul.f32 %v6279_v63, %v3859_v8  ;;  %v466_v40 = vmul.f32 %v4066_v33, %v3862_v9  ;;  %v6282_v15 = vld [vmem:[#allocation42_spill] sm:$0xff]  ;;  %v6283_v61 = vld [vmem:[#allocation33_spill] sm:$0xff] }
  0x57   : > { %v1287_v49 = vadd.f32 %v6280_v29, %v1259_v5  ;;  %v951_v25 = vadd.f32 %v943_v53, %v923_v23  ;;  %v4427_v20 = vmul.f32 %v4287_v31, %v6281_v27  ;;  %v4431_v55 = vmul.f32 %v4306_v1, %v6282_v15  ;;  %v6284_v23 = vld [vmem:[#allocation43_spill] sm:$0xff] }
  0x58   : > { %v725_v28 = vadd.f32 %v717_v54, %v697_v46  ;;  %v773_v59 = vmul.f32 %v6283_v61, %v3942_v56  ;;  %v446_v0 = vadd.f32 %v3851_v7, %v438_v52  ;;  %v494_v9 = vmul.f32 %v4069_v34, %v3865_v10  ;;  %v6285_v31 = vld [vmem:[#allocation51_spill] sm:$0xff]  ;;  %v6286_v54 = vld [vmem:[#allocation36_spill] sm:$0xff] }
  0x59   : > { %v1315_v5 = vadd.f32 %v4194_v19, %v1287_v49  ;;  %v979_v53 = vadd.f32 %v971_v57, %v951_v25  ;;  %v4441_v29 = vmul.f32 %v4315_v14, %v6284_v23  ;;  %v4445_v1 = vmul.f32 %v4324_v3, %v6285_v31  ;;  %v6287_v49 = vld [vmem:[#allocation53_spill] sm:$0xff]  ;;  %v6290_v31 = vld [vmem:[#allocation71_spill] sm:$0xff] }
  0x5a   : > { %v753_v46 = vadd.f32 %v745_v2, %v725_v28  ;;  %v801_v61 = vmul.f32 %v6286_v54, %v6233_v41  ;;  %v474_v52 = vadd.f32 %v466_v40, %v446_v0  ;;  %v522_v15 = vmul.f32 %v4087_v35, %v3875_v17  ;;  %v6288_v14 = vld [vmem:[#allocation57_spill] sm:$0xff] }
  0x5b   : > { %v1343_v19 = vadd.f32 %v4206_v21, %v1315_v5  ;;  %v1007_v57 = vadd.f32 %v999_v26, %v979_v53  ;;  %v4454_v25 = vmul.f32 %v4327_v38, %v6287_v49  ;;  %v4458_v3 = vmul.f32 %v4335_v6, %v6288_v14  ;;  %v6289_v0 = vld [vmem:[#allocation45_spill] sm:$0xff]  ;;  %v6291_v5 = vld [vmem:[#allocation58_spill] sm:$0xff]  ;;  %v6292_v38 = vld [vmem:[#allocation59_spill] sm:$0xff] }
  0x5c   : > { %v781_v2 = vadd.f32 %v773_v59, %v753_v46  ;;  %v830_v28 = vmul.f32 %v6279_v63, %v6244_v44  ;;  %v502_v54 = vadd.f32 %v494_v9, %v474_v52  ;;  %v550_v40 = vmul.f32 %v6289_v0, %v3883_v22  ;;  %v4474_v59 = vld [vmem:[%s3856_s26 + $0x70] sm:$0xff]  ;;  %v6295_v14 = vld [vmem:[#allocation9_spill] sm:$0xff] }
  0x5d   : > { %v1371_v21 = vadd.f32 %v6290_v31, %v1343_v19  ;;  %v1036_v26 = vadd.f32 %v1028_v18, %v1007_v57  ;;  %v4467_v53 = vmul.f32 %v4351_v12, %v6291_v5  ;;  %v4471_v6 = vmul.f32 %v4371_v62, %v6292_v38  ;;  %6293 = vst [vmem:[#allocation21_spill] sm:$0xff] %v4474_v59  ;;  %v4477_v63 = vld [vmem:[%s3856_s26 + $0x71] sm:$0xff]  ;;  %v6296_v31 = vld [vmem:[#allocation46_spill] sm:$0xff] }
  0x5e   : > { %6294 = vst [vmem:[#allocation50_spill] sm:$0xff] %v4477_v63  ;;  %v809_v9 = vadd.f32 %v801_v61, %v781_v2  ;;  %v858_v46 = vmul.f32 %v4066_v33, %v6253_v42  ;;  %v530_v52 = vadd.f32 %v522_v15, %v502_v54  ;;  %v578_v18 = vmul.f32 %v6296_v31, %v6295_v14  ;;  %v6297_v19 = vld [vmem:[#allocation72_spill] sm:$0xff]  ;;  %v6299_v38 = vld [vmem:[#allocation65_spill] sm:$0xff] }
  0x5f   : > { %v1399_v57 = vadd.f32 %v6297_v19, %v1371_v21  ;;  %v1064_v12 = vadd.f32 %v1056_v13, %v1036_v26  ;;  %v6298_v5 = vld [vmem:[#allocation60_spill] sm:$0xff]  ;;  %v4490_v49 = vmul.f32 %v4477_v63, %v6299_v38  ;;  %v886_v2 = vmul.f32 %v4069_v34, %v6260_v24  ;;  %v6303_v21 = vld [vmem:[#allocation47_spill] sm:$0xff]  ;;  %v6304_v26 = vld [vmem:[#allocation73_spill] sm:$0xff] }
  0x60   : > { %v4486_v62 = vmul.f32 %v4474_v59, %v6298_v5  ;;  %v4493_v61 = vld [vmem:[%s3856_s26 + $0x72] sm:$0xff]  ;;  %v838_v15 = vadd.f32 %v830_v28, %v809_v9  ;;  %v558_v54 = vadd.f32 %v550_v40, %v530_v52  ;;  %v606_v13 = vmul.f32 %v6303_v21, %v6248_v30 }
  0x61   : > { %6300 = vst [vmem:[#allocation25_spill] sm:$0xff] %v4490_v49  ;;  %6301 = vst [vmem:[#allocation66_spill] sm:$0xff] %v4493_v61  ;;  %v4496_v33 = vld [vmem:[%s3856_s26 + $0x73] sm:$0xff]  ;;  %v1428_v19 = vadd.f32 %v6304_v26, %v1399_v57  ;;  %v1092_v59 = vadd.f32 %v1084_v39, %v1064_v12  ;;  %v914_v9 = vmul.f32 %v4087_v35, %v6265_v16  ;;  %v6312_v12 = vld [vmem:[#allocation74_spill] sm:$0xff] }
  0x62   : > { %6302 = vst [vmem:[#allocation29_spill] sm:$0xff] %v4496_v33  ;;  %v6305_v5 = vld [vmem:[#allocation69_spill] sm:$0xff]  ;;  %v6307_v38 = vld [vmem:[#allocation76_spill] sm:$0xff]  ;;  %v866_v40 = vadd.f32 %v858_v46, %v838_v15  ;;  %v586_v52 = vadd.f32 %v578_v18, %v558_v54  ;;  %v4535_v35 = vld [vmem:[%s3856_s26 + $0x80] sm:$0xff]  ;;  %v942_v54 = vmul.f32 %v6289_v0, %v6266_v50 }
  0x63   : > { %v4505_v63 = vmul.f32 %v4493_v61, %v6305_v5  ;;  %v4509_v49 = vmul.f32 %v4496_v33, %v6307_v38  ;;  %v4512_v28 = vld [vmem:[%s3856_s26 + $0x74] sm:$0xff]  ;;  %v1456_v26 = vadd.f32 %v6312_v12, %v1428_v19  ;;  %v1120_v61 = vadd.f32 %v4405_v37, %v1092_v59  ;;  %6318 = vst [vmem:[#allocation9_spill] sm:$0xff] %v4535_v35  ;;  %v6320_v12 = vld [vmem:[#allocation54_spill] sm:$0xff]  ;;  %v6321_v59 = vld [vmem:[#allocation75_spill] sm:$0xff] }
  0x64   : > { %6309 = vst [vmem:[#allocation67_spill] sm:$0xff] %v4512_v28  ;;  %v4515_v34 = vld [vmem:[%s3856_s26 + $0x75] sm:$0xff]  ;;  %v894_v18 = vadd.f32 %v886_v2, %v866_v40  ;;  %v4552_v40 = vld [vmem:[%s3856_s26 + $0x81] sm:$0xff] }
  0x65   : > { %6306 = vst [vmem:[#allocation32_spill] sm:$0xff] %v4505_v63  ;;  %6308 = vst [vmem:[#allocation38_spill] sm:$0xff] %v4509_v49  ;;  %v6311_v57 = vld [vmem:[#allocation52_spill] sm:$0xff]  ;;  %v6313_v33 = vld [vmem:[#allocation77_spill] sm:$0xff]  ;;  %v614_v49 = vadd.f32 %v606_v13, %v586_v52 }
  0x66   : > { %6310 = vst [vmem:[#allocation33_spill] sm:$0xff] %v4515_v34  ;;  %v635_v39 = vmul.f32 %v6311_v57, %v3903_v36  ;;  %v4525_v38 = vmul.f32 %v4512_v28, %v6313_v33  ;;  %v6315_v5 = vld [vmem:[#allocation80_spill] sm:$0xff]  ;;  %v1484_v28 = vadd.f32 %v6321_v59, %v1456_v26  ;;  %v1148_v33 = vadd.f32 %v4412_v11, %v1120_v61  ;;  %v4555_v0 = vld [vmem:[%s3856_s26 + $0x82] sm:$0xff] }
  0x67   : > { %v4529_v46 = vmul.f32 %v4515_v34, %v6315_v5  ;;  %v4532_v15 = vld [vmem:[%s3856_s26 + $0x76] sm:$0xff]  ;;  %6325 = vst [vmem:[#allocation72_spill] sm:$0xff] %v4552_v40  ;;  %6326 = vst [vmem:[#allocation47_spill] sm:$0xff] %v4555_v0  ;;  %v922_v13 = vadd.f32 %v914_v9, %v894_v18  ;;  %v6328_v26 = vld [vmem:[#allocation55_spill] sm:$0xff] }
  0x68   : > { %6314 = vst [vmem:[#allocation36_spill] sm:$0xff] %v4525_v38  ;;  %6317 = vst [vmem:[#allocation71_spill] sm:$0xff] %v4532_v15  ;;  %v6319_v19 = vld [vmem:[#allocation12_spill] sm:$0xff]  ;;  %v6322_v34 = vld [vmem:[#allocation81_spill] sm:$0xff]  ;;  %v643_v63 = vadd.f32 %v635_v39, %v614_v49  ;;  %v691_v11 = vmul.f32 %v6328_v26, %v3915_v43  ;;  %v998_v39 = vmul.f32 %v6303_v21, %v6268_v45 }
  0x69   : > { %6316 = vst [vmem:[#allocation45_spill] sm:$0xff] %v4529_v46  ;;  %v663_v37 = vmul.f32 %v6320_v12, %v6319_v19  ;;  %v4545_v5 = vmul.f32 %v4532_v15, %v6322_v34  ;;  %v6323_v46 = vld [vmem:[#allocation83_spill] sm:$0xff]  ;;  %v6327_v52 = vld [vmem:[#allocation28_spill] sm:$0xff]  ;;  %v1176_v15 = vadd.f32 %v4416_v58, %v1148_v33  ;;  %v6332_v34 = vld [vmem:[#allocation89_spill] sm:$0xff] }
  0x6a   : > { %v4549_v2 = vmul.f32 %v4535_v35, %v6323_v46  ;;  %v970_v38 = vmul.f32 %v6296_v31, %v6327_v52  ;;  %v6329_v61 = vld [vmem:[#allocation84_spill] sm:$0xff]  ;;  %v6330_v35 = vld [vmem:[#allocation85_spill] sm:$0xff]  ;;  %v4569_v9 = vmul.f32 %v4555_v0, %v6332_v34  ;;  %v4572_v18 = vld [vmem:[%s3856_s26 + $0x83] sm:$0xff]  ;;  %v950_v31 = vadd.f32 %v942_v54, %v922_v13 }
  0x6b   : > { %v1512_v59 = vadd.f32 %v6329_v61, %v1484_v28  ;;  %v4565_v46 = vmul.f32 %v4552_v40, %v6330_v35  ;;  %6334 = vst [vmem:[#allocation74_spill] sm:$0xff] %v4572_v18  ;;  %v4575_v49 = vld [vmem:[%s3856_s26 + $0x84] sm:$0xff]  ;;  %v6336_v28 = vld [vmem:[#allocation56_spill] sm:$0xff]  ;;  %v1204_v40 = vadd.f32 %v4427_v20, %v1176_v15  ;;  %v6344_v20 = vld [vmem:[#allocation61_spill] sm:$0xff] }
  0x6c   : > { %6324 = vst [vmem:[#allocation46_spill] sm:$0xff] %v4549_v2  ;;  %6333 = vst [vmem:[#allocation52_spill] sm:$0xff] %v4569_v9  ;;  %v671_v2 = vadd.f32 %v663_v37, %v643_v63  ;;  %v719_v58 = vmul.f32 %v6336_v28, %v3923_v47  ;;  %v6337_v33 = vld [vmem:[#allocation86_spill] sm:$0xff]  ;;  %v6340_v34 = vld [vmem:[#allocation95_spill] sm:$0xff]  ;;  %v978_v21 = vadd.f32 %v970_v38, %v950_v31 }
  0x6d   : > { %6331 = vst [vmem:[#allocation73_spill] sm:$0xff] %v4565_v46  ;;  %6335 = vst [vmem:[#allocation54_spill] sm:$0xff] %v4575_v49  ;;  %v1540_v61 = vadd.f32 %v6337_v33, %v1512_v59  ;;  %v6338_v35 = vld [vmem:[#allocation94_spill] sm:$0xff]  ;;  %v4589_v9 = vmul.f32 %v4575_v49, %v6340_v34  ;;  %v1027_v37 = vmul.f32 %v6311_v57, %v6271_v4  ;;  %v6345_v59 = vld [vmem:[#allocation88_spill] sm:$0xff] }
  0x6e   : > { %v4585_v0 = vmul.f32 %v4572_v18, %v6338_v35  ;;  %v4592_v54 = vld [vmem:[%s3856_s26 + $0x85] sm:$0xff]  ;;  %v699_v13 = vadd.f32 %v691_v11, %v671_v2  ;;  %v747_v15 = vmul.f32 %v6344_v20, %v3931_v51  ;;  %v1233_v18 = vadd.f32 %v4431_v55, %v1204_v40  ;;  %v6346_v49 = vld [vmem:[#allocation97_spill] sm:$0xff] }
  0x6f   : > { %6341 = vst [vmem:[#allocation55_spill] sm:$0xff] %v4589_v9  ;;  %6342 = vst [vmem:[#allocation84_spill] sm:$0xff] %v4592_v54  ;;  %v4595_v63 = vld [vmem:[%s3856_s26 + $0x86] sm:$0xff]  ;;  %v1568_v33 = vadd.f32 %v6345_v59, %v1540_v61  ;;  %v4605_v34 = vmul.f32 %v4592_v54, %v6346_v49  ;;  %v1006_v31 = vadd.f32 %v998_v39, %v978_v21 }
  0x70   : > { %6339 = vst [vmem:[#allocation75_spill] sm:$0xff] %v4585_v0  ;;  %6343 = vst [vmem:[#allocation56_spill] sm:$0xff] %v4595_v63  ;;  %v6348_v35 = vld [vmem:[#allocation98_spill] sm:$0xff]  ;;  %v1055_v57 = vmul.f32 %v6320_v12, %v6272_v48  ;;  %v727_v2 = vadd.f32 %v719_v58, %v699_v13  ;;  %v1261_v54 = vadd.f32 %v4441_v29, %v1233_v18  ;;  %v6352_v12 = vld [vmem:[#allocation63_spill] sm:$0xff] }
  0x71   : > { %6347 = vst [vmem:[#allocation86_spill] sm:$0xff] %v4605_v34  ;;  %v4609_v9 = vmul.f32 %v4595_v63, %v6348_v35  ;;  %v427_v38 = vld [vmem:[%s3856_s26 + $0x40] sm:$0xff]  ;;  %v1083_v49 = vmul.f32 %v6328_v26, %v6273_v60  ;;  %v1111_v63 = vmul.f32 %v6336_v28, %v6274_v32  ;;  %v1035_v21 = vadd.f32 %v1027_v37, %v1006_v31  ;;  %v6354_v29 = vld [vmem:[#allocation64_spill] sm:$0xff]  ;;  %v6355_v26 = vld [vmem:[#allocation7_spill] sm:$0xff] }
  0x72   : > { %v6350_v11 = vld [vmem:[#allocation62_spill] sm:$0xff]  ;;  %v755_v35 = vadd.f32 %v747_v15, %v727_v2  ;;  %v803_v58 = vmul.f32 %v6352_v12, %v6233_v41  ;;  %v439_v13 = vmul.f32 %v3859_v8, %v427_v38  ;;  %v832_v18 = vmul.f32 %v6354_v29, %v6244_v44 }
  0x73   : > { %6349 = vst [vmem:[#allocation61_spill] sm:$0xff] %v4609_v9  ;;  %v775_v61 = vmul.f32 %v6350_v11, %v3942_v56  ;;  %v455_v59 = vld [vmem:[%s3856_s26 + $0x41] sm:$0xff]  ;;  %v6353_v9 = vld [vmem:[#allocation92_spill] sm:$0xff]  ;;  %v1063_v28 = vadd.f32 %v1055_v57, %v1035_v21 }
  0x74   : > { %v6351_v55 = vld [vmem:[#allocation90_spill] sm:$0xff]  ;;  %v447_v37 = vadd.f32 %v3851_v7, %v439_v13  ;;  %v6359_v7 = vld [vmem:[#allocation48_spill] sm:$0xff] }
  0x75   : > { %v1596_v40 = vadd.f32 %v6351_v55, %v1568_v33  ;;  %v483_v39 = vld [vmem:[%s3856_s26 + $0x42] sm:$0xff]  ;;  %v1289_v33 = vadd.f32 %v4445_v1, %v1261_v54  ;;  %v467_v55 = vmul.f32 %v6355_v26, %v455_v59  ;;  %v783_v46 = vadd.f32 %v775_v61, %v755_v35  ;;  %v6358_v54 = vld [vmem:[#allocation68_spill] sm:$0xff] }
  0x76   : > { %v511_v0 = vld [vmem:[%s3856_s26 + $0x43] sm:$0xff]  ;;  %v495_v15 = vmul.f32 %v3865_v10, %v483_v39  ;;  %v1091_v59 = vadd.f32 %v1083_v49, %v1063_v28 }
  0x77   : > { %v1625_v34 = vadd.f32 %v6353_v9, %v1596_v40  ;;  %v6356_v31 = vld [vmem:[#allocation10_spill] sm:$0xff]  ;;  %v1317_v38 = vadd.f32 %v4454_v25, %v1289_v33  ;;  %v6357_v9 = vld [vmem:[#allocation39_spill] sm:$0xff]  ;;  %v860_v40 = vmul.f32 %v6358_v54, %v6253_v42  ;;  %v811_v26 = vadd.f32 %v803_v58, %v783_v46 }
  0x78   : > { %v1139_v1 = vmul.f32 %v6344_v20, %v6357_v9  ;;  %v539_v8 = vld [vmem:[%s3856_s26 + $0x44] sm:$0xff]  ;;  %v475_v35 = vadd.f32 %v467_v55, %v447_v37  ;;  %v523_v57 = vmul.f32 %v3875_v17, %v511_v0  ;;  %v1119_v33 = vadd.f32 %v1111_v63, %v1091_v59 }
  0x79   : > { %v1653_v2 = vadd.f32 %v6356_v31, %v1625_v34  ;;  %v1345_v39 = vadd.f32 %v4458_v3, %v1317_v38  ;;  %v6360_v34 = vld [vmem:[#allocation40_spill] sm:$0xff]  ;;  %v6361_v21 = vld [vmem:[#allocation70_spill] sm:$0xff]  ;;  %v840_v31 = vadd.f32 %v832_v18, %v811_v26  ;;  %v551_v46 = vmul.f32 %v3883_v22, %v539_v8  ;;  %v6362_v49 = vld [vmem:[#allocation99_spill] sm:$0xff] }
  0x7a   : > { %v1167_v25 = vmul.f32 %v6350_v11, %v6360_v34  ;;  %v888_v20 = vmul.f32 %v6361_v21, %v6260_v24  ;;  %v567_v13 = vld [vmem:[%s3856_s26 + $0x45] sm:$0xff]  ;;  %v503_v10 = vadd.f32 %v495_v15, %v475_v35  ;;  %v1195_v55 = vmul.f32 %v6352_v12, %v6281_v27  ;;  %v6364_v18 = vld [vmem:[#allocation20_spill] sm:$0xff] }
  0x7b   : > { %v1681_v61 = vadd.f32 %v6359_v7, %v1653_v2  ;;  %v1373_v0 = vadd.f32 %v4467_v53, %v1345_v39  ;;  %v6363_v3 = vld [vmem:[#allocation78_spill] sm:$0xff]  ;;  %v1147_v37 = vadd.f32 %v1139_v1, %v1119_v33  ;;  %v868_v2 = vadd.f32 %v860_v40, %v840_v31  ;;  %v6366_v59 = vld [vmem:[#allocation79_spill] sm:$0xff]  ;;  %v6367_v40 = vld [vmem:[#allocation100_spill] sm:$0xff] }
  0x7c   : > { %v916_v28 = vmul.f32 %v6363_v3, %v6265_v16  ;;  %v595_v11 = vld [vmem:[%s3856_s26 + $0x46] sm:$0xff]  ;;  %v531_v38 = vadd.f32 %v523_v57, %v503_v10  ;;  %v579_v63 = vmul.f32 %v6295_v14, %v567_v13  ;;  %v944_v12 = vmul.f32 %v6366_v59, %v6266_v50 }
  0x7d   : > { %v1709_v58 = vadd.f32 %v6362_v49, %v1681_v61  ;;  %v1401_v8 = vadd.f32 %v4471_v6, %v1373_v0  ;;  %v6365_v15 = vld [vmem:[#allocation42_spill] sm:$0xff]  ;;  %v1175_v35 = vadd.f32 %v1167_v25, %v1147_v37  ;;  %v896_v7 = vadd.f32 %v888_v20, %v868_v2  ;;  %v6372_v0 = vld [vmem:[#allocation51_spill] sm:$0xff]  ;;  %v4686_v2 = vld [vmem:[%s3856_s26 + $0x51] sm:$0xff] }
  0x7e   : > { %v1224_v53 = vmul.f32 %v6354_v29, %v6365_v15  ;;  %v559_v61 = vadd.f32 %v551_v46, %v531_v38  ;;  %v607_v1 = vmul.f32 %v6248_v30, %v595_v11  ;;  %v1252_v39 = vmul.f32 %v6358_v54, %v6284_v23  ;;  %v6368_v6 = vld [vmem:[#allocation82_spill] sm:$0xff]  ;;  %v4673_v29 = vld [vmem:[%s3856_s26 + $0x50] sm:$0xff]  ;;  %v6369_v46 = vld [vmem:[#allocation101_spill] sm:$0xff] }
  0x7f   : > { %v1737_v26 = vadd.f32 %v6364_v18, %v1709_v58  ;;  %v1430_v57 = vadd.f32 %v4486_v62, %v1401_v8  ;;  %v972_v13 = vmul.f32 %v6368_v6, %v6327_v52  ;;  %v1203_v33 = vadd.f32 %v1195_v55, %v1175_v35  ;;  %v6371_v58 = vld [vmem:[#allocation25_spill] sm:$0xff]  ;;  %v6373_v11 = vld [vmem:[#allocation87_spill] sm:$0xff]  ;;  %v6374_v18 = vld [vmem:[#allocation32_spill] sm:$0xff] }
  0x80   : > { %v924_v31 = vadd.f32 %v916_v28, %v896_v7  ;;  %v587_v25 = vadd.f32 %v579_v63, %v559_v61  ;;  %v636_v20 = vmul.f32 %v4673_v29, %v3903_v36  ;;  %v1280_v54 = vmul.f32 %v6361_v21, %v6372_v0  ;;  %v6375_v8 = vld [vmem:[#allocation53_spill] sm:$0xff]  ;;  %v6377_v61 = vld [vmem:[#allocation91_spill] sm:$0xff] }
  0x81   : > { %v1765_v10 = vadd.f32 %v6367_v40, %v1737_v26  ;;  %v1458_v62 = vadd.f32 %v6371_v58, %v1430_v57  ;;  %v1000_v37 = vmul.f32 %v6373_v11, %v6268_v45  ;;  %v1232_v55 = vadd.f32 %v1224_v53, %v1203_v33  ;;  %v6376_v21 = vld [vmem:[#allocation57_spill] sm:$0xff]  ;;  %v6378_v33 = vld [vmem:[#allocation38_spill] sm:$0xff] }
  0x82   : > { %v952_v28 = vadd.f32 %v944_v12, %v924_v31  ;;  %v615_v38 = vadd.f32 %v607_v1, %v587_v25  ;;  %v664_v63 = vmul.f32 %v4686_v2, %v6319_v19  ;;  %v1308_v35 = vmul.f32 %v6363_v3, %v6375_v8  ;;  %v4699_v53 = vld [vmem:[%s3856_s26 + $0x52] sm:$0xff]  ;;  %v6379_v25 = vld [vmem:[#allocation58_spill] sm:$0xff] }
  0x83   : > { %v4678_v49 = vadd.f32 %v6369_v46, %v1765_v10  ;;  %v1486_v26 = vadd.f32 %v6374_v18, %v1458_v62  ;;  %v1336_v7 = vmul.f32 %v6366_v59, %v6376_v21  ;;  %v1029_v40 = vmul.f32 %v6377_v61, %v6271_v4  ;;  %v6380_v46 = vld [vmem:[#allocation59_spill] sm:$0xff]  ;;  %v6381_v58 = vld [vmem:[#allocation93_spill] sm:$0xff] }
  0x84   : > { %v1260_v12 = vadd.f32 %v1252_v39, %v1232_v55  ;;  %v980_v1 = vadd.f32 %v972_v13, %v952_v28  ;;  %v644_v10 = vadd.f32 %v636_v20, %v615_v38  ;;  %v692_v57 = vmul.f32 %v4699_v53, %v3915_v43  ;;  %v4711_v18 = vld [vmem:[%s3856_s26 + $0x53] sm:$0xff] }
  0x85   : > { %6370 = vst [vmem:[#allocation88_spill] sm:$0xff] %v4678_v49  ;;  %1809 = vadd.xlane.f32.xlu0 %v4678_v49  ;;  %v1514_v31 = vadd.f32 %v6378_v33, %v1486_v26  ;;  %v1364_v3 = vmul.f32 %v6368_v6, %v6379_v25  ;;  %v1392_v59 = vmul.f32 %v6373_v11, %v6380_v46  ;;  %v6382_v28 = vld [vmem:[#allocation36_spill] sm:$0xff]  ;;  %v6384_v33 = vld [vmem:[#allocation65_spill] sm:$0xff]  ;;  %v6385_v49 = vld [vmem:[#allocation19_spill] sm:$0xff] }
  0x86   : > { %v1057_v62 = vmul.f32 %v6381_v58, %v6272_v48  ;;  %v1288_v39 = vadd.f32 %v1280_v54, %v1260_v12  ;;  %v1008_v13 = vadd.f32 %v1000_v37, %v980_v1  ;;  %v672_v20 = vadd.f32 %v664_v63, %v644_v10  ;;  %v6383_v26 = vld [vmem:[#allocation60_spill] sm:$0xff]  ;;  %v6386_v12 = vld [vmem:[#allocation45_spill] sm:$0xff] }
  0x87   : > { %v720_v55 = vmul.f32 %v4711_v18, %v3923_v47  ;;  %v1542_v38 = vadd.f32 %v6382_v28, %v1514_v31  ;;  %v1421_v6 = vmul.f32 %v6377_v61, %v6383_v26  ;;  %v1449_v11 = vmul.f32 %v6381_v58, %v6384_v33  ;;  %v3134_v19 = vld [vmem:[%s3856_s26 + $0x54] sm:$0xff] }
  0x88   : > { %v1085_v43 = vmul.f32 %v6385_v49, %v6273_v60  ;;  %v1316_v48 = vadd.f32 %v1308_v35, %v1288_v39  ;;  %v1037_v54 = vadd.f32 %v1029_v40, %v1008_v13  ;;  %v700_v37 = vadd.f32 %v692_v57, %v672_v20  ;;  %v6387_v10 = vld [vmem:[#allocation69_spill] sm:$0xff]  ;;  %v6388_v28 = vld [vmem:[#allocation76_spill] sm:$0xff] }
  0x89   : > { %v748_v63 = vmul.f32 %v3134_v19, %v3931_v51  ;;  %v1570_v1 = vadd.f32 %v6386_v12, %v1542_v38  ;;  %v1477_v31 = vmul.f32 %v6385_v49, %v6387_v10  ;;  %v6389_v61 = vld [vmem:[#allocation44_spill] sm:$0xff]  ;;  %v6390_v39 = vld [vmem:[#allocation77_spill] sm:$0xff] }
  0x8a   : > { %v1505_v47 = vmul.f32 %v6389_v61, %v6388_v28  ;;  %v1113_v58 = vmul.f32 %v6389_v61, %v6274_v32  ;;  %v3142_v33 = vld [vmem:[%s3856_s26 + $0x55] sm:$0xff]  ;;  %v1344_v60 = vadd.f32 %v1336_v7, %v1316_v48  ;;  %v1065_v26 = vadd.f32 %v1057_v62, %v1037_v54  ;;  %v6394_v54 = vld [vmem:[#allocation46_spill] sm:$0xff] }
  0x8b   : > { %v728_v35 = vadd.f32 %v720_v55, %v700_v37  ;;  %v776_v40 = vmul.f32 %v3142_v33, %v3942_v56  ;;  %v1598_v57 = vadd.f32 %v4545_v5, %v1570_v1  ;;  %v6391_v13 = vld [vmem:[#allocation96_spill] sm:$0xff]  ;;  %v6395_v5 = vld [vmem:[#allocation81_spill] sm:$0xff]  ;;  %v4756_v32 = vld [vmem:[%s3856_s26 + $0x60] sm:$0xff] }
  0x8c   : > { %v1533_v20 = vmul.f32 %v6391_v13, %v6390_v39  ;;  %v6392_v38 = vld [vmem:[#allocation80_spill] sm:$0xff]  ;;  %v1141_v28 = vmul.f32 %v6391_v13, %v6357_v9  ;;  %v1372_v48 = vadd.f32 %v1364_v3, %v1344_v60  ;;  %v1093_v7 = vadd.f32 %v1085_v43, %v1065_v26  ;;  %v6396_v1 = vld [vmem:[#allocation49_spill] sm:$0xff]  ;;  %v6397_v39 = vld [vmem:[#allocation83_spill] sm:$0xff] }
  0x8d   : > { %v6393_v49 = vld [vmem:[#allocation24_spill] sm:$0xff]  ;;  %v756_v62 = vadd.f32 %v748_v63, %v728_v35  ;;  %v1627_v37 = vadd.f32 %v6394_v54, %v1598_v57  ;;  %v4747_v56 = vmul.f32 %v6396_v1, %v6395_v5  ;;  %v6398_v10 = vld [vmem:[#allocation21_spill] sm:$0xff]  ;;  %v833_v26 = vmul.f32 %v4756_v32, %v6244_v44  ;;  %v4761_v63 = vld [vmem:[%s3856_s26 + $0x61] sm:$0xff] }
  0x8e   : > { %v4738_v12 = vmul.f32 %v6393_v49, %v6392_v38  ;;  %v3150_v51 = vld [vmem:[%s3856_s26 + $0x56] sm:$0xff]  ;;  %v4751_v38 = vmul.f32 %v6398_v10, %v6397_v39  ;;  %v1169_v9 = vmul.f32 %v6393_v49, %v6360_v34  ;;  %v1400_v43 = vadd.f32 %v1392_v59, %v1372_v48  ;;  %v6400_v48 = vld [vmem:[#allocation6_spill] sm:$0xff] }
  0x8f   : > { %v804_v55 = vmul.f32 %v3150_v51, %v6233_v41  ;;  %v1121_v60 = vadd.f32 %v1113_v58, %v1093_v7  ;;  %v784_v3 = vadd.f32 %v776_v40, %v756_v62  ;;  %v6399_v35 = vld [vmem:[#allocation73_spill] sm:$0xff]  ;;  %v1197_v54 = vmul.f32 %v6396_v1, %v6281_v27  ;;  %v4771_v40 = vld [vmem:[%s3856_s26 + $0x62] sm:$0xff]  ;;  %v6401_v62 = vld [vmem:[#allocation52_spill] sm:$0xff] }
  0x90   : > { %v1655_v57 = vadd.f32 %v6399_v35, %v1627_v37  ;;  %v1226_v39 = vmul.f32 %v6398_v10, %v6365_v15  ;;  %v861_v5 = vmul.f32 %v4761_v63, %v6253_v42  ;;  %v1429_v41 = vadd.f32 %v1421_v6, %v1400_v43  ;;  %v6402_v35 = vld [vmem:[#allocation7_spill] sm:$0xff]  ;;  %v6403_v15 = vld [vmem:[#allocation8_spill] sm:$0xff] }
  0x91   : > { %v1149_v59 = vadd.f32 %v1141_v28, %v1121_v60  ;;  %v812_v58 = vadd.f32 %v804_v55, %v784_v3  ;;  %v440_v7 = vmul.f32 %v4673_v29, %v6400_v48  ;;  %v889_v37 = vmul.f32 %v4771_v40, %v6260_v24  ;;  %v4785_v55 = vld [vmem:[%s5910_s3] ss:$0 sm:$0xff]  ;;  %v6405_v43 = vld [vmem:[#allocation75_spill] sm:$0xff] }
  0x92   : > { %v1683_v44 = vadd.f32 %v6401_v62, %v1655_v57  ;;  %v468_v27 = vmul.f32 %v4686_v2, %v6402_v35  ;;  %v496_v34 = vmul.f32 %v4699_v53, %v6403_v15  ;;  %v1457_v42 = vadd.f32 %v1449_v11, %v1429_v41  ;;  %6404 = vst [vmem:[#allocation62_spill] sm:$0xff] %v4785_v55  ;;  %v6406_v3 = vld [vmem:[#allocation50_spill] sm:$0xff] }
  0x93   : > { %v1177_v6 = vadd.f32 %v1169_v9, %v1149_v59  ;;  %v841_v28 = vadd.f32 %v833_v26, %v812_v58  ;;  %v448_v29 = vadd.f32 %v4785_v55, %v440_v7  ;;  %v1254_v57 = vmul.f32 %v6406_v3, %v6284_v23  ;;  %v6407_v59 = vld [vmem:[#allocation55_spill] sm:$0xff]  ;;  %v6408_v62 = vld [vmem:[#allocation66_spill] sm:$0xff] }
  0x94   : > { %v1711_v60 = vadd.f32 %v6405_v43, %v1683_v44  ;;  %v917_v2 = vmul.f32 %v6389_v61, %v6265_v16  ;;  %v524_v41 = vmul.f32 %v4711_v18, %v3875_v17  ;;  %v1485_v9 = vadd.f32 %v1477_v31, %v1457_v42  ;;  %v6409_v55 = vld [vmem:[#allocation86_spill] sm:$0xff]  ;;  %v6410_v42 = vld [vmem:[#allocation29_spill] sm:$0xff] }
  0x95   : > { %v1205_v53 = vadd.f32 %v1197_v54, %v1177_v6  ;;  %v869_v11 = vadd.f32 %v861_v5, %v841_v28  ;;  %v476_v26 = vadd.f32 %v468_v27, %v448_v29  ;;  %v1282_v7 = vmul.f32 %v6408_v62, %v6372_v0  ;;  %v6411_v29 = vld [vmem:[#allocation61_spill] sm:$0xff] }
  0x96   : > { %v1739_v58 = vadd.f32 %v6407_v59, %v1711_v60  ;;  %v945_v44 = vmul.f32 %v6391_v13, %v6266_v50  ;;  %v552_v43 = vmul.f32 %v3134_v19, %v3883_v22  ;;  %v1513_v24 = vadd.f32 %v1505_v47, %v1485_v9  ;;  %v6413_v47 = vld [vmem:[#allocation67_spill] sm:$0xff]  ;;  %v6416_v9 = vld [vmem:[#allocation89_spill] sm:$0xff]  ;;  %v6418_v59 = vld [vmem:[#allocation34_spill] sm:$0xff] }
  0x97   : > { %v1234_v15 = vadd.f32 %v1226_v39, %v1205_v53  ;;  %v897_v61 = vadd.f32 %v889_v37, %v869_v11  ;;  %v504_v16 = vadd.f32 %v496_v34, %v476_v26  ;;  %v1310_v31 = vmul.f32 %v6410_v42, %v6375_v8  ;;  %v6417_v11 = vld [vmem:[#allocation71_spill] sm:$0xff] }
  0x98   : > { %v1767_v18 = vadd.f32 %v6409_v55, %v1739_v58  ;;  %v973_v27 = vmul.f32 %v6393_v49, %v6327_v52  ;;  %v580_v5 = vmul.f32 %v3142_v33, %v6295_v14  ;;  %v1541_v54 = vadd.f32 %v1533_v20, %v1513_v24  ;;  %v6414_v24 = vld [vmem:[#allocation85_spill] sm:$0xff] }
  0x99   : > { %v1262_v6 = vadd.f32 %v1254_v57, %v1234_v15  ;;  %v925_v28 = vadd.f32 %v917_v2, %v897_v61  ;;  %v532_v13 = vadd.f32 %v524_v41, %v504_v16  ;;  %v1338_v34 = vmul.f32 %v6413_v47, %v6376_v21  ;;  %v6415_v15 = vld [vmem:[#allocation33_spill] sm:$0xff] }
  0x9a   : > { %v4808_v19 = vadd.f32 %v6411_v29, %v1767_v18  ;;  %v1001_v39 = vmul.f32 %v6396_v1, %v6268_v45  ;;  %v608_v37 = vmul.f32 %v3150_v51, %v6248_v30  ;;  %v1569_v55 = vadd.f32 %v4738_v12, %v1541_v54  ;;  %v6420_v18 = vld [vmem:[#allocation94_spill] sm:$0xff] }
  0x9b   : > { %v1290_v49 = vadd.f32 %v1282_v7, %v1262_v6  ;;  %v953_v60 = vadd.f32 %v945_v44, %v925_v28  ;;  %v560_v33 = vadd.f32 %v552_v43, %v532_v13  ;;  %v1646_v16 = vmul.f32 %v6406_v3, %v6414_v24  ;;  %v6419_v7 = vld [vmem:[#allocation12_spill] sm:$0xff]  ;;  %v6423_v6 = vld [vmem:[#allocation35_spill] sm:$0xff]  ;;  %v6424_v13 = vld [vmem:[#allocation13_spill] sm:$0xff] }
  0x9c   : > { %6412 = vst [vmem:[#allocation90_spill] sm:$0xff] %v4808_v19  ;;  %1813 = vadd.xlane.f32.xlu1 %v4808_v19  ;;  %v1366_v20 = vmul.f32 %v6415_v15, %v6379_v25  ;;  %v1030_v57 = vmul.f32 %v6398_v10, %v6271_v4  ;;  %v637_v1 = vmul.f32 %v4756_v32, %v3903_v36  ;;  %v6443_v4 = vld [vmem:[#allocation17_spill] sm:$0xff] }
  0x9d   : > { %v1597_v51 = vadd.f32 %v4747_v56, %v1569_v55  ;;  %v1318_v12 = vadd.f32 %v1310_v31, %v1290_v49  ;;  %v981_v2 = vadd.f32 %v973_v27, %v953_v60  ;;  %v588_v41 = vadd.f32 %v580_v5, %v560_v33  ;;  %v6421_v27 = vld [vmem:[#allocation60_spill] sm:$0xff]  ;;  %v6422_v5 = vld [vmem:[#allocation9_spill] sm:$0xff] }
  0x9e   : > { %v1674_v53 = vmul.f32 %v6408_v62, %v6416_v9  ;;  %v1394_v26 = vmul.f32 %v6417_v11, %v6380_v46  ;;  %v1058_v58 = vmul.f32 %v6406_v3, %v6418_v59  ;;  %v665_v10 = vmul.f32 %v4761_v63, %v6419_v7  ;;  %v6426_v60 = vld [vmem:[#allocation65_spill] sm:$0xff]  ;;  %v6427_v33 = vld [vmem:[#allocation72_spill] sm:$0xff] }
  0x9f   : > { %v1626_v44 = vadd.f32 %v4751_v38, %v1597_v51  ;;  %v1346_v43 = vadd.f32 %v1338_v34, %v1318_v12  ;;  %v1009_v56 = vadd.f32 %v1001_v39, %v981_v2  ;;  %v616_v61 = vadd.f32 %v608_v37, %v588_v41  ;;  %v4844_v34 = vld [vmem:[%s3856_s26 + $0x63] sm:$0xff]  ;;  %v6428_v12 = vld [vmem:[#allocation37_spill] sm:$0xff]  ;;  %v6438_v7 = vld [vmem:[#allocation40_spill] sm:$0xff] }
  0xa0   : > { %v1702_v31 = vmul.f32 %v6410_v42, %v6420_v18  ;;  %v1423_v54 = vmul.f32 %v6422_v5, %v6421_v27  ;;  %v1086_v28 = vmul.f32 %v6408_v62, %v6423_v6  ;;  %v693_v3 = vmul.f32 %v4771_v40, %v6424_v13  ;;  %v6425_v39 = vld [vmem:[#allocation95_spill] sm:$0xff]  ;;  %v6429_v62 = vld [vmem:[#allocation14_spill] sm:$0xff] }
  0xa1   : > { %v1654_v29 = vadd.f32 %v1646_v16, %v1626_v44  ;;  %v1374_v55 = vadd.f32 %v1366_v20, %v1346_v43  ;;  %v1038_v49 = vadd.f32 %v1030_v57, %v1009_v56  ;;  %v645_v38 = vadd.f32 %v637_v1, %v616_v61  ;;  %v4855_v1 = vld [vmem:[%s3856_s26 + $0x64] sm:$0xff]  ;;  %v6430_v44 = vld [vmem:[#allocation97_spill] sm:$0xff] }
  0xa2   : > { %v1730_v37 = vmul.f32 %v6413_v47, %v6425_v39  ;;  %v1451_v51 = vmul.f32 %v6427_v33, %v6426_v60  ;;  %v1114_v2 = vmul.f32 %v6410_v42, %v6428_v12  ;;  %v721_v41 = vmul.f32 %v4844_v34, %v6429_v62  ;;  %v6431_v56 = vld [vmem:[#allocation69_spill] sm:$0xff]  ;;  %v6432_v61 = vld [vmem:[#allocation47_spill] sm:$0xff] }
  0xa3   : > { %v1682_v19 = vadd.f32 %v1674_v53, %v1654_v29  ;;  %v1402_v16 = vadd.f32 %v1394_v26, %v1374_v55  ;;  %v1066_v20 = vadd.f32 %v1058_v58, %v1038_v49  ;;  %v673_v57 = vadd.f32 %v665_v10, %v645_v38  ;;  %v6433_v13 = vld [vmem:[#allocation39_spill] sm:$0xff]  ;;  %v6435_v29 = vld [vmem:[#allocation98_spill] sm:$0xff]  ;;  %v6436_v49 = vld [vmem:[#allocation76_spill] sm:$0xff] }
  0xa4   : > { %v1758_v43 = vmul.f32 %v6415_v15, %v6430_v44  ;;  %v1479_v6 = vmul.f32 %v6432_v61, %v6431_v56  ;;  %v1142_v59 = vmul.f32 %v6413_v47, %v6433_v13  ;;  %v6434_v42 = vld [vmem:[#allocation15_spill] sm:$0xff]  ;;  %v1786_v55 = vmul.f32 %v6417_v11, %v6435_v29  ;;  %v6437_v38 = vld [vmem:[#allocation74_spill] sm:$0xff]  ;;  %v6439_v47 = vld [vmem:[#allocation16_spill] sm:$0xff] }
  0xa5   : > { %v749_v12 = vmul.f32 %v4855_v1, %v6434_v42  ;;  %v1710_v62 = vadd.f32 %v1702_v31, %v1682_v19  ;;  %v1431_v53 = vadd.f32 %v1423_v54, %v1402_v16  ;;  %v1094_v26 = vadd.f32 %v1086_v28, %v1066_v20  ;;  %v4866_v10 = vld [vmem:[%s3856_s26 + $0x65] sm:$0xff] }
  0xa6   : > { %v701_v58 = vadd.f32 %v693_v3, %v673_v57  ;;  %v1507_v56 = vmul.f32 %v6437_v38, %v6436_v49  ;;  %v1170_v60 = vmul.f32 %v6415_v15, %v6438_v7  ;;  %v777_v13 = vmul.f32 %v4866_v10, %v6439_v47  ;;  %v4877_v28 = vld [vmem:[%s3856_s26 + $0x66] sm:$0xff]  ;;  %v6440_v3 = vld [vmem:[#allocation77_spill] sm:$0xff] }
  0xa7   : > { %v1738_v42 = vadd.f32 %v1730_v37, %v1710_v62  ;;  %v1459_v19 = vadd.f32 %v1451_v51, %v1431_v53  ;;  %v1122_v31 = vadd.f32 %v1114_v2, %v1094_v26  ;;  %v6441_v16 = vld [vmem:[#allocation54_spill] sm:$0xff]  ;;  %v6442_v57 = vld [vmem:[#allocation41_spill] sm:$0xff]  ;;  %v805_v49 = vmul.f32 %v4877_v28, %v6443_v4  ;;  %v4886_v37 = vld [vmem:[%s3856_s26 + $0x70] sm:$0xff] }
  0xa8   : > { %v729_v54 = vadd.f32 %v721_v41, %v701_v58  ;;  %v1535_v20 = vmul.f32 %v6441_v16, %v6440_v3  ;;  %v1198_v29 = vmul.f32 %v6417_v11, %v6442_v57  ;;  %v6444_v51 = vld [vmem:[#allocation80_spill] sm:$0xff]  ;;  %v6446_v41 = vld [vmem:[#allocation42_spill] sm:$0xff] }
  0xa9   : > { %v1766_v15 = vadd.f32 %v1758_v43, %v1738_v42  ;;  %v1487_v7 = vadd.f32 %v1479_v6, %v1459_v19  ;;  %v1150_v36 = vadd.f32 %v1142_v59, %v1122_v31  ;;  %v6445_v2 = vld [vmem:[#allocation84_spill] sm:$0xff]  ;;  %v1227_v53 = vmul.f32 %v6422_v5, %v6446_v41  ;;  %v6447_v26 = vld [vmem:[#allocation18_spill] sm:$0xff]  ;;  %v6449_v59 = vld [vmem:[#allocation81_spill] sm:$0xff] }
  0xaa   : > { %v757_v47 = vadd.f32 %v749_v12, %v729_v54  ;;  %v1563_v62 = vmul.f32 %v6445_v2, %v6444_v51  ;;  %v834_v11 = vmul.f32 %v4886_v37, %v6447_v26  ;;  %v6450_v12 = vld [vmem:[#allocation56_spill] sm:$0xff]  ;;  %v1255_v19 = vmul.f32 %v6427_v33, %v6284_v23 }
  0xab   : > { %v4894_v58 = vadd.f32 %v1786_v55, %v1766_v15  ;;  %v1515_v57 = vadd.f32 %v1507_v56, %v1487_v7  ;;  %v1178_v43 = vadd.f32 %v1170_v60, %v1150_v36  ;;  %v1591_v42 = vmul.f32 %v6450_v12, %v6449_v59  ;;  %v4901_v31 = vld [vmem:[%s3856_s26 + $0x71] sm:$0xff]  ;;  %v6451_v56 = vld [vmem:[#allocation22_spill] sm:$0xff] }
  0xac   : > { %v785_v6 = vadd.f32 %v777_v13, %v757_v47  ;;  %v441_v5 = vmul.f32 %v4756_v32, %v6400_v48  ;;  %v469_v55 = vmul.f32 %v4761_v63, %v6402_v35  ;;  %v4909_v36 = vld [vmem:[%s3856_s26 + $0x90] sm:$0xff]  ;;  %v862_v33 = vmul.f32 %v4901_v31, %v6451_v56  ;;  %v6452_v47 = vld [vmem:[#allocation83_spill] sm:$0xff]  ;;  %v6453_v63 = vld [vmem:[#allocation62_spill] sm:$0xff] }
  0xad   : > { %6448 = vst [vmem:[#allocation63_spill] sm:$0xff] %v4894_v58  ;;  %1811 = vadd.xlane.f32.xlu0 %v4894_v58  ;;  %v1543_v7 = vadd.f32 %v1535_v20, %v1515_v57  ;;  %v1206_v13 = vadd.f32 %v1198_v29, %v1178_v43  ;;  %v1620_v54 = vmul.f32 %v4909_v36, %v6452_v47  ;;  %v4918_v15 = vld [vmem:[%s3856_s26 + $0x72] sm:$0xff] }
  0xae   : > { %v813_v60 = vadd.f32 %v805_v49, %v785_v6  ;;  %v1283_v32 = vmul.f32 %v6432_v61, %v6372_v0  ;;  %v449_v58 = vadd.f32 %v6453_v63, %v441_v5  ;;  %v6454_v20 = vld [vmem:[#allocation8_spill] sm:$0xff]  ;;  %v6455_v6 = vld [vmem:[#allocation23_spill] sm:$0xff]  ;;  %v1311_v61 = vmul.f32 %v6437_v38, %v6375_v8 }
  0xaf   : > { %v497_v57 = vmul.f32 %v4771_v40, %v6454_v20  ;;  %v1571_v23 = vadd.f32 %v1563_v62, %v1543_v7  ;;  %v4924_v29 = vld [vmem:[%s3856_s26 + $0x91] sm:$0xff]  ;;  %v1235_v49 = vadd.f32 %v1227_v53, %v1206_v13  ;;  %v890_v56 = vmul.f32 %v4918_v15, %v6455_v6  ;;  %v6456_v13 = vld [vmem:[#allocation26_spill] sm:$0xff] }
  0xb0   : > { %v842_v43 = vadd.f32 %v834_v11, %v813_v60  ;;  %v1648_v26 = vmul.f32 %v4924_v29, %v6414_v24  ;;  %v4933_v5 = vld [vmem:[%s3856_s26 + $0x73] sm:$0xff]  ;;  %v477_v0 = vadd.f32 %v469_v55, %v449_v58  ;;  %v525_v40 = vmul.f32 %v4844_v34, %v3875_v17 }
  0xb1   : > { %v1599_v62 = vadd.f32 %v1591_v42, %v1571_v23  ;;  %v4938_v7 = vld [vmem:[%s3856_s26 + $0x92] sm:$0xff]  ;;  %v1263_v53 = vadd.f32 %v1255_v19, %v1235_v49  ;;  %v918_v60 = vmul.f32 %v4933_v5, %v6456_v13  ;;  %v1339_v38 = vmul.f32 %v6441_v16, %v6376_v21 }
  0xb2   : > { %v870_v11 = vadd.f32 %v862_v33, %v842_v43  ;;  %v1676_v6 = vmul.f32 %v4938_v7, %v6416_v9  ;;  %v4947_v58 = vld [vmem:[%s3856_s26 + $0x74] sm:$0xff]  ;;  %v505_v55 = vadd.f32 %v497_v57, %v477_v0  ;;  %v553_v23 = vmul.f32 %v4855_v1, %v3883_v22 }
  0xb3   : > { %v1628_v34 = vadd.f32 %v1620_v54, %v1599_v62  ;;  %v4952_v42 = vld [vmem:[%s3856_s26 + $0x93] sm:$0xff]  ;;  %v1291_v19 = vadd.f32 %v1283_v32, %v1263_v53  ;;  %v946_v49 = vmul.f32 %v4947_v58, %v6266_v50  ;;  %v1367_v16 = vmul.f32 %v6445_v2, %v6379_v25 }
  0xb4   : > { %v898_v33 = vadd.f32 %v890_v56, %v870_v11  ;;  %v1704_v43 = vmul.f32 %v4952_v42, %v6420_v18  ;;  %v4961_v0 = vld [vmem:[%s3856_s26 + $0x75] sm:$0xff]  ;;  %v533_v57 = vadd.f32 %v525_v40, %v505_v55  ;;  %v581_v1 = vmul.f32 %v4866_v10, %v6295_v14 }
  0xb5   : > { %v1656_v54 = vadd.f32 %v1648_v26, %v1628_v34  ;;  %v4966_v62 = vld [vmem:[%s3856_s26 + $0x94] sm:$0xff]  ;;  %v1319_v56 = vadd.f32 %v1311_v61, %v1291_v19  ;;  %v974_v53 = vmul.f32 %v4961_v0, %v6327_v52  ;;  %v1395_v2 = vmul.f32 %v6450_v12, %v6380_v46  ;;  %v4989_v46 = vld [vmem:[%s3856_s26 + $0x80] sm:$0xff] }
  0xb6   : > { %v926_v32 = vadd.f32 %v918_v60, %v898_v33  ;;  %v1732_v11 = vmul.f32 %v4966_v62, %v6425_v39  ;;  %v4975_v40 = vld [vmem:[%s3856_s26 + $0x76] sm:$0xff]  ;;  %v561_v55 = vadd.f32 %v553_v23, %v533_v57  ;;  %v609_v10 = vmul.f32 %v4877_v28, %v6248_v30  ;;  %v6457_v57 = vld [vmem:[#allocation11_spill] sm:$0xff] }
  0xb7   : > { %v1684_v26 = vadd.f32 %v1676_v6, %v1656_v54  ;;  %v4980_v34 = vld [vmem:[%s3856_s26 + $0x95] sm:$0xff]  ;;  %v1347_v61 = vadd.f32 %v1339_v38, %v1319_v56  ;;  %v1002_v19 = vmul.f32 %v4975_v40, %v6268_v45  ;;  %v1424_v12 = vmul.f32 %v4909_v36, %v6421_v27  ;;  %v6458_v56 = vld [vmem:[#allocation31_spill] sm:$0xff]  ;;  %v6459_v45 = vld [vmem:[#allocation98_spill] sm:$0xff] }
  0xb8   : > { %v954_v60 = vadd.f32 %v946_v49, %v926_v32  ;;  %v1760_v33 = vmul.f32 %v4980_v34, %v6430_v44  ;;  %v589_v23 = vadd.f32 %v581_v1, %v561_v55  ;;  %v638_v28 = vmul.f32 %v4886_v37, %v6457_v57  ;;  %v4994_v54 = vld [vmem:[%s3856_s26 + $0x96] sm:$0xff]  ;;  %v5003_v44 = vld [vmem:[%s3856_s26 + $0x81] sm:$0xff] }
  0xb9   : > { %v1712_v6 = vadd.f32 %v1704_v43, %v1684_v26  ;;  %v1375_v38 = vadd.f32 %v1367_v16, %v1347_v61  ;;  %v1031_v32 = vmul.f32 %v4989_v46, %v6458_v56  ;;  %v1788_v52 = vmul.f32 %v4994_v54, %v6459_v45  ;;  %v6460_v25 = vld [vmem:[#allocation65_spill] sm:$0xff]  ;;  %v6461_v55 = vld [vmem:[#allocation12_spill] sm:$0xff]  ;;  %v5012_v45 = vld [vmem:[%s3856_s26 + $0x82] sm:$0xff] }
  0xba   : > { %v982_v49 = vadd.f32 %v974_v53, %v954_v60  ;;  %v1452_v27 = vmul.f32 %v4924_v29, %v6460_v25  ;;  %v617_v1 = vadd.f32 %v609_v10, %v589_v23  ;;  %v666_v43 = vmul.f32 %v4901_v31, %v6461_v55  ;;  %v6462_v53 = vld [vmem:[#allocation34_spill] sm:$0xff]  ;;  %v6463_v60 = vld [vmem:[#allocation69_spill] sm:$0xff]  ;;  %v6465_v55 = vld [vmem:[#allocation35_spill] sm:$0xff] }
  0xbb   : > { %v1740_v26 = vadd.f32 %v1732_v11, %v1712_v6  ;;  %v1403_v57 = vadd.f32 %v1395_v2, %v1375_v38  ;;  %v1059_v61 = vmul.f32 %v5003_v44, %v6462_v53  ;;  %v1480_v56 = vmul.f32 %v4938_v7, %v6463_v60  ;;  %v6464_v50 = vld [vmem:[#allocation13_spill] sm:$0xff]  ;;  %v6466_v2 = vld [vmem:[#allocation76_spill] sm:$0xff]  ;;  %v5021_v6 = vld [vmem:[%s3856_s26 + $0x83] sm:$0xff] }
  0xbc   : > { %v1010_v16 = vadd.f32 %v1002_v19, %v982_v49  ;;  %v646_v25 = vadd.f32 %v638_v28, %v617_v1  ;;  %v694_v21 = vmul.f32 %v4918_v15, %v6464_v50  ;;  %v1087_v11 = vmul.f32 %v5012_v45, %v6465_v55  ;;  %v6467_v49 = vld [vmem:[#allocation14_spill] sm:$0xff] }
  0xbd   : > { %v1768_v10 = vadd.f32 %v1760_v33, %v1740_v26  ;;  %v1432_v23 = vadd.f32 %v1424_v12, %v1403_v57  ;;  %v1508_v19 = vmul.f32 %v4952_v42, %v6466_v2  ;;  %v722_v60 = vmul.f32 %v4933_v5, %v6467_v49  ;;  %v6469_v33 = vld [vmem:[#allocation37_spill] sm:$0xff]  ;;  %v5030_v57 = vld [vmem:[%s3856_s26 + $0x84] sm:$0xff] }
  0xbe   : > { %v1039_v39 = vadd.f32 %v1031_v32, %v1010_v16  ;;  %v674_v38 = vadd.f32 %v666_v43, %v646_v25  ;;  %v1115_v12 = vmul.f32 %v5021_v6, %v6469_v33  ;;  %v6470_v26 = vld [vmem:[#allocation15_spill] sm:$0xff]  ;;  %v1536_v43 = vmul.f32 %v4966_v62, %v6440_v3  ;;  %v6473_v3 = vld [vmem:[#allocation40_spill] sm:$0xff] }
  0xbf   : > { %v5025_v28 = vadd.f32 %v1788_v52, %v1768_v10  ;;  %v1460_v1 = vadd.f32 %v1452_v27, %v1432_v23  ;;  %v750_v16 = vmul.f32 %v4947_v58, %v6470_v26  ;;  %v6471_v10 = vld [vmem:[#allocation39_spill] sm:$0xff] }
  0xc0   : > { %v1067_v53 = vadd.f32 %v1059_v61, %v1039_v39  ;;  %v702_v32 = vadd.f32 %v694_v21, %v674_v38  ;;  %v1143_v27 = vmul.f32 %v5030_v57, %v6471_v10  ;;  %v1564_v39 = vmul.f32 %v4980_v34, %v6444_v51  ;;  %v5044_v61 = vld [vmem:[%s3856_s26 + $0x85] sm:$0xff]  ;;  %v6472_v38 = vld [vmem:[#allocation16_spill] sm:$0xff]  ;;  %v6474_v10 = vld [vmem:[#allocation41_spill] sm:$0xff] }
  0xc1   : > { %6468 = vst [vmem:[#allocation92_spill] sm:$0xff] %v5025_v28  ;;  %1815 = vadd.xlane.f32.xlu1 %v5025_v28  ;;  %v1488_v25 = vadd.f32 %v1480_v56, %v1460_v1  ;;  %v1592_v21 = vmul.f32 %v4994_v54, %v6449_v59  ;;  %v778_v56 = vmul.f32 %v4961_v0, %v6472_v38 }
  0xc2   : > { %v1095_v52 = vadd.f32 %v1087_v11, %v1067_v53  ;;  %v730_v23 = vadd.f32 %v722_v60, %v702_v32  ;;  %v1171_v53 = vmul.f32 %v5044_v61, %v6473_v3  ;;  %v5051_v11 = vld [vmem:[%s3856_s26 + $0x86] sm:$0xff]  ;;  %v442_v51 = vmul.f32 %v4886_v37, %v6400_v48 }
  0xc3   : > { %v1516_v1 = vadd.f32 %v1508_v19, %v1488_v25  ;;  %v1199_v59 = vmul.f32 %v5051_v11, %v6474_v10  ;;  %v806_v60 = vmul.f32 %v4975_v40, %v6443_v4  ;;  %v470_v19 = vmul.f32 %v4901_v31, %v6402_v35  ;;  %v5062_v32 = vld [vmem:[%s3856_s26 + $0xa0] sm:$0xff] }
  0xc4   : > { %v1123_v28 = vadd.f32 %v1115_v12, %v1095_v52  ;;  %v758_v2 = vadd.f32 %v750_v16, %v730_v23  ;;  %v450_v52 = vadd.f32 %v6453_v63, %v442_v51  ;;  %v498_v48 = vmul.f32 %v4918_v15, %v6454_v20  ;;  %v6475_v10 = vld [vmem:[#allocation18_spill] sm:$0xff]  ;;  %v6476_v63 = vld [vmem:[#allocation43_spill] sm:$0xff] }
  0xc5   : > { %v1544_v12 = vadd.f32 %v1536_v43, %v1516_v1  ;;  %v1621_v37 = vmul.f32 %v5062_v32, %v6452_v47  ;;  %v1228_v16 = vmul.f32 %v4909_v36, %v6446_v41  ;;  %v835_v35 = vmul.f32 %v4989_v46, %v6475_v10  ;;  %v5074_v43 = vld [vmem:[%s3856_s26 + $0xa1] sm:$0xff] }
  0xc6   : > { %v1151_v25 = vadd.f32 %v1143_v27, %v1123_v28  ;;  %v786_v23 = vadd.f32 %v778_v56, %v758_v2  ;;  %v478_v27 = vadd.f32 %v470_v19, %v450_v52  ;;  %v526_v51 = vmul.f32 %v4933_v5, %v3875_v17  ;;  %v6477_v2 = vld [vmem:[#allocation22_spill] sm:$0xff]  ;;  %v6478_v5 = vld [vmem:[#allocation51_spill] sm:$0xff] }
  0xc7   : > { %v1572_v31 = vadd.f32 %v1564_v39, %v1544_v12  ;;  %v1649_v15 = vmul.f32 %v5074_v43, %v6414_v24  ;;  %v1256_v20 = vmul.f32 %v4924_v29, %v6476_v63  ;;  %v863_v56 = vmul.f32 %v5003_v44, %v6477_v2  ;;  %v5085_v39 = vld [vmem:[%s3856_s26 + $0xa2] sm:$0xff] }
  0xc8   : > { %v1179_v28 = vadd.f32 %v1171_v53, %v1151_v25  ;;  %v814_v1 = vadd.f32 %v806_v60, %v786_v23  ;;  %v506_v53 = vadd.f32 %v498_v48, %v478_v27  ;;  %v554_v19 = vmul.f32 %v4947_v58, %v3883_v22  ;;  %v6479_v60 = vld [vmem:[#allocation23_spill] sm:$0xff] }
  0xc9   : > { %v1600_v47 = vadd.f32 %v1592_v21, %v1572_v31  ;;  %v1677_v17 = vmul.f32 %v5085_v39, %v6416_v9  ;;  %v1284_v25 = vmul.f32 %v4938_v7, %v6478_v5  ;;  %v891_v23 = vmul.f32 %v5012_v45, %v6479_v60  ;;  %v5096_v21 = vld [vmem:[%s3856_s26 + $0xa3] sm:$0xff] }
  0xca   : > { %v1207_v12 = vadd.f32 %v1199_v59, %v1179_v28  ;;  %v843_v52 = vadd.f32 %v835_v35, %v814_v1  ;;  %v534_v59 = vadd.f32 %v526_v51, %v506_v53  ;;  %v582_v48 = vmul.f32 %v4961_v0, %v6295_v14  ;;  %v6480_v14 = vld [vmem:[#allocation95_spill] sm:$0xff]  ;;  %v6481_v1 = vld [vmem:[#allocation57_spill] sm:$0xff] }
  0xcb   : > { %v1629_v24 = vadd.f32 %v1621_v37, %v1600_v47  ;;  %v1705_v22 = vmul.f32 %v5096_v21, %v6420_v18  ;;  %v1312_v58 = vmul.f32 %v4952_v42, %v6375_v8  ;;  %v919_v35 = vmul.f32 %v5021_v6, %v6456_v13  ;;  %v5107_v47 = vld [vmem:[%s3856_s26 + $0xa4] sm:$0xff] }
  0xcc   : > { %v1236_v31 = vadd.f32 %v1228_v16, %v1207_v12  ;;  %v871_v28 = vadd.f32 %v863_v56, %v843_v52  ;;  %v562_v16 = vadd.f32 %v554_v19, %v534_v59  ;;  %v610_v51 = vmul.f32 %v4975_v40, %v6248_v30  ;;  %v6482_v56 = vld [vmem:[#allocation27_spill] sm:$0xff]  ;;  %v6484_v59 = vld [vmem:[#allocation97_spill] sm:$0xff]  ;;  %v6485_v40 = vld [vmem:[#allocation58_spill] sm:$0xff] }
  0xcd   : > { %v1657_v27 = vadd.f32 %v1649_v15, %v1629_v24  ;;  %v1733_v0 = vmul.f32 %v5107_v47, %v6480_v14  ;;  %v1340_v12 = vmul.f32 %v4966_v62, %v6481_v1  ;;  %v947_v52 = vmul.f32 %v5030_v57, %v6482_v56  ;;  %v5118_v24 = vld [vmem:[%s3856_s26 + $0xa5] sm:$0xff]  ;;  %v6486_v1 = vld [vmem:[#allocation28_spill] sm:$0xff] }
  0xce   : > { %v1264_v37 = vadd.f32 %v1256_v20, %v1236_v31  ;;  %v899_v53 = vadd.f32 %v891_v23, %v871_v28  ;;  %v590_v20 = vadd.f32 %v582_v48, %v562_v16  ;;  %v6483_v19 = vld [vmem:[#allocation11_spill] sm:$0xff]  ;;  %v1761_v30 = vmul.f32 %v5118_v24, %v6484_v59 }
  0xcf   : > { %v1685_v18 = vadd.f32 %v1677_v17, %v1657_v27  ;;  %v639_v31 = vmul.f32 %v4989_v46, %v6483_v19  ;;  %v1368_v14 = vmul.f32 %v4980_v34, %v6485_v40  ;;  %v975_v23 = vmul.f32 %v5044_v61, %v6486_v1  ;;  %v5129_v9 = vld [vmem:[%s3856_s26 + $0xa6] sm:$0xff] }
  0xd0   : > { %v1292_v15 = vadd.f32 %v1284_v25, %v1264_v37  ;;  %v927_v8 = vadd.f32 %v919_v35, %v899_v53  ;;  %v618_v27 = vadd.f32 %v610_v51, %v590_v20  ;;  %v6487_v25 = vld [vmem:[#allocation12_spill] sm:$0xff]  ;;  %v6488_v37 = vld [vmem:[#allocation98_spill] sm:$0xff]  ;;  %v6489_v16 = vld [vmem:[#allocation59_spill] sm:$0xff] }
  0xd1   : > { %v1713_v28 = vadd.f32 %v1705_v22, %v1685_v18  ;;  %v667_v48 = vmul.f32 %v5003_v44, %v6487_v25  ;;  %v1789_v46 = vmul.f32 %v5129_v9, %v6488_v37  ;;  %v1396_v19 = vmul.f32 %v4994_v54, %v6489_v16  ;;  %v6490_v40 = vld [vmem:[#allocation30_spill] sm:$0xff] }
  0xd2   : > { %v1320_v17 = vadd.f32 %v1312_v58, %v1292_v15  ;;  %v955_v59 = vadd.f32 %v947_v52, %v927_v8  ;;  %v1003_v35 = vmul.f32 %v5051_v11, %v6490_v40  ;;  %v647_v18 = vadd.f32 %v639_v31, %v618_v27  ;;  %v6491_v58 = vld [vmem:[#allocation60_spill] sm:$0xff]  ;;  %v6492_v15 = vld [vmem:[#allocation31_spill] sm:$0xff]  ;;  %v6493_v52 = vld [vmem:[#allocation65_spill] sm:$0xff] }
  0xd3   : > { %v1741_v53 = vadd.f32 %v1733_v0, %v1713_v28  ;;  %v695_v22 = vmul.f32 %v5012_v45, %v6464_v50  ;;  %v1425_v51 = vmul.f32 %v5062_v32, %v6491_v58  ;;  %v1032_v20 = vmul.f32 %v4909_v36, %v6492_v15  ;;  %v6494_v31 = vld [vmem:[#allocation34_spill] sm:$0xff] }
  0xd4   : > { %v1348_v1 = vadd.f32 %v1340_v12, %v1320_v17  ;;  %v983_v44 = vadd.f32 %v975_v23, %v955_v59  ;;  %v675_v16 = vadd.f32 %v667_v48, %v647_v18  ;;  %v723_v8 = vmul.f32 %v5021_v6, %v6467_v49  ;;  %v6495_v49 = vld [vmem:[#allocation69_spill] sm:$0xff] }
  0xd5   : > { %v1769_v25 = vadd.f32 %v1761_v30, %v1741_v53  ;;  %v1453_v0 = vmul.f32 %v5074_v43, %v6493_v52  ;;  %v1060_v45 = vmul.f32 %v4924_v29, %v6494_v31  ;;  %v751_v23 = vmul.f32 %v5030_v57, %v6470_v26  ;;  %v6496_v57 = vld [vmem:[#allocation76_spill] sm:$0xff]  ;;  %v6497_v53 = vld [vmem:[#allocation39_spill] sm:$0xff] }
  0xd6   : > { %v1376_v37 = vadd.f32 %v1368_v14, %v1348_v1  ;;  %v1011_v12 = vadd.f32 %v1003_v35, %v983_v44  ;;  %v703_v59 = vadd.f32 %v695_v22, %v675_v16  ;;  %v1088_v14 = vmul.f32 %v4938_v7, %v6465_v55 }
  0xd7   : > { %v5151_v50 = vadd.f32 %v1789_v46, %v1769_v25  ;;  %v1481_v1 = vmul.f32 %v5085_v39, %v6495_v49  ;;  %v779_v27 = vmul.f32 %v5044_v61, %v6472_v38  ;;  %v1509_v26 = vmul.f32 %v5096_v21, %v6496_v57 }
  0xd8   : > { %v1404_v28 = vadd.f32 %v1396_v19, %v1376_v37  ;;  %v1040_v30 = vadd.f32 %v1032_v20, %v1011_v12  ;;  %v731_v17 = vadd.f32 %v723_v8, %v703_v59  ;;  %v1116_v37 = vmul.f32 %v4952_v42, %v6469_v33 }
  0xd9   : > { %1817 = vadd.xlane.f32.xlu0 %v5151_v50  ;;  %v807_v19 = vmul.f32 %v5051_v11, %v6443_v4  ;;  %v1144_v18 = vmul.f32 %v4966_v62, %v6497_v53  ;;  %v836_v44 = vmul.f32 %v4909_v36, %v6475_v10  ;;  %v1172_v25 = vmul.f32 %v4980_v34, %v6473_v3 }
  0xda   : > { %v1433_v6 = vadd.f32 %v1425_v51, %v1404_v28  ;;  %v1068_v48 = vadd.f32 %v1060_v45, %v1040_v30  ;;  %v759_v16 = vadd.f32 %v751_v23, %v731_v17  ;;  %v6498_v51 = vld [vmem:[#allocation77_spill] sm:$0xff]  ;;  %v864_v12 = vmul.f32 %v4924_v29, %v6477_v2  ;;  %v6502_v2 = vld [vmem:[#allocation83_spill] sm:$0xff] }
  0xdb   : > { %v1537_v61 = vmul.f32 %v5107_v47, %v6498_v51  ;;  %v6500_v28 = vld [vmem:[#allocation41_spill] sm:$0xff]  ;;  %v1229_v17 = vmul.f32 %v5062_v32, %v6446_v41 }
  0xdc   : > { %v1461_v46 = vadd.f32 %v1453_v0, %v1433_v6  ;;  %v1096_v35 = vadd.f32 %v1088_v14, %v1068_v48  ;;  %v787_v38 = vadd.f32 %v779_v27, %v759_v16  ;;  %v6499_v0 = vld [vmem:[#allocation80_spill] sm:$0xff]  ;;  %v1200_v59 = vmul.f32 %v4994_v54, %v6500_v28  ;;  %v6501_v30 = vld [vmem:[#allocation81_spill] sm:$0xff] }
  0xdd   : > { %v1565_v4 = vmul.f32 %v5118_v24, %v6499_v0  ;;  %v1593_v36 = vmul.f32 %v5129_v9, %v6501_v30  ;;  %v892_v14 = vmul.f32 %v4938_v7, %v6479_v60  ;;  %v5187_v6 = vld [vmem:[%s3856_s26 + $0xb0] sm:$0xff]  ;;  %v1257_v7 = vmul.f32 %v5074_v43, %v6476_v63  ;;  %v6503_v16 = vld [vmem:[#allocation85_spill] sm:$0xff] }
  0xde   : > { %v1489_v22 = vadd.f32 %v1481_v1, %v1461_v46  ;;  %v1124_v20 = vadd.f32 %v1116_v37, %v1096_v35  ;;  %v815_v11 = vadd.f32 %v807_v19, %v787_v38  ;;  %v1622_v27 = vmul.f32 %v5187_v6, %v6502_v2  ;;  %v5196_v46 = vld [vmem:[%s3856_s26 + $0xb1] sm:$0xff] }
  0xdf   : > { %v920_v37 = vmul.f32 %v4952_v42, %v6456_v13  ;;  %v1650_v19 = vmul.f32 %v5196_v46, %v6503_v16  ;;  %v1285_v13 = vmul.f32 %v5085_v39, %v6478_v5  ;;  %v6504_v38 = vld [vmem:[#allocation89_spill] sm:$0xff] }
  0xe0   : > { %v1517_v8 = vadd.f32 %v1509_v26, %v1489_v22  ;;  %v1152_v45 = vadd.f32 %v1144_v18, %v1124_v20  ;;  %v844_v10 = vadd.f32 %v836_v44, %v815_v11  ;;  %v948_v18 = vmul.f32 %v4966_v62, %v6482_v56  ;;  %v5205_v22 = vld [vmem:[%s3856_s26 + $0xb2] sm:$0xff] }
  0xe1   : > { %v1678_v44 = vmul.f32 %v5205_v22, %v6504_v38 }
  0xe2   : > { %v1545_v23 = vadd.f32 %v1537_v61, %v1517_v8  ;;  %v1180_v1 = vadd.f32 %v1172_v25, %v1152_v45  ;;  %v872_v48 = vadd.f32 %v864_v12, %v844_v10  ;;  %v6505_v25 = vld [vmem:[#allocation28_spill] sm:$0xff]  ;;  %v6506_v12 = vld [vmem:[#allocation53_spill] sm:$0xff]  ;;  %v6507_v45 = vld [vmem:[#allocation94_spill] sm:$0xff] }
  0xe3   : > { %v976_v8 = vmul.f32 %v4980_v34, %v6505_v25  ;;  %v1313_v62 = vmul.f32 %v5096_v21, %v6506_v12  ;;  %v3415_v10 = vld [vmem:[%s3856_s26 + $0xb4] sm:$0xff] }
  0xe4   : > { %v1573_v29 = vadd.f32 %v1565_v4, %v1545_v23  ;;  %v1208_v26 = vadd.f32 %v1200_v59, %v1180_v1  ;;  %v900_v35 = vadd.f32 %v892_v14, %v872_v48  ;;  %v5214_v4 = vld [vmem:[%s3856_s26 + $0xb3] sm:$0xff] }
  0xe5   : > { %v1706_v59 = vmul.f32 %v5214_v4, %v6507_v45  ;;  %v6508_v1 = vld [vmem:[#allocation57_spill] sm:$0xff] }
  0xe6   : > { %v1601_v60 = vadd.f32 %v1593_v36, %v1573_v29  ;;  %v1237_v61 = vadd.f32 %v1229_v17, %v1208_v26  ;;  %v928_v20 = vadd.f32 %v920_v37, %v900_v35  ;;  %v1004_v36 = vmul.f32 %v4994_v54, %v6490_v40  ;;  %v6509_v29 = vld [vmem:[#allocation95_spill] sm:$0xff]  ;;  %v3423_v26 = vld [vmem:[%s3856_s26 + $0xb5] sm:$0xff] }
  0xe7   : > { %v1341_v34 = vmul.f32 %v5107_v47, %v6508_v1  ;;  %v1033_v37 = vmul.f32 %v5062_v32, %v6492_v15 }
  0xe8   : > { %v1630_v42 = vadd.f32 %v1622_v27, %v1601_v60  ;;  %v1265_v11 = vadd.f32 %v1257_v7, %v1237_v61  ;;  %v956_v23 = vadd.f32 %v948_v18, %v928_v20  ;;  %v1734_v27 = vmul.f32 %v3415_v10, %v6509_v29  ;;  %v6510_v60 = vld [vmem:[#allocation58_spill] sm:$0xff]  ;;  %v6511_v18 = vld [vmem:[#allocation97_spill] sm:$0xff] }
  0xe9   : > { %v1762_v54 = vmul.f32 %v3423_v26, %v6511_v18  ;;  %v1061_v61 = vmul.f32 %v5074_v43, %v6494_v31  ;;  %v1117_v43 = vmul.f32 %v5096_v21, %v6469_v33  ;;  %v1173_v33 = vmul.f32 %v5118_v24, %v6473_v3 }
  0xea   : > { %v1658_v56 = vadd.f32 %v1650_v19, %v1630_v42  ;;  %v1293_v14 = vadd.f32 %v1285_v13, %v1265_v11  ;;  %v984_v48 = vadd.f32 %v976_v8, %v956_v23  ;;  %v1369_v19 = vmul.f32 %v5118_v24, %v6510_v60  ;;  %v3431_v13 = vld [vmem:[%s3856_s26 + $0xb6] sm:$0xff]  ;;  %v6513_v8 = vld [vmem:[#allocation98_spill] sm:$0xff] }
  0xeb   : > { %v1790_v32 = vmul.f32 %v3431_v13, %v6513_v8  ;;  %v1089_v11 = vmul.f32 %v5085_v39, %v6465_v55  ;;  %v1482_v39 = vmul.f32 %v5205_v22, %v6495_v49  ;;  %v1566_v3 = vmul.f32 %v3423_v26, %v6499_v0 }
  0xec   : > { %v1686_v17 = vadd.f32 %v1678_v44, %v1658_v56  ;;  %v1321_v7 = vadd.f32 %v1313_v62, %v1293_v14  ;;  %v1012_v40 = vadd.f32 %v1004_v36, %v984_v48  ;;  %v6512_v44 = vld [vmem:[#allocation59_spill] sm:$0xff]  ;;  %v1426_v56 = vmul.f32 %v5187_v6, %v6491_v58 }
  0xed   : > { %v1397_v20 = vmul.f32 %v5129_v9, %v6512_v44  ;;  %v1454_v36 = vmul.f32 %v5196_v46, %v6493_v52  ;;  %v1510_v48 = vmul.f32 %v5214_v4, %v6496_v57 }
  0xee   : > { %v1714_v35 = vadd.f32 %v1706_v59, %v1686_v17  ;;  %v1349_v42 = vadd.f32 %v1341_v34, %v1321_v7  ;;  %v1041_v15 = vadd.f32 %v1033_v37, %v1012_v40  ;;  %v1145_v17 = vmul.f32 %v5107_v47, %v6497_v53 }
  0xef   : > { %v1201_v7 = vmul.f32 %v5129_v9, %v6500_v28  ;;  %v1538_v53 = vmul.f32 %v3415_v10, %v6498_v51  ;;  %v1258_v40 = vmul.f32 %v5196_v46, %v6476_v63  ;;  %v3384_v9 = vld [vmem:[%s3856_s26 + $0xc0] sm:$0xff] }
  0xf0   : > { %v1742_v25 = vadd.f32 %v1734_v27, %v1714_v35  ;;  %v1377_v62 = vadd.f32 %v1369_v19, %v1349_v42  ;;  %v1069_v23 = vadd.f32 %v1061_v61, %v1041_v15  ;;  %v1230_v35 = vmul.f32 %v5187_v6, %v6446_v41  ;;  %v3392_v6 = vld [vmem:[%s3856_s26 + $0xc1] sm:$0xff] }
  0xf1   : > { %v1594_v42 = vmul.f32 %v3431_v13, %v6501_v30  ;;  %v1623_v41 = vmul.f32 %v3384_v9, %v6502_v2  ;;  %v1314_v15 = vmul.f32 %v5214_v4, %v6506_v12  ;;  %v1651_v63 = vmul.f32 %v3392_v6, %v6503_v16  ;;  %v3400_v46 = vld [vmem:[%s3856_s26 + $0xc2] sm:$0xff] }
  0xf2   : > { %v1770_v59 = vadd.f32 %v1762_v54, %v1742_v25  ;;  %v1405_v31 = vadd.f32 %v1397_v20, %v1377_v62  ;;  %v1097_v34 = vadd.f32 %v1089_v11, %v1069_v23  ;;  %v1286_v20 = vmul.f32 %v5205_v22, %v6478_v5  ;;  %v3408_v22 = vld [vmem:[%s3856_s26 + $0xc3] sm:$0xff] }
  0xf3   : > { %v1679_v5 = vmul.f32 %v3400_v46, %v6504_v38  ;;  %v3416_v4 = vld [vmem:[%s3856_s26 + $0xc4] sm:$0xff] }
  0xf4   : > { %v5246_v14 = vadd.f32 %v1790_v32, %v1770_v59  ;;  %v1434_v55 = vadd.f32 %v1426_v56, %v1405_v31  ;;  %v1125_v27 = vadd.f32 %v1117_v43, %v1097_v34  ;;  %v1342_v56 = vmul.f32 %v3415_v10, %v6508_v1 }
  0xf5   : > { %v1370_v43 = vmul.f32 %v3423_v26, %v6510_v60  ;;  %v1398_v34 = vmul.f32 %v3431_v13, %v6512_v44  ;;  %v1427_v1 = vmul.f32 %v3384_v9, %v6491_v58  ;;  %v1455_v26 = vmul.f32 %v3392_v6, %v6493_v52 }
  0xf6   : > { %1819 = vadd.xlane.f32.xlu1 %v5246_v14  ;;  %v1462_v21 = vadd.f32 %v1454_v36, %v1434_v55  ;;  %v1153_v37 = vadd.f32 %v1145_v17, %v1125_v27  ;;  %v1707_v36 = vmul.f32 %v3408_v22, %v6507_v45  ;;  %v1735_v55 = vmul.f32 %v3416_v4, %v6509_v29 }
  0xf7   : > { %v1483_v13 = vmul.f32 %v3400_v46, %v6495_v49  ;;  %v1539_v52 = vmul.f32 %v3416_v4, %v6498_v51 }
  0xf8   : > { %v1490_v47 = vadd.f32 %v1482_v39, %v1462_v21  ;;  %v1181_v19 = vadd.f32 %v1173_v33, %v1153_v37  ;;  %v3424_v39 = vld [vmem:[%s3856_s26 + $0xc5] sm:$0xff] }
  0xf9   : > { %v1763_v33 = vmul.f32 %v3424_v39, %v6511_v18  ;;  %v3432_v21 = vld [vmem:[%s3856_s26 + $0xc6] sm:$0xff] }
  0xfa   : > { %v1518_v54 = vadd.f32 %v1510_v48, %v1490_v47  ;;  %v1209_v24 = vadd.f32 %v1201_v7, %v1181_v19  ;;  %v1791_v37 = vmul.f32 %v3432_v21, %v6513_v8  ;;  %v1595_v9 = vmul.f32 %v3432_v21, %v6501_v30 }
  0xfc   : > { %v1546_v61 = vadd.f32 %v1538_v53, %v1518_v54  ;;  %v1238_v28 = vadd.f32 %v1230_v35, %v1209_v24  ;;  %v1511_v53 = vmul.f32 %v3408_v22, %v6496_v57 }
  0xfe   : > { %v1574_v25 = vadd.f32 %v1566_v3, %v1546_v61  ;;  %v1266_v32 = vadd.f32 %v1258_v40, %v1238_v28  ;;  %v6514_v3 = vld [vmem:[#allocation88_spill] sm:$0xff]  ;;  %v1567_v40 = vmul.f32 %v3424_v39, %v6499_v0  ;;  %v6516_v39 = vld [vmem:[#allocation63_spill] sm:$0xff] }
  0xff   : > { %v3385_v61 = vld [vmem:[%s3856_s26 + $0xd0] sm:$0xff] }
 0x100   : > { %v1602_v11 = vadd.f32 %v1594_v42, %v1574_v25  ;;  %v1294_v62 = vadd.f32 %v1286_v20, %v1266_v32  ;;  %v3393_v28 = vld [vmem:[%s3856_s26 + $0xd1] sm:$0xff]  ;;  %v1624_v20 = vmul.f32 %v3385_v61, %v6502_v2 }
 0x101   : > { %v3401_v25 = vld [vmem:[%s3856_s26 + $0xd2] sm:$0xff]  ;;  %v1652_v6 = vmul.f32 %v3393_v28, %v6503_v16 }
 0x102   : > { %v1631_v59 = vadd.f32 %v1623_v41, %v1602_v11  ;;  %v1322_v23 = vadd.f32 %v1314_v15, %v1294_v62  ;;  %v3409_v32 = vld [vmem:[%s3856_s26 + $0xd3] sm:$0xff]  ;;  %v1680_v15 = vmul.f32 %v3401_v25, %v6504_v38 }
 0x103   : > { %v3417_v11 = vld [vmem:[%s3856_s26 + $0xd4] sm:$0xff]  ;;  %v1708_v46 = vmul.f32 %v3409_v32, %v6507_v45 }
 0x104   : > { %v1659_v31 = vadd.f32 %v1651_v63, %v1631_v59  ;;  %v1350_v12 = vadd.f32 %v1342_v56, %v1322_v23  ;;  %v3425_v62 = vld [vmem:[%s3856_s26 + $0xd5] sm:$0xff]  ;;  %v1736_v56 = vmul.f32 %v3417_v11, %v6509_v29 }
 0x105   : > { %v3433_v59 = vld [vmem:[%s3856_s26 + $0xd6] sm:$0xff]  ;;  %v1764_v2 = vmul.f32 %v3425_v62, %v6511_v18 }
 0x106   : > { %v1687_v17 = vadd.f32 %v1679_v5, %v1659_v31  ;;  %v1378_v10 = vadd.f32 %v1370_v43, %v1350_v12  ;;  %v1792_v23 = vmul.f32 %v3433_v59, %v6513_v8  ;;  %v3596_v18 = vld [vmem:[%s5913_s6 + $0xe4] ss:$16 sps:$4 sm:$0xff]   ;;  %v3598_v8 = vld [vmem:[%s5913_s6 + $0xec] ss:$16 sps:$4 sm:$0xff]   ;;  %v3630_v59 = vld [vmem:[%s5913_s6 + $0x40] ss:$16 sps:$4 sm:$0xff]  }
 0x107   : > { %2146 = vmatprep.subr.bf16.mxu0 %v3596_v18  ;;  %2219 = vmatprep.subr.bf16.mxu1 %v3598_v8  ;;  %v3765_v18 = vmov 0  }
 0x108   : > { %v1715_v27 = vadd.f32 %v1707_v36, %v1687_v17  ;;  %v1406_v48 = vadd.f32 %v1398_v34, %v1378_v10  ;;  %v6515_v36 = vld [vmem:[#allocation90_spill] sm:$0xff]  ;;  %v3601_v17 = vld [vmem:[%s5913_s6 + $0xe8] ss:$16 sps:$4 sm:$0xff]   ;;  %2178 = vmatprep.mubr.bf16.mxu0 %v3765_v18  ;;  %2251 = vmatprep.mubr.bf16.mxu1 %v3765_v18 }
 0x109   : > { %v3600_v34 = vld [vmem:[%s5913_s6 + $0xe0] ss:$16 sps:$4 sm:$0xff]   ;;  %2220 = vmatpush1.bf16.msra.mxu1 %v3601_v17 }
 0x10a   : > { %v1743_v60 = vadd.f32 %v1735_v55, %v1715_v27  ;;  %v1435_v7 = vadd.f32 %v1427_v1, %v1406_v48  ;;  %v3602_v55 = vld [vmem:[%s5913_s6 + $0xc4] ss:$16 sps:$4 sm:$0xff]   ;;  %v3604_v1 = vld [vmem:[%s5913_s6 + $0xcc] ss:$16 sps:$4 sm:$0xff]   ;;  %2147 = vmatpush1.bf16.msra.mxu0 %v3600_v34  ;;  %v3606_v27 = vld [vmem:[%s5913_s6 + $0xc0] ss:$16 sps:$4 sm:$0xff]  }
 0x10b   : > { %2148 = vmatprep.subr.bf16.mxu0 %v3602_v55  ;;  %2221 = vmatprep.subr.bf16.mxu1 %v3604_v1  ;;  %v5454_v1 = vld [vmem:[%s5911_s4] ss:$0 sm:$0xff] }
 0x10c   : > { %v1771_v44 = vadd.f32 %v1763_v33, %v1743_v60  ;;  %v1463_v47 = vadd.f32 %v1455_v26, %v1435_v7  ;;  %v3607_v33 = vld [vmem:[%s5913_s6 + $0xc8] ss:$16 sps:$4 sm:$0xff]   ;;  %v3608_v60 = vld [vmem:[%s5913_s6 + $0xa4] ss:$16 sps:$4 sm:$0xff]   ;;  %v3612_v7 = vld [vmem:[%s5913_s6 + $0xa0] ss:$16 sps:$4 sm:$0xff]  }
 0x10d   : > { %2222 = vmatpush1.bf16.msra.mxu1 %v3607_v33 }
 0x10e   : > { %v1810_v58 = vpop.xlane.xlu0 %1809  ;;  %v5291_v19 = vadd.f32 %v1791_v37, %v1771_v44  ;;  %v1491_v54 = vadd.f32 %v1483_v13, %v1463_v47  ;;  %2149 = vmatpush1.bf16.msra.mxu0 %v3606_v27  ;;  %v3610_v37 = vld [vmem:[%s5913_s6 + $0xac] ss:$16 sps:$4 sm:$0xff]   ;;  %v3613_v13 = vld [vmem:[%s5913_s6 + $0xa8] ss:$16 sps:$4 sm:$0xff]   ;;  %v6517_v44 = vld [vmem:[#allocation92_spill] sm:$0xff] }
 0x10f   : > { %v1826_v35 = vmul.f32 0.0078125, %v1810_v58  ;;  %2150 = vmatprep.subr.bf16.mxu0 %v3608_v60  ;;  %2223 = vmatprep.subr.bf16.mxu1 %v3610_v37 }
 0x110   : > { %1821 = vadd.xlane.f32.xlu0 %v5291_v19  ;;  %v1519_v49 = vadd.f32 %v1511_v53, %v1491_v54 }
 0x111   : > { %v5296_v24 = vsub.f32 %v6514_v3, %v1826_v35  ;;  %2224 = vmatpush1.bf16.msra.mxu1 %v3613_v13  ;;  %v3614_v3 = vld [vmem:[%s5913_s6 + $0x84] ss:$16 sps:$4 sm:$0xff]  }
 0x112   : > { %v1547_v42 = vadd.f32 %v1539_v52, %v1519_v49  ;;  %2151 = vmatpush1.bf16.msra.mxu0 %v3612_v7  ;;  %v3616_v49 = vld [vmem:[%s5913_s6 + $0x8c] ss:$16 sps:$4 sm:$0xff]  }
 0x113   : > { %v1842_v57 = vmul.f32 %v5296_v24, %v5296_v24  ;;  %2152 = vmatprep.subr.bf16.mxu0 %v3614_v3  ;;  %2225 = vmatprep.subr.bf16.mxu1 %v3616_v49 }
 0x114   : > { %v1575_v51 = vadd.f32 %v1567_v40, %v1547_v42  ;;  %v3618_v40 = vld [vmem:[%s5913_s6 + $0x80] ss:$16 sps:$4 sm:$0xff]  }
 0x115   : > { %1850 = vadd.xlane.f32.xlu0 %v1842_v57 }
 0x116   : > { %v1603_v41 = vadd.f32 %v1595_v9, %v1575_v51  ;;  %2153 = vmatpush1.bf16.msra.mxu0 %v3618_v40 }
 0x118   : > { %v1632_v0 = vadd.f32 %v1624_v20, %v1603_v41  ;;  %v3620_v41 = vld [vmem:[%s5913_s6 + $0x64] ss:$16 sps:$4 sm:$0xff]  }
 0x119   : > { %2154 = vmatprep.subr.bf16.mxu0 %v3620_v41 }
 0x11a   : > { %v1660_v63 = vadd.f32 %v1652_v6, %v1632_v0  ;;  %v3624_v6 = vld [vmem:[%s5913_s6 + $0x60] ss:$16 sps:$4 sm:$0xff]  }
 0x11b   : > { %2155 = vmatpush1.bf16.msra.mxu0 %v3624_v6 }
 0x11c   : > { %v1688_v30 = vadd.f32 %v1680_v15, %v1660_v63 }
 0x11e   : > { %v1716_v5 = vadd.f32 %v1708_v46, %v1688_v30  ;;  %v3626_v30 = vld [vmem:[%s5913_s6 + $0x44] ss:$16 sps:$4 sm:$0xff]  }
 0x11f   : > { %2156 = vmatprep.subr.bf16.mxu0 %v3626_v30 }
 0x120   : > { %v1744_v22 = vadd.f32 %v1736_v56, %v1716_v5  ;;  %v3628_v56 = vld [vmem:[%s5913_s6 + $0x4c] ss:$16 sps:$4 sm:$0xff]   ;;  %v3631_v5 = vld [vmem:[%s5913_s6 + $0x48] ss:$16 sps:$4 sm:$0xff]   ;;  %2157 = vmatpush1.bf16.msra.mxu0 %v3630_v59 }
 0x121   : > { %v3645_v59 = vld [vmem:[%s5915_s8 + $0x38] sm:$0xff]  }
 0x122   : > { %v1772_v16 = vadd.f32 %v1764_v2, %v1744_v22  ;;  %v3632_v2 = vld [vmem:[%s5913_s6 + $0x24] ss:$16 sps:$4 sm:$0xff]   ;;  %v3634_v22 = vld [vmem:[%s5913_s6 + $0x2c] ss:$16 sps:$4 sm:$0xff]  }
 0x123   : > { %2158 = vmatprep.subr.bf16.mxu0 %v3632_v2  ;;  %v3647_v2 = vld [vmem:[%s5915_s8 + $0xb8] sm:$0xff]  }
 0x124   : > { %v5316_v43 = vadd.f32 %v1792_v23, %v1772_v16  ;;  %v3636_v23 = vld [vmem:[%s5913_s6 + $0x20] ss:$16 sps:$4 sm:$0xff]  }
 0x125   : > { %v1814_v31 = vpop.xlane.xlu1 %1813  ;;  %2159 = vmatpush1.bf16.msra.mxu0 %v3636_v23 }
 0x126   : > { %v1828_v38 = vmul.f32 0.0078125, %v1814_v31  ;;  %1823 = vadd.xlane.f32.xlu1 %v5316_v43  ;;  %v3638_v31 = vld [vmem:[%s5913_s6 + $0x4] ss:$16 sps:$4 sm:$0xff]  }
 0x127   : > { %2160 = vmatprep.subr.bf16.mxu0 %v3638_v31  ;;  %v3650_v31 = vld [vmem:[%s5915_s8 + $0xf0] sm:$0xff]  }
 0x128   : > { %v5320_v45 = vsub.f32 %v6515_v36, %v1828_v38  ;;  %v3640_v38 = vld [vmem:[%s5913_s6 + $0xc] ss:$16 sps:$4 sm:$0xff]  }
 0x12a   : > { %v1844_v29 = vmul.f32 %v5320_v45, %v5320_v45 }
 0x12c   : > { %1854 = vadd.xlane.f32.xlu0 %v1844_v29  ;;  %v3642_v29 = vld [vmem:[%s5913_s6] ss:$16 sps:$4 sm:$0xff]  }
 0x12d   : > { %2161 = vmatpush1.bf16.msra.mxu0 %v3642_v29 }
 0x136   : > { %v1812_v4 = vpop.xlane.xlu0 %1811 }
 0x137   : > { %v1827_v12 = vmul.f32 0.0078125, %v1812_v4  ;;  %v3643_v4 = vld [vmem:[%s5913_s6 + $0x8] ss:$16 sps:$4 sm:$0xff]  }
 0x139   : > { %v5340_v10 = vsub.f32 %v6516_v39, %v1827_v12 }
 0x13b   : > { %v1843_v21 = vmul.f32 %v5340_v10, %v5340_v10 }
 0x13d   : > { %1852 = vadd.xlane.f32.xlu1 %v1843_v21 }
 0x14a   : > { %v1816_v48 = vpop.xlane.xlu1 %1815 }
 0x14b   : > { %v1829_v26 = vmul.f32 0.0078125, %v1816_v48 }
 0x14d   : > { %v5366_v47 = vsub.f32 %v6517_v44, %v1829_v26  ;;  %v5461_v26 = vld [vmem:[%s5912_s5] ss:$0 sm:$0xff] }
 0x14f   : > { %v1845_v53 = vmul.f32 %v5366_v47, %v5366_v47 }
 0x151   : > { %1856 = vadd.xlane.f32.xlu1 %v1845_v53 }
 0x162   : > { %v1818_v58 = vpop.xlane.xlu0 %1817 }
 0x163   : > { %v1830_v35 = vmul.f32 0.0078125, %v1818_v58 }
 0x165   : > { %v5371_v54 = vsub.f32 %v5151_v50, %v1830_v35  ;;  %v3619_v50 = vld [vmem:[%s5913_s6 + $0x88] ss:$16 sps:$4 sm:$0xff]  }
 0x166   : > { %2226 = vmatpush1.bf16.msra.mxu1 %v3619_v50 }
 0x167   : > { %v1846_v52 = vmul.f32 %v5371_v54, %v5371_v54 }
 0x169   : > { %1858 = vadd.xlane.f32.xlu0 %v1846_v52 }
 0x17f   : > { %v1820_v61 = vpop.xlane.xlu1 %1819 }
 0x180   : > { %v1831_v57 = vmul.f32 0.0078125, %v1820_v61 }
 0x182   : > { %v5388_v42 = vsub.f32 %v5246_v14, %v1831_v57  ;;  %v3622_v14 = vld [vmem:[%s5913_s6 + $0x6c] ss:$16 sps:$4 sm:$0xff]  }
 0x183   : > { %2227 = vmatprep.subr.bf16.mxu1 %v3622_v14 }
 0x184   : > { %v1847_v9 = vmul.f32 %v5388_v42, %v5388_v42 }
 0x186   : > { %1860 = vadd.xlane.f32.xlu1 %v1847_v9 }
 0x199   : > { %v1822_v28 = vpop.xlane.xlu0 %1821 }
 0x19a   : > { %v1832_v51 = vmul.f32 0.0078125, %v1822_v28 }
 0x19c   : > { %v5393_v20 = vsub.f32 %v5291_v19, %v1832_v51  ;;  %v3625_v19 = vld [vmem:[%s5913_s6 + $0x68] ss:$16 sps:$4 sm:$0xff]  }
 0x19d   : > { %2228 = vmatpush1.bf16.msra.mxu1 %v3625_v19 }
 0x19e   : > { %v1848_v25 = vmul.f32 %v5393_v20, %v5393_v20  ;;  %v1851_v63 = vpop.xlane.xlu0 %1850  ;;  %2229 = vmatprep.subr.bf16.mxu1 %v3628_v56  ;;  %v3644_v56 = vld [vmem:[%s5915_s8 + $0x78] sm:$0xff]  }
 0x19f   : > { %v1866_v46 = vmul.f32 0.0078125, %v1851_v63  ;;  %3506 = vmatprep.subr.bf16.mxu0 %v3644_v56 }
 0x1a0   : > { %1862 = vadd.xlane.f32.xlu0 %v1848_v25 }
 0x1a1   : > { %v1874_v62 = vadd.f32 1e-06, %v1866_v46  ;;  %2230 = vmatpush1.bf16.msra.mxu1 %v3631_v5  ;;  %v3646_v5 = vld [vmem:[%s5915_s8 + $0xf8] sm:$0xff]  }
 0x1a2   : > { %2231 = vmatprep.subr.bf16.mxu1 %v3634_v22  ;;  %v3648_v22 = vld [vmem:[%s5915_s8 + $0x70] sm:$0xff]  }
 0x1a3   : > { %3676 = vrsqrt.f32 %v1874_v62 }
 0x1af   : > { %v1824_v32 = vpop.xlane.xlu1 %1823 }
 0x1b0   : > { %v1833_v0 = vmul.f32 0.0078125, %v1824_v32  ;;  %v3677_v17 = vpop.eup %3676 }
 0x1b1   : > { %v1890_v39 = vmul.f32 %v3677_v17, %v5296_v24  ;;  %v3654_v17 = vld [vmem:[%s5915_s8 + $0xe8] sm:$0xff]  }
 0x1b2   : > { %v5410_v15 = vsub.f32 %v5316_v43, %v1833_v0  ;;  %v3637_v43 = vld [vmem:[%s5913_s6 + $0x28] ss:$16 sps:$4 sm:$0xff]  }
 0x1b3   : > { %2232 = vmatpush1.bf16.msra.mxu1 %v3637_v43  ;;  %v1905_v21 = vmul.f32 %v5454_v1, %v1890_v39  ;;  %v3649_v43 = vld [vmem:[%s5915_s8 + $0x30] sm:$0xff]   ;;  %v3656_v39 = vld [vmem:[%s5915_s8 + $0x60] sm:$0xff]  }
 0x1b4   : > { %v1849_v11 = vmul.f32 %v5410_v15, %v5410_v15  ;;  %2233 = vmatprep.subr.bf16.mxu1 %v3640_v38  ;;  %v3651_v38 = vld [vmem:[%s5915_s8 + $0xb0] sm:$0xff]  }
 0x1b5   : > { %v1855_v8 = vpop.xlane.xlu0 %1854  ;;  %v1920_v7 = vadd.f32 %v5461_v26, %v1905_v21  ;;  %v1964_v21 = vld [vmem:[%s5914_s7] sm:$0xf] }
 0x1b6   : > { %1864 = vadd.xlane.f32.xlu1 %v1849_v11  ;;  %v1868_v34 = vmul.f32 0.0078125, %v1855_v8 }
 0x1b7   : > { %2234 = vmatpush1.bf16.msra.mxu1 %v3643_v4 }
 0x1b8   : > { %v1876_v55 = vadd.f32 1e-06, %v1868_v34  ;;  %3546 = vmatprep.subr.bf16.mxu1 %v3646_v5  ;;  %v3652_v34 = vld [vmem:[%s5915_s8 + $0x68] sm:$0xff]  }
 0x1c6   : > { %v1853_v16 = vpop.xlane.xlu1 %1852 }
 0x1c7   : > { %v1867_v36 = vmul.f32 0.0078125, %v1853_v16 }
 0x1c9   : > { %v1875_v12 = vadd.f32 1e-06, %v1867_v36 }
 0x1cb   : > { %3678 = vrsqrt.f32 %v1875_v12 }
 0x1cc   : > { %3680 = vrsqrt.f32 %v1876_v55  ;;  %v3655_v55 = vld [vmem:[%s5915_s8 + $0xa8] sm:$0xff]  }
 0x1d8   : > { %v3679_v27 = vpop.eup %3678 }
 0x1d9   : > { %v1891_v33 = vmul.f32 %v3679_v27, %v5340_v10  ;;  %v3681_v10 = vpop.eup %3680  ;;  %v3658_v27 = vld [vmem:[%s5915_s8 + $0xe0] sm:$0xff]  }
 0x1da   : > { %v1857_v48 = vpop.xlane.xlu1 %1856  ;;  %v1892_v53 = vmul.f32 %v3681_v10, %v5320_v45 }
 0x1db   : > { %v1869_v60 = vmul.f32 0.0078125, %v1857_v48  ;;  %v1906_v24 = vmul.f32 %v5454_v1, %v1891_v33  ;;  %v3659_v33 = vld [vmem:[%s5915_s8 + $0xa0] sm:$0xff]  }
 0x1dc   : > { %v1907_v52 = vmul.f32 %v5454_v1, %v1892_v53  ;;  %v6518_v48 = vld [vmem:[#allocation2_spill] sm:$0xff] }
 0x1dd   : > { %v1877_v37 = vadd.f32 1e-06, %v1869_v60  ;;  %v1921_v13 = vadd.f32 %v5461_v26, %v1906_v24  ;;  %v6519_v60 = vld [vmem:[#allocation4_spill] sm:$0xff] }
 0x1de   : > { %v1922_v49 = vadd.f32 %v5461_v26, %v1907_v52  ;;  %v5539_v24 = vrot.slane %v1964_v21, %v6519_v60  ;;  %v3670_v60 = vld [vmem:[%s5915_s8 + $0xc8] sm:$0xff]  }
 0x1df   : > { %3682 = vrsqrt.f32 %v1877_v37  ;;  %v1928_v44 = vpack.c.bf16 %v1921_v13, %v1920_v7  ;;  %v6520_v37 = vld [vmem:[#allocation3_spill] sm:$0xff]  ;;  %v6521_v13 = vld [vmem:[#allocation5_spill] sm:$0xff] }
 0x1e0   : > { %v5542_v7 = vrot.slane %v1964_v21, %v6520_v37 }
 0x1e1   : > { %2179 = vmatmul.mubr.bf16.vlgmr.msra.gmra.mxu0 %v1928_v44  ;;  %2252 = vmatmul.mubr.bf16.vlgmr.msra.gmra.mxu1 %v1928_v44  ;;  %v5545_v44 = vrot.slane %v1964_v21, %v6521_v13  ;;  %v3669_v13 = vld [vmem:[%s5915_s8 + $0x8] sm:$0xff]  }
 0x1e2   : > { %2188 = vmatprep.mubr.bf16.mxu0 %v3765_v18  ;;  %2261 = vmatprep.mubr.bf16.mxu1 %v3765_v18 }
 0x1e3   : > { %3507 = vmatpush3.bf16.msra.mxu0 %v3645_v59  ;;  %3547 = vmatpush3.bf16.msra.mxu1 %v3647_v2 }
 0x1e4   : > { %3508 = vmatprep.subr.bf16.mxu0 %v3648_v22  ;;  %3548 = vmatprep.subr.bf16.mxu1 %v3650_v31 }
 0x1e7   : > { %3509 = vmatpush3.bf16.msra.mxu0 %v3649_v43  ;;  %3549 = vmatpush3.bf16.msra.mxu1 %v3651_v38 }
 0x1e8   : > { %3510 = vmatprep.subr.bf16.mxu0 %v3652_v34  ;;  %3550 = vmatprep.subr.bf16.mxu1 %v3654_v17 }
 0x1eb   : > { %3551 = vmatpush3.bf16.msra.mxu1 %v3655_v55 }
 0x1ec   : > { %v3683_v58 = vpop.eup %3682  ;;  %3552 = vmatprep.subr.bf16.mxu1 %v3658_v27 }
 0x1ed   : > { %v1893_v35 = vmul.f32 %v3683_v58, %v5366_v47 }
 0x1ef   : > { %v1908_v3 = vmul.f32 %v5454_v1, %v1893_v35  ;;  %3553 = vmatpush3.bf16.msra.mxu1 %v3659_v33 }
 0x1f1   : > { %v1923_v40 = vadd.f32 %v5461_v26, %v1908_v3 }
 0x1f2   : > { %v1859_v61 = vpop.xlane.xlu0 %1858 }
 0x1f3   : > { %v1929_v50 = vpack.c.bf16 %v1923_v40, %v1922_v49  ;;  %v1870_v57 = vmul.f32 0.0078125, %v1859_v61 }
 0x1f5   : > { %2189 = vmatmul.mubr.bf16.gmra.mxu0 %v1929_v50  ;;  %2262 = vmatmul.mubr.bf16.gmra.mxu1 %v1929_v50  ;;  %v1878_v9 = vadd.f32 1e-06, %v1870_v57 }
 0x1f6   : > { %2198 = vmatprep.mubr.bf16.mxu0 %v3765_v18  ;;  %2271 = vmatprep.mubr.bf16.mxu1 %v3765_v18 }
 0x1f7   : > { %3684 = vrsqrt.f32 %v1878_v9 }
 0x204   : > { %v3685_v51 = vpop.eup %3684 }
 0x205   : > { %v1894_v25 = vmul.f32 %v3685_v51, %v5371_v54 }
 0x207   : > { %v1909_v6 = vmul.f32 %v5454_v1, %v1894_v25 }
 0x209   : > { %v1924_v32 = vadd.f32 %v5461_v26, %v1909_v6 }
 0x20f   : > { %v1861_v45 = vpop.xlane.xlu1 %1860 }
 0x210   : > { %v1871_v28 = vmul.f32 0.0078125, %v1861_v45 }
 0x212   : > { %v1879_v47 = vadd.f32 1e-06, %v1871_v28 }
 0x214   : > { %3686 = vrsqrt.f32 %v1879_v47 }
 0x221   : > { %v3687_v41 = vpop.eup %3686 }
 0x222   : > { %v1895_v14 = vmul.f32 %v3687_v41, %v5388_v42 }
 0x224   : > { %v1910_v19 = vmul.f32 %v5454_v1, %v1895_v14 }
 0x226   : > { %v1925_v0 = vadd.f32 %v5461_v26, %v1910_v19  ;;  %v3660_v19 = vld [vmem:[%s5915_s8 + $0x58] sm:$0xff]  }
 0x228   : > { %v1930_v11 = vpack.c.bf16 %v1925_v0, %v1924_v32  ;;  %v3662_v32 = vld [vmem:[%s5915_s8 + $0xd8] sm:$0xff]  }
 0x229   : > { %v1863_v63 = vpop.xlane.xlu0 %1862  ;;  %3554 = vmatprep.subr.bf16.mxu1 %v3662_v32 }
 0x22a   : > { %2199 = vmatmul.mubr.bf16.gmra.mxu0 %v1930_v11  ;;  %2272 = vmatmul.mubr.bf16.gmra.mxu1 %v1930_v11  ;;  %v1872_v46 = vmul.f32 0.0078125, %v1863_v63 }
 0x22b   : > { %2208 = vmatprep.mubr.bf16.mxu0 %v3765_v18  ;;  %2281 = vmatprep.mubr.bf16.mxu1 %v3765_v18 }
 0x22c   : > { %v1880_v62 = vadd.f32 1e-06, %v1872_v46 }
 0x22e   : > { %3688 = vrsqrt.f32 %v1880_v62  ;;  %v3661_v62 = vld [vmem:[%s5915_s8 + $0x18] sm:$0xff]  }
 0x23b   : > { %v3689_v23 = vpop.eup %3688 }
 0x23c   : > { %v1896_v16 = vmul.f32 %v3689_v23, %v5393_v20 }
 0x23e   : > { %v1911_v4 = vmul.f32 %v5454_v1, %v1896_v16 }
 0x23f   : > { %v1865_v54 = vpop.xlane.xlu1 %1864 }
 0x240   : > { %v1873_v30 = vmul.f32 0.0078125, %v1865_v54  ;;  %v1926_v12 = vadd.f32 %v5461_v26, %v1911_v4  ;;  %v3663_v54 = vld [vmem:[%s5915_s8 + $0x98] sm:$0xff]  }
 0x241   : > { %3555 = vmatpush3.bf16.msra.mxu1 %v3663_v54 }
 0x242   : > { %v1881_v42 = vadd.f32 1e-06, %v1873_v30 }
 0x244   : > { %3690 = vrsqrt.f32 %v1881_v42 }
 0x251   : > { %v3691_v36 = vpop.eup %3690 }
 0x252   : > { %v1897_v29 = vmul.f32 %v3691_v36, %v5410_v15  ;;  %v3653_v15 = vld [vmem:[%s5915_s8 + $0x28] sm:$0xff]   ;;  %v3664_v36 = vld [vmem:[%s5915_s8 + $0x50] sm:$0xff]  }
 0x253   : > { %3511 = vmatpush3.bf16.msra.mxu0 %v3653_v15 }
 0x254   : > { %v1912_v20 = vmul.f32 %v5454_v1, %v1897_v29  ;;  %3512 = vmatprep.subr.bf16.mxu0 %v3656_v39  ;;  %v3657_v1 = vld [vmem:[%s5915_s8 + $0x20] sm:$0xff]   ;;  %v3666_v29 = vld [vmem:[%s5915_s8 + $0xd0] sm:$0xff]  }
 0x255   : > { %3556 = vmatprep.subr.bf16.mxu1 %v3666_v29 }
 0x256   : > { %v1927_v18 = vadd.f32 %v5461_v26, %v1912_v20  ;;  %v5536_v26 = vrot.slane %v1964_v21, %v6518_v48  ;;  %v3668_v48 = vld [vmem:[%s5915_s8 + $0x48] sm:$0xff]  }
 0x257   : > { %3513 = vmatpush3.bf16.msra.mxu0 %v3657_v1 }
 0x258   : > { %v1931_v8 = vpack.c.bf16 %v1927_v18, %v1926_v12  ;;  %3514 = vmatprep.subr.bf16.mxu0 %v3660_v19  ;;  %v3665_v18 = vld [vmem:[%s5915_s8 + $0x10] sm:$0xff]  }
 0x25a   : > { %2209 = vmatmul.mubr.bf16.gmra.mxu0 %v1931_v8  ;;  %2282 = vmatmul.mubr.bf16.gmra.mxu1 %v1931_v8  ;;  %v3667_v8 = vld [vmem:[%s5915_s8 + $0x90] sm:$0xff]  }
 0x25b   : > { %3515 = vmatpush3.bf16.msra.mxu0 %v3661_v62  ;;  %3557 = vmatpush3.bf16.msra.mxu1 %v3667_v8 }
 0x25c   : > { %3516 = vmatprep.subr.bf16.mxu0 %v3664_v36  ;;  %3558 = vmatprep.subr.bf16.mxu1 %v3670_v60 }
 0x25f   : > { %3517 = vmatpush3.bf16.msra.mxu0 %v3665_v18 }
 0x260   : > { %3518 = vmatprep.subr.bf16.mxu0 %v3668_v48 }
 0x263   : > { %3519 = vmatpush3.bf16.msra.mxu0 %v3669_v13 }
 0x2a1   : > { %v2180_v10 = vpop.f32.mrf.mxu0  ;;  %v2253_v53 = vpop.f32.mrf.mxu1 }
 0x2a2   : > { %v5548_v58 = vadd.f32 %v2180_v10, %v5536_v26  ;;  %v5551_v35 = vadd.f32 %v2253_v53, %v5539_v24  ;;  %v3671_v10 = vld [vmem:[%s5915_s8 + $0x88] sm:$0xff]   ;;  %v3672_v53 = vld [vmem:[%s5915_s8 + $0x40] sm:$0xff]  }
 0x2a3   : > { %v2182_v52 = vpop.f32.mrf.mxu0  ;;  %v2255_v3 = vpop.f32.mrf.mxu1  ;;  %3559 = vmatpush3.bf16.msra.mxu1 %v3671_v10  ;;  %3520 = vmatprep.subr.bf16.mxu0 %v3672_v53 }
 0x2a4   : > { %v2292_v49 = vmul.f32 %v5548_v58, %v5548_v58  ;;  %v2294_v40 = vmul.f32 %v5551_v35, %v5551_v35  ;;  %v5558_v50 = vadd.f32 %v2182_v52, %v5542_v7  ;;  %v5561_v61 = vadd.f32 %v2255_v3, %v5545_v44 }
 0x2a5   : > { %v2184_v57 = vpop.f32.mrf.mxu0  ;;  %v2257_v9 = vpop.f32.mrf.mxu1 }
 0x2a6   : > { %v2324_v45 = vmul.f32 %v2292_v49, %v5548_v58  ;;  %v2326_v28 = vmul.f32 %v2294_v40, %v5551_v35  ;;  %v2293_v47 = vmul.f32 %v5558_v50, %v5558_v50  ;;  %v2295_v51 = vmul.f32 %v5561_v61, %v5561_v61  ;;  %v3674_v40 = vld [vmem:[%s5915_s8 + $0xc0] sm:$0xff]  }
 0x2a7   : > { %v5570_v25 = vadd.f32 %v2184_v57, %v5536_v26  ;;  %v5573_v41 = vadd.f32 %v2257_v9, %v5539_v24  ;;  %v2186_v14 = vpop.f32.mrf.mxu0  ;;  %v2259_v6 = vpop.f32.mrf.mxu1  ;;  %3560 = vmatprep.subr.bf16.mxu1 %v3674_v40 }
 0x2a8   : > { %v2356_v0 = vmul.f32 0.044715, %v2324_v45  ;;  %v2358_v11 = vmul.f32 0.044715, %v2326_v28  ;;  %v2325_v63 = vmul.f32 %v2293_v47, %v5558_v50  ;;  %v2327_v46 = vmul.f32 %v2295_v51, %v5561_v61  ;;  %v3673_v45 = vld [vmem:[%s5915_s8] sm:$0xff]  }
 0x2a9   : > { %v2296_v30 = vmul.f32 %v5570_v25, %v5570_v25  ;;  %v2298_v42 = vmul.f32 %v5573_v41, %v5573_v41  ;;  %v5594_v56 = vadd.f32 %v2186_v14, %v5542_v7  ;;  %v5597_v59 = vadd.f32 %v2259_v6, %v5545_v44  ;;  %v3675_v47 = vld [vmem:[%s5915_s8 + $0x80] sm:$0xff]   ;;  %3521 = vmatpush3.bf16.msra.mxu0 %v3673_v45 }
 0x2aa   : > { %v2388_v5 = vadd.f32 %v2356_v0, %v5548_v58  ;;  %v2390_v2 = vadd.f32 %v2358_v11, %v5551_v35  ;;  %v2357_v22 = vmul.f32 0.044715, %v2325_v63  ;;  %v2359_v23 = vmul.f32 0.044715, %v2327_v46  ;;  %3561 = vmatpush3.bf16.msra.mxu1 %v3675_v47 }
 0x2ab   : > { %v2328_v16 = vmul.f32 %v2296_v30, %v5570_v25  ;;  %v2330_v43 = vmul.f32 %v2298_v42, %v5573_v41  ;;  %v2297_v31 = vmul.f32 %v5594_v56, %v5594_v56  ;;  %v2299_v38 = vmul.f32 %v5597_v59, %v5597_v59 }
 0x2ac   : > { %v2420_v4 = vmul.f32 0.7978846, %v2388_v5  ;;  %v2422_v20 = vmul.f32 0.7978846, %v2390_v2  ;;  %v2389_v12 = vadd.f32 %v2357_v22, %v5558_v50  ;;  %v2391_v39 = vadd.f32 %v2359_v23, %v5561_v61 }
 0x2ad   : > { %v2360_v34 = vmul.f32 0.044715, %v2328_v16  ;;  %v2362_v15 = vmul.f32 0.044715, %v2330_v43  ;;  %v2329_v17 = vmul.f32 %v2297_v31, %v5594_v56  ;;  %v2331_v55 = vmul.f32 %v2299_v38, %v5597_v59 }
 0x2ae   : > { %3692 = vtanh.f32 %v2420_v4  ;;  %v2421_v1 = vmul.f32 0.7978846, %v2389_v12  ;;  %v2423_v57 = vmul.f32 0.7978846, %v2391_v39 }
 0x2af   : > { %v2392_v27 = vadd.f32 %v2360_v34, %v5570_v25  ;;  %v2394_v33 = vadd.f32 %v2362_v15, %v5573_v41  ;;  %v2361_v21 = vmul.f32 0.044715, %v2329_v17  ;;  %3694 = vtanh.f32 %v2422_v20 }
 0x2b0   : > { %v2363_v37 = vmul.f32 0.044715, %v2331_v55 }
 0x2b1   : > { %v2424_v52 = vmul.f32 0.7978846, %v2392_v27  ;;  %v2426_v3 = vmul.f32 0.7978846, %v2394_v33  ;;  %v2393_v49 = vadd.f32 %v2361_v21, %v5594_v56 }
 0x2b2   : > { %v2395_v9 = vadd.f32 %v2363_v37, %v5597_v59 }
 0x2b3   : > { %3696 = vtanh.f32 %v2424_v52  ;;  %v2425_v28 = vmul.f32 0.7978846, %v2393_v49 }
 0x2b4   : > { %3698 = vtanh.f32 %v2426_v3  ;;  %v2427_v51 = vmul.f32 0.7978846, %v2395_v9 }
 0x2b5   : > { %3700 = vtanh.f32 %v2421_v1  ;;  %v2190_v14 = vpop.f32.mrf.mxu0  ;;  %v2263_v6 = vpop.f32.mrf.mxu1 }
 0x2b6   : > { %3702 = vtanh.f32 %v2423_v57  ;;  %v5652_v19 = vadd.f32 %v2190_v14, %v5536_v26  ;;  %v5655_v32 = vadd.f32 %v2263_v6, %v5539_v24 }
 0x2b7   : > { %3704 = vtanh.f32 %v2425_v28  ;;  %v2192_v0 = vpop.f32.mrf.mxu0  ;;  %v2265_v11 = vpop.f32.mrf.mxu1 }
 0x2b8   : > { %v2300_v63 = vmul.f32 %v5652_v19, %v5652_v19  ;;  %v2302_v46 = vmul.f32 %v5655_v32, %v5655_v32  ;;  %v5662_v62 = vadd.f32 %v2192_v0, %v5542_v7  ;;  %v5665_v54 = vadd.f32 %v2265_v11, %v5545_v44 }
 0x2b9   : > { %3706 = vtanh.f32 %v2427_v51  ;;  %v2194_v30 = vpop.f32.mrf.mxu0  ;;  %v2267_v42 = vpop.f32.mrf.mxu1 }
 0x2ba   : > { %v2332_v5 = vmul.f32 %v2300_v63, %v5652_v19  ;;  %v2301_v2 = vmul.f32 %v5662_v62, %v5662_v62  ;;  %v2303_v22 = vmul.f32 %v5665_v54, %v5665_v54  ;;  %v2334_v16 = vmul.f32 %v2302_v46, %v5655_v32 }
 0x2bb   : > { %v3693_v23 = vpop.eup %3692  ;;  %v5674_v43 = vadd.f32 %v2194_v30, %v5536_v26  ;;  %v5677_v31 = vadd.f32 %v2267_v42, %v5539_v24  ;;  %v2196_v10 = vpop.f32.mrf.mxu0 }
 0x2bc   : > { %v2364_v38 = vmul.f32 0.044715, %v2332_v5  ;;  %v2333_v36 = vmul.f32 %v2301_v2, %v5662_v62  ;;  %v3695_v29 = vpop.eup %3694  ;;  %v2335_v4 = vmul.f32 %v2303_v22, %v5665_v54  ;;  %v2484_v18 = vadd.f32 1.0, %v3693_v23  ;;  %v2269_v49 = vpop.f32.mrf.mxu1 }
 0x2bd   : > { %v2304_v20 = vmul.f32 %v5674_v43, %v5674_v43  ;;  %v2306_v12 = vmul.f32 %v5677_v31, %v5677_v31  ;;  %v2366_v15 = vmul.f32 0.044715, %v2334_v16  ;;  %v2486_v27 = vadd.f32 1.0, %v3695_v29 }
 0x2be   : > { %v2396_v8 = vadd.f32 %v2364_v38, %v5652_v19  ;;  %v2365_v34 = vmul.f32 0.044715, %v2333_v36  ;;  %v2367_v17 = vmul.f32 0.044715, %v2335_v4  ;;  %v2516_v57 = vmul.f32 0.5, %v2484_v18 }
 0x2bf   : > { %v2336_v55 = vmul.f32 %v2304_v20, %v5674_v43  ;;  %v2338_v39 = vmul.f32 %v2306_v12, %v5677_v31  ;;  %v2398_v9 = vadd.f32 %v2366_v15, %v5655_v32  ;;  %v2518_v51 = vmul.f32 0.5, %v2486_v27 }
 0x2c0   : > { %v3697_v1 = vpop.eup %3696  ;;  %v2397_v33 = vadd.f32 %v2365_v34, %v5662_v62  ;;  %v2428_v60 = vmul.f32 0.7978846, %v2396_v8  ;;  %v2399_v37 = vadd.f32 %v2367_v17, %v5665_v54  ;;  %v5694_v0 = vadd.f32 %v2196_v10, %v5542_v7 }
 0x2c1   : > { %v3699_v21 = vpop.eup %3698  ;;  %v2488_v48 = vadd.f32 1.0, %v3697_v1  ;;  %v2368_v13 = vmul.f32 0.044715, %v2336_v55  ;;  %v2370_v3 = vmul.f32 0.044715, %v2338_v39  ;;  %v5697_v46 = vadd.f32 %v2269_v49, %v5545_v44 }
 0x2c2   : > { %v3701_v53 = vpop.eup %3700  ;;  %v2429_v52 = vmul.f32 0.7978846, %v2397_v33  ;;  %v2431_v45 = vmul.f32 0.7978846, %v2399_v37  ;;  %v2490_v14 = vadd.f32 1.0, %v3699_v21  ;;  %3708 = vtanh.f32 %v2428_v60 }
 0x2c3   : > { %v3703_v40 = vpop.eup %3702  ;;  %v2400_v28 = vadd.f32 %v2368_v13, %v5674_v43  ;;  %v2402_v6 = vadd.f32 %v2370_v3, %v5677_v31  ;;  %v2520_v11 = vmul.f32 0.5, %v2488_v48  ;;  %v2305_v5 = vmul.f32 %v5694_v0, %v5694_v0 }
 0x2c4   : > { %v3705_v47 = vpop.eup %3704  ;;  %3710 = vtanh.f32 %v2429_v52  ;;  %v2485_v2 = vadd.f32 1.0, %v3701_v53  ;;  %v2430_v22 = vmul.f32 0.7978846, %v2398_v9  ;;  %v2307_v23 = vmul.f32 %v5697_v46, %v5697_v46 }
 0x2c5   : > { %v2432_v63 = vmul.f32 0.7978846, %v2400_v28  ;;  %v2434_v42 = vmul.f32 0.7978846, %v2402_v6  ;;  %3712 = vtanh.f32 %v2431_v45  ;;  %v2489_v16 = vadd.f32 1.0, %v3705_v47 }
 0x2c6   : > { %v3707_v30 = vpop.eup %3706  ;;  %v2522_v38 = vmul.f32 0.5, %v2490_v14  ;;  %v2337_v36 = vmul.f32 %v2305_v5, %v5694_v0  ;;  %v2517_v29 = vmul.f32 0.5, %v2485_v2  ;;  %v2339_v4 = vmul.f32 %v2307_v23, %v5697_v46 }
 0x2c7   : > { %3714 = vtanh.f32 %v2432_v63  ;;  %v2521_v20 = vmul.f32 0.5, %v2489_v16  ;;  %v2487_v12 = vadd.f32 1.0, %v3703_v40  ;;  %v2491_v18 = vadd.f32 1.0, %v3707_v30 }
 0x2c8   : > { %v2552_v8 = vmul.f32 %v2520_v11, %v5570_v25  ;;  %3716 = vtanh.f32 %v2434_v42  ;;  %v2369_v34 = vmul.f32 0.044715, %v2337_v36  ;;  %v2549_v15 = vmul.f32 %v2517_v29, %v5558_v50 }
 0x2c9   : > { %v2371_v17 = vmul.f32 0.044715, %v2339_v4  ;;  %v2553_v55 = vmul.f32 %v2521_v20, %v5594_v56  ;;  %v2519_v39 = vmul.f32 0.5, %v2487_v12  ;;  %v2523_v1 = vmul.f32 0.5, %v2491_v18 }
 0x2ca   : > { %v2548_v27 = vmul.f32 %v2516_v57, %v5548_v58  ;;  %v2554_v33 = vmul.f32 %v2522_v38, %v5573_v41  ;;  %3718 = vtanh.f32 %v2430_v22  ;;  %v2401_v21 = vadd.f32 %v2369_v34, %v5694_v0 }
 0x2cb   : > { %v2403_v48 = vadd.f32 %v2371_v17, %v5697_v46  ;;  %v2581_v60 = vpack.c.bf16 %v2553_v55, %v2549_v15  ;;  %v2551_v25 = vmul.f32 %v2519_v39, %v5561_v61  ;;  %v2555_v37 = vmul.f32 %v2523_v1, %v5597_v59 }
 0x2cc   : > { %v2550_v50 = vmul.f32 %v2518_v51, %v5551_v35  ;;  %v2580_v13 = vpack.c.bf16 %v2552_v8, %v2548_v27  ;;  %v2433_v56 = vmul.f32 0.7978846, %v2401_v21 }
 0x2cd   : > { %v2435_v10 = vmul.f32 0.7978846, %v2403_v48  ;;  %2891 = vmatprep.mubr.bf16.mxu0 %v2581_v60  ;;  %v2583_v53 = vpack.c.bf16 %v2555_v37, %v2551_v25 }
 0x2ce   : > { %v2582_v58 = vpack.c.bf16 %v2554_v33, %v2550_v50  ;;  %3720 = vtanh.f32 %v2433_v56  ;;  %2892 = vmatmul.mubr.bf16.vlgmr.msra.gmra.mxu0 %v2580_v13 }
 0x2cf   : > { %3722 = vtanh.f32 %v2435_v10  ;;  %2956 = vmatprep.mubr.bf16.mxu1 %v2583_v53  ;;  %v3709_v41 = vpop.eup %3708 }
 0x2d0   : > { %2957 = vmatmul.mubr.bf16.vlgmr.msra.gmra.mxu1 %v2582_v58  ;;  %v2492_v45 = vadd.f32 1.0, %v3709_v41 }
 0x2d1   : > { %v3711_v52 = vpop.eup %3710 }
 0x2d2   : > { %v3713_v3 = vpop.eup %3712  ;;  %v2493_v57 = vadd.f32 1.0, %v3711_v52  ;;  %v2524_v5 = vmul.f32 0.5, %v2492_v45 }
 0x2d3   : > { %v2495_v9 = vadd.f32 1.0, %v3713_v3 }
 0x2d4   : > { %v3715_v49 = vpop.eup %3714  ;;  %v2525_v11 = vmul.f32 0.5, %v2493_v57  ;;  %v2556_v12 = vmul.f32 %v2524_v5, %v5652_v19 }
 0x2d5   : > { %v3717_v61 = vpop.eup %3716  ;;  %v2496_v59 = vadd.f32 1.0, %v3715_v49  ;;  %v2527_v42 = vmul.f32 0.5, %v2495_v9 }
 0x2d6   : > { %v2498_v35 = vadd.f32 1.0, %v3717_v61  ;;  %v2557_v38 = vmul.f32 %v2525_v11, %v5662_v62 }
 0x2d7   : > { %v3719_v40 = vpop.eup %3718  ;;  %v2528_v51 = vmul.f32 0.5, %v2496_v59  ;;  %v2559_v4 = vmul.f32 %v2527_v42, %v5665_v54 }
 0x2d8   : > { %v2494_v28 = vadd.f32 1.0, %v3719_v40  ;;  %v2530_v63 = vmul.f32 0.5, %v2498_v35 }
 0x2d9   : > { %v2560_v16 = vmul.f32 %v2528_v51, %v5674_v43 }
 0x2da   : > { %v2526_v22 = vmul.f32 0.5, %v2494_v28  ;;  %v2562_v29 = vmul.f32 %v2530_v63, %v5677_v31 }
 0x2db   : > { %v3721_v47 = vpop.eup %3720  ;;  %v2584_v15 = vpack.c.bf16 %v2560_v16, %v2556_v12 }
 0x2dc   : > { %v3723_v14 = vpop.eup %3722  ;;  %v2497_v6 = vadd.f32 1.0, %v3721_v47  ;;  %v2558_v8 = vmul.f32 %v2526_v22, %v5655_v32 }
 0x2dd   : > { %v2499_v30 = vadd.f32 1.0, %v3723_v14 }
 0x2de   : > { %v2529_v2 = vmul.f32 0.5, %v2497_v6  ;;  %v2586_v17 = vpack.c.bf16 %v2562_v29, %v2558_v8 }
 0x2df   : > { %v2531_v23 = vmul.f32 0.5, %v2499_v30 }
 0x2e0   : > { %v2561_v36 = vmul.f32 %v2529_v2, %v5694_v0 }
 0x2e1   : > { %v2563_v20 = vmul.f32 %v2531_v23, %v5697_v46 }
 0x2e2   : > { %v2585_v18 = vpack.c.bf16 %v2561_v36, %v2557_v38 }
 0x2e3   : > { %v2587_v34 = vpack.c.bf16 %v2563_v20, %v2559_v4 }
 0x2e4   : > { %2899 = vmatprep.mubr.bf16.mxu0 %v2585_v18 }
 0x2e5   : > { %2964 = vmatprep.mubr.bf16.mxu1 %v2587_v34  ;;  %2900 = vmatmul.mubr.bf16.gmra.mxu0 %v2584_v15 }
 0x2e6   : > { %2965 = vmatmul.mubr.bf16.gmra.mxu1 %v2586_v17 }
 0x2ea   : > { %v2200_v62 = vpop.f32.mrf.mxu0  ;;  %v2273_v43 = vpop.f32.mrf.mxu1 }
 0x2eb   : > { %v5724_v31 = vadd.f32 %v2200_v62, %v5536_v26  ;;  %v5727_v54 = vadd.f32 %v2273_v43, %v5539_v24 }
 0x2ec   : > { %v2202_v0 = vpop.f32.mrf.mxu0  ;;  %v2275_v19 = vpop.f32.mrf.mxu1 }
 0x2ed   : > { %v2308_v32 = vmul.f32 %v5724_v31, %v5724_v31  ;;  %v2310_v46 = vmul.f32 %v5727_v54, %v5727_v54  ;;  %v5734_v55 = vadd.f32 %v2202_v0, %v5542_v7  ;;  %v5737_v39 = vadd.f32 %v2275_v19, %v5545_v44 }
 0x2ee   : > { %v2204_v1 = vpop.f32.mrf.mxu0  ;;  %v2277_v27 = vpop.f32.mrf.mxu1 }
 0x2ef   : > { %v2340_v33 = vmul.f32 %v2308_v32, %v5724_v31  ;;  %v2342_v21 = vmul.f32 %v2310_v46, %v5727_v54  ;;  %v2309_v48 = vmul.f32 %v5734_v55, %v5734_v55  ;;  %v2311_v60 = vmul.f32 %v5737_v39, %v5737_v39 }
 0x2f0   : > { %v5746_v25 = vadd.f32 %v2204_v1, %v5536_v26  ;;  %v5749_v37 = vadd.f32 %v2277_v27, %v5539_v24  ;;  %v2206_v50 = vpop.f32.mrf.mxu0  ;;  %v2279_v13 = vpop.f32.mrf.mxu1 }
 0x2f1   : > { %v2372_v56 = vmul.f32 0.044715, %v2340_v33  ;;  %v2374_v10 = vmul.f32 0.044715, %v2342_v21  ;;  %v2341_v53 = vmul.f32 %v2309_v48, %v5734_v55  ;;  %v2343_v58 = vmul.f32 %v2311_v60, %v5737_v39 }
 0x2f2   : > { %v2312_v41 = vmul.f32 %v5746_v25, %v5746_v25  ;;  %v2314_v52 = vmul.f32 %v5749_v37, %v5749_v37  ;;  %v5758_v3 = vadd.f32 %v2206_v50, %v5542_v7  ;;  %v5761_v49 = vadd.f32 %v2279_v13, %v5545_v44 }
 0x2f3   : > { %v2404_v61 = vadd.f32 %v2372_v56, %v5724_v31  ;;  %v2406_v40 = vadd.f32 %v2374_v10, %v5727_v54  ;;  %v2373_v59 = vmul.f32 0.044715, %v2341_v53  ;;  %v2375_v57 = vmul.f32 0.044715, %v2343_v58 }
 0x2f4   : > { %v2344_v35 = vmul.f32 %v2312_v41, %v5746_v25  ;;  %v2346_v9 = vmul.f32 %v2314_v52, %v5749_v37  ;;  %v2313_v45 = vmul.f32 %v5758_v3, %v5758_v3  ;;  %v2315_v28 = vmul.f32 %v5761_v49, %v5761_v49 }
 0x2f5   : > { %v2436_v47 = vmul.f32 0.7978846, %v2404_v61  ;;  %v2438_v51 = vmul.f32 0.7978846, %v2406_v40  ;;  %v2405_v14 = vadd.f32 %v2373_v59, %v5734_v55  ;;  %v2407_v6 = vadd.f32 %v2375_v57, %v5737_v39 }
 0x2f6   : > { %v2376_v11 = vmul.f32 0.044715, %v2344_v35  ;;  %v2378_v63 = vmul.f32 0.044715, %v2346_v9  ;;  %v2345_v30 = vmul.f32 %v2313_v45, %v5758_v3  ;;  %v2347_v42 = vmul.f32 %v2315_v28, %v5761_v49 }
 0x2f7   : > { %3724 = vtanh.f32 %v2436_v47  ;;  %v2437_v5 = vmul.f32 0.7978846, %v2405_v14  ;;  %v2439_v2 = vmul.f32 0.7978846, %v2407_v6 }
 0x2f8   : > { %3726 = vtanh.f32 %v2438_v51  ;;  %v2408_v22 = vadd.f32 %v2376_v11, %v5746_v25  ;;  %v2410_v23 = vadd.f32 %v2378_v63, %v5749_v37  ;;  %v2377_v16 = vmul.f32 0.044715, %v2345_v30 }
 0x2f9   : > { %3728 = vtanh.f32 %v2437_v5  ;;  %v2379_v38 = vmul.f32 0.044715, %v2347_v42 }
 0x2fa   : > { %3730 = vtanh.f32 %v2439_v2  ;;  %v2440_v36 = vmul.f32 0.7978846, %v2408_v22  ;;  %v2442_v29 = vmul.f32 0.7978846, %v2410_v23  ;;  %v2409_v4 = vadd.f32 %v2377_v16, %v5758_v3 }
 0x2fb   : > { %v2411_v20 = vadd.f32 %v2379_v38, %v5761_v49 }
 0x2fc   : > { %3732 = vtanh.f32 %v2440_v36  ;;  %v2441_v12 = vmul.f32 0.7978846, %v2409_v4 }
 0x2fd   : > { %3734 = vtanh.f32 %v2442_v29  ;;  %v2443_v18 = vmul.f32 0.7978846, %v2411_v20 }
 0x2fe   : > { %3736 = vtanh.f32 %v2441_v12 }
 0x2ff   : > { %3738 = vtanh.f32 %v2443_v18 }
 0x304   : > { %v3725_v8 = vpop.eup %3724 }
 0x305   : > { %v3727_v34 = vpop.eup %3726  ;;  %v2500_v19 = vadd.f32 1.0, %v3725_v8 }
 0x306   : > { %v3729_v15 = vpop.eup %3728  ;;  %v2502_v1 = vadd.f32 1.0, %v3727_v34 }
 0x307   : > { %v3731_v17 = vpop.eup %3730  ;;  %v2501_v62 = vadd.f32 1.0, %v3729_v15  ;;  %v2532_v10 = vmul.f32 0.5, %v2500_v19 }
 0x308   : > { %v2503_v0 = vadd.f32 1.0, %v3731_v17  ;;  %v2534_v41 = vmul.f32 0.5, %v2502_v1 }
 0x309   : > { %v3733_v43 = vpop.eup %3732  ;;  %v2533_v60 = vmul.f32 0.5, %v2501_v62  ;;  %v2564_v45 = vmul.f32 %v2532_v10, %v5724_v31 }
 0x30a   : > { %v3735_v32 = vpop.eup %3734  ;;  %v2504_v46 = vadd.f32 1.0, %v3733_v43  ;;  %v2535_v56 = vmul.f32 0.5, %v2503_v0  ;;  %v2566_v47 = vmul.f32 %v2534_v41, %v5727_v54 }
 0x30b   : > { %v3737_v27 = vpop.eup %3736  ;;  %v2506_v33 = vadd.f32 1.0, %v3735_v32  ;;  %v2565_v40 = vmul.f32 %v2533_v60, %v5734_v55 }
 0x30c   : > { %v3739_v21 = vpop.eup %3738  ;;  %v2505_v48 = vadd.f32 1.0, %v3737_v27  ;;  %v2536_v50 = vmul.f32 0.5, %v2504_v46  ;;  %v2567_v35 = vmul.f32 %v2535_v56, %v5737_v39 }
 0x30d   : > { %v2507_v13 = vadd.f32 1.0, %v3739_v21  ;;  %v2538_v53 = vmul.f32 0.5, %v2506_v33 }
 0x30e   : > { %v2537_v58 = vmul.f32 0.5, %v2505_v48  ;;  %v2568_v61 = vmul.f32 %v2536_v50, %v5746_v25 }
 0x30f   : > { %v2539_v52 = vmul.f32 0.5, %v2507_v13  ;;  %v2570_v57 = vmul.f32 %v2538_v53, %v5749_v37 }
 0x310   : > { %v2569_v59 = vmul.f32 %v2537_v58, %v5758_v3  ;;  %v2588_v14 = vpack.c.bf16 %v2568_v61, %v2564_v45 }
 0x311   : > { %v2571_v9 = vmul.f32 %v2539_v52, %v5761_v49  ;;  %v2590_v6 = vpack.c.bf16 %v2570_v57, %v2566_v47 }
 0x312   : > { %v2589_v28 = vpack.c.bf16 %v2569_v59, %v2565_v40 }
 0x313   : > { %v2591_v51 = vpack.c.bf16 %v2571_v9, %v2567_v35 }
 0x314   : > { %2907 = vmatprep.mubr.bf16.mxu0 %v2589_v28 }
 0x315   : > { %2972 = vmatprep.mubr.bf16.mxu1 %v2591_v51  ;;  %2908 = vmatmul.mubr.bf16.gmra.mxu0 %v2588_v14 }
 0x316   : > { %2973 = vmatmul.mubr.bf16.gmra.mxu1 %v2590_v6 }
 0x31a   : > { %v2210_v55 = vpop.f32.mrf.mxu0  ;;  %v2283_v25 = vpop.f32.mrf.mxu1 }
 0x31b   : > { %v5788_v37 = vadd.f32 %v2210_v55, %v5536_v26  ;;  %v5791_v39 = vadd.f32 %v2283_v25, %v5539_v24 }
 0x31c   : > { %v2212_v3 = vpop.f32.mrf.mxu0  ;;  %v2285_v31 = vpop.f32.mrf.mxu1 }
 0x31d   : > { %v2316_v54 = vmul.f32 %v5788_v37, %v5788_v37  ;;  %v2318_v49 = vmul.f32 %v5791_v39, %v5791_v39  ;;  %v5798_v11 = vadd.f32 %v2212_v3, %v5542_v7  ;;  %v5801_v63 = vadd.f32 %v2285_v31, %v5545_v44 }
 0x31e   : > { %v2214_v30 = vpop.f32.mrf.mxu0  ;;  %v2287_v42 = vpop.f32.mrf.mxu1 }
 0x31f   : > { %v2348_v5 = vmul.f32 %v2316_v54, %v5788_v37  ;;  %v2350_v2 = vmul.f32 %v2318_v49, %v5791_v39  ;;  %v2317_v22 = vmul.f32 %v5798_v11, %v5798_v11  ;;  %v2319_v23 = vmul.f32 %v5801_v63, %v5801_v63 }
 0x320   : > { %v5810_v16 = vadd.f32 %v2214_v30, %v5536_v26  ;;  %v5813_v38 = vadd.f32 %v2287_v42, %v5539_v24  ;;  %v2216_v36 = vpop.f32.mrf.mxu0  ;;  %v2289_v29 = vpop.f32.mrf.mxu1 }
 0x321   : > { %v2380_v4 = vmul.f32 0.044715, %v2348_v5  ;;  %v2382_v20 = vmul.f32 0.044715, %v2350_v2  ;;  %v2349_v12 = vmul.f32 %v2317_v22, %v5798_v11  ;;  %v2351_v18 = vmul.f32 %v2319_v23, %v5801_v63 }
 0x322   : > { %v2320_v8 = vmul.f32 %v5810_v16, %v5810_v16  ;;  %v2322_v34 = vmul.f32 %v5813_v38, %v5813_v38  ;;  %v5822_v26 = vadd.f32 %v2216_v36, %v5542_v7  ;;  %v5825_v24 = vadd.f32 %v2289_v29, %v5545_v44 }
 0x323   : > { %v2412_v15 = vadd.f32 %v2380_v4, %v5788_v37  ;;  %v2414_v17 = vadd.f32 %v2382_v20, %v5791_v39  ;;  %v2381_v62 = vmul.f32 0.044715, %v2349_v12  ;;  %v2383_v43 = vmul.f32 0.044715, %v2351_v18 }
 0x324   : > { %v2352_v0 = vmul.f32 %v2320_v8, %v5810_v16  ;;  %v2354_v19 = vmul.f32 %v2322_v34, %v5813_v38  ;;  %v2321_v32 = vmul.f32 %v5822_v26, %v5822_v26  ;;  %v2323_v7 = vmul.f32 %v5825_v24, %v5825_v24 }
 0x325   : > { %v2444_v46 = vmul.f32 0.7978846, %v2412_v15  ;;  %v2446_v1 = vmul.f32 0.7978846, %v2414_v17  ;;  %v2413_v44 = vadd.f32 %v2381_v62, %v5798_v11  ;;  %v2415_v27 = vadd.f32 %v2383_v43, %v5801_v63 }
 0x326   : > { %v2384_v33 = vmul.f32 0.044715, %v2352_v0  ;;  %v2386_v21 = vmul.f32 0.044715, %v2354_v19  ;;  %v2353_v48 = vmul.f32 %v2321_v32, %v5822_v26  ;;  %v2355_v60 = vmul.f32 %v2323_v7, %v5825_v24 }
 0x327   : > { %3740 = vtanh.f32 %v2444_v46  ;;  %v2445_v50 = vmul.f32 0.7978846, %v2413_v44  ;;  %v2447_v13 = vmul.f32 0.7978846, %v2415_v27 }
 0x328   : > { %3742 = vtanh.f32 %v2446_v1  ;;  %v2416_v56 = vadd.f32 %v2384_v33, %v5810_v16  ;;  %v2418_v10 = vadd.f32 %v2386_v21, %v5813_v38  ;;  %v2385_v53 = vmul.f32 0.044715, %v2353_v48  ;;  %v5866_v1 = vld [vmem:[%s5917_s10] ss:$0 sm:$0xff] }
 0x329   : > { %3744 = vtanh.f32 %v2445_v50  ;;  %v2387_v58 = vmul.f32 0.044715, %v2355_v60  ;;  %v1801_v48 = vld [vmem:[%s5861_s27] sm:$0xff] }
 0x32a   : > { %3746 = vtanh.f32 %v2447_v13  ;;  %v2448_v41 = vmul.f32 0.7978846, %v2416_v56  ;;  %v2450_v52 = vmul.f32 0.7978846, %v2418_v10  ;;  %v2417_v61 = vadd.f32 %v2385_v53, %v5822_v26 }
 0x32b   : > { %v2419_v40 = vadd.f32 %v2387_v58, %v5825_v24  ;;  %v1802_v58 = vld [vmem:[%s5861_s27 + $0x8] sm:$0xff] }
 0x32c   : > { %3748 = vtanh.f32 %v2448_v41  ;;  %v2449_v59 = vmul.f32 0.7978846, %v2417_v61 }
 0x32d   : > { %3750 = vtanh.f32 %v2450_v52  ;;  %v2451_v57 = vmul.f32 0.7978846, %v2419_v40 }
 0x32e   : > { %3752 = vtanh.f32 %v2449_v59 }
 0x32f   : > { %3754 = vtanh.f32 %v2451_v57 }
 0x334   : > { %v3741_v35 = vpop.eup %3740 }
 0x335   : > { %v3743_v9 = vpop.eup %3742  ;;  %v2508_v6 = vadd.f32 1.0, %v3741_v35 }
 0x336   : > { %v3745_v45 = vpop.eup %3744  ;;  %v2510_v3 = vadd.f32 1.0, %v3743_v9 }
 0x337   : > { %v3747_v28 = vpop.eup %3746  ;;  %v2509_v47 = vadd.f32 1.0, %v3745_v45  ;;  %v2540_v23 = vmul.f32 0.5, %v2508_v6 }
 0x338   : > { %v2511_v14 = vadd.f32 1.0, %v3747_v28  ;;  %v2542_v4 = vmul.f32 0.5, %v2510_v3 }
 0x339   : > { %v3749_v51 = vpop.eup %3748  ;;  %v2541_v42 = vmul.f32 0.5, %v2509_v47  ;;  %v2572_v62 = vmul.f32 %v2540_v23, %v5788_v37 }
 0x33a   : > { %v3751_v55 = vpop.eup %3750  ;;  %v2512_v25 = vadd.f32 1.0, %v3749_v51  ;;  %v2543_v22 = vmul.f32 0.5, %v2511_v14  ;;  %v2574_v0 = vmul.f32 %v2542_v4, %v5791_v39 }
 0x33b   : > { %v3753_v31 = vpop.eup %3752  ;;  %v2514_v54 = vadd.f32 1.0, %v3751_v55  ;;  %v2573_v18 = vmul.f32 %v2541_v42, %v5798_v11  ;;  %v1804_v42 = vld [vmem:[%s5861_s27 + $0x18] sm:$0xff] }
 0x33c   : > { %v3755_v49 = vpop.eup %3754  ;;  %v2513_v30 = vadd.f32 1.0, %v3753_v31  ;;  %v2544_v5 = vmul.f32 0.5, %v2512_v25  ;;  %v2575_v15 = vmul.f32 %v2543_v22, %v5801_v63  ;;  %v5854_v63 = vld [vmem:[%s5916_s9] ss:$0 sm:$0xff]  ;;  %v1803_v25 = vld [vmem:[%s5861_s27 + $0x10] sm:$0xff] }
 0x33d   : > { %v2515_v2 = vadd.f32 1.0, %v3755_v49  ;;  %v2546_v36 = vmul.f32 0.5, %v2514_v54 }
 0x33e   : > { %v2545_v29 = vmul.f32 0.5, %v2513_v30  ;;  %v2576_v12 = vmul.f32 %v2544_v5, %v5810_v16 }
 0x33f   : > { %v2547_v20 = vmul.f32 0.5, %v2515_v2  ;;  %v2578_v34 = vmul.f32 %v2546_v36, %v5813_v38 }
 0x340   : > { %v2577_v8 = vmul.f32 %v2545_v29, %v5822_v26  ;;  %v2592_v32 = vpack.c.bf16 %v2576_v12, %v2572_v62 }
 0x341   : > { %v2579_v17 = vmul.f32 %v2547_v20, %v5825_v24  ;;  %v2594_v16 = vpack.c.bf16 %v2578_v34, %v2574_v0 }
 0x342   : > { %v2593_v43 = vpack.c.bf16 %v2577_v8, %v2573_v18 }
 0x343   : > { %v2595_v19 = vpack.c.bf16 %v2579_v17, %v2575_v15 }
 0x344   : > { %2915 = vmatprep.mubr.bf16.mxu0 %v2593_v43  ;;  %v1805_v43 = vld [vmem:[%s5861_s27 + $0x20] sm:$0xff] }
 0x345   : > { %2980 = vmatprep.mubr.bf16.mxu1 %v2595_v19  ;;  %2916 = vmatmul.mubr.bf16.gmra.mxu0 %v2592_v32 }
 0x346   : > { %2981 = vmatmul.mubr.bf16.gmra.mxu1 %v2594_v16 }
 0x38e   : > { %v3522_v11 = vpop.f32.mrf.mxu0 }
 0x390   : > { %v3562_v26 = vpop.f32.mrf.mxu1  ;;  %v3523_v38 = vpop.f32.mrf.mxu0 }
 0x391   : > { %v3524_v37 = vadd.f32 %v3523_v38, %v3522_v11 }
 0x392   : > { %v3563_v24 = vpop.f32.mrf.mxu1  ;;  %v3525_v7 = vpop.f32.mrf.mxu0 }
 0x393   : > { %v2894_v39 = vadd.f32 %v3524_v37, %v5854_v63  ;;  %v3564_v46 = vadd.f32 %v3563_v24, %v3562_v26  ;;  %v1806_v26 = vld [vmem:[%s5861_s27 + $0x28] sm:$0xff] }
 0x394   : > { %v3565_v44 = vpop.f32.mrf.mxu1  ;;  %v3526_v27 = vpop.f32.mrf.mxu0 }
 0x395   : > { %v2959_v33 = vadd.f32 %v3564_v46, %v2894_v39  ;;  %v3527_v21 = vadd.f32 %v3526_v27, %v3525_v7 }
 0x396   : > { %v3566_v60 = vpop.f32.mrf.mxu1 }
 0x397   : > { %v2996_v50 = vmul.f32 %v5866_v1, %v2959_v33  ;;  %v2897_v13 = vadd.f32 %v3527_v21, %v5854_v63  ;;  %v3567_v56 = vadd.f32 %v3566_v60, %v3565_v44 }
 0x399   : > { %v3004_v10 = vadd.f32 %v2996_v50, %v1801_v48  ;;  %v2962_v53 = vadd.f32 %v3567_v56, %v2897_v13 }
 0x39b   : > { %3012 = vst [vmem:[%s5874_s12] sm:$0xff] %v3004_v10  ;;  %v2997_v41 = vmul.f32 %v5866_v1, %v2962_v53  ;;  %v1807_v10 = vld [vmem:[%s5861_s27 + $0x30] sm:$0xff] }
 0x39d   : > { %v3005_v52 = vadd.f32 %v2997_v41, %v1802_v58 }
 0x39f   : > { %3013 = vst [vmem:[%s5874_s12 + $0x8] sm:$0xff] %v3005_v52 }
 0x3a5   : > { %v3528_v61 = vpop.f32.mrf.mxu0 }
 0x3a6   : > { %v3568_v40 = vpop.f32.mrf.mxu1 }
 0x3a7   : > { %v3529_v59 = vpop.f32.mrf.mxu0 }
 0x3a8   : > { %v3530_v57 = vadd.f32 %v3529_v59, %v3528_v61  ;;  %v3569_v35 = vpop.f32.mrf.mxu1 }
 0x3a9   : > { %v3531_v9 = vpop.f32.mrf.mxu0  ;;  %v3570_v28 = vadd.f32 %v3569_v35, %v3568_v40  ;;  %v1808_v40 = vld [vmem:[%s5861_s27 + $0x38] sm:$0xff] }
 0x3aa   : > { %v2902_v45 = vadd.f32 %v3530_v57, %v5854_v63  ;;  %v3571_v47 = vpop.f32.mrf.mxu1 }
 0x3ab   : > { %v3532_v51 = vpop.f32.mrf.mxu0 }
 0x3ac   : > { %v2967_v14 = vadd.f32 %v3570_v28, %v2902_v45  ;;  %v3533_v6 = vadd.f32 %v3532_v51, %v3531_v9  ;;  %v3572_v55 = vpop.f32.mrf.mxu1 }
 0x3ad   : > { %v3573_v54 = vadd.f32 %v3572_v55, %v3571_v47 }
 0x3ae   : > { %v2998_v3 = vmul.f32 %v5866_v1, %v2967_v14  ;;  %v2905_v31 = vadd.f32 %v3533_v6, %v5854_v63 }
 0x3b0   : > { %v3006_v49 = vadd.f32 %v2998_v3, %v1803_v25  ;;  %v2970_v30 = vadd.f32 %v3573_v54, %v2905_v31 }
 0x3b2   : > { %3014 = vst [vmem:[%s5874_s12 + $0x10] sm:$0xff] %v3006_v49  ;;  %v2999_v5 = vmul.f32 %v5866_v1, %v2970_v30 }
 0x3b4   : > { %v3007_v2 = vadd.f32 %v2999_v5, %v1804_v42 }
 0x3b6   : > { %3015 = vst [vmem:[%s5874_s12 + $0x18] sm:$0xff] %v3007_v2 }
 0x3d5   : > { %v3534_v22 = vpop.f32.mrf.mxu0 }
 0x3d6   : > { %v3574_v23 = vpop.f32.mrf.mxu1 }
 0x3d7   : > { %v3535_v36 = vpop.f32.mrf.mxu0 }
 0x3d8   : > { %v3536_v29 = vadd.f32 %v3535_v36, %v3534_v22  ;;  %v3575_v4 = vpop.f32.mrf.mxu1 }
 0x3d9   : > { %v3537_v20 = vpop.f32.mrf.mxu0  ;;  %v3576_v18 = vadd.f32 %v3575_v4, %v3574_v23 }
 0x3da   : > { %v2910_v12 = vadd.f32 %v3536_v29, %v5854_v63  ;;  %v3577_v8 = vpop.f32.mrf.mxu1 }
 0x3db   : > { %v3538_v34 = vpop.f32.mrf.mxu0 }
 0x3dc   : > { %v2975_v15 = vadd.f32 %v3576_v18, %v2910_v12  ;;  %v3539_v17 = vadd.f32 %v3538_v34, %v3537_v20  ;;  %v3578_v62 = vpop.f32.mrf.mxu1 }
 0x3dd   : > { %v3579_v32 = vadd.f32 %v3578_v62, %v3577_v8 }
 0x3de   : > { %v3000_v0 = vmul.f32 %v5866_v1, %v2975_v15  ;;  %v2913_v19 = vadd.f32 %v3539_v17, %v5854_v63 }
 0x3e0   : > { %v3008_v16 = vadd.f32 %v3000_v0, %v1805_v43  ;;  %v2978_v11 = vadd.f32 %v3579_v32, %v2913_v19 }
 0x3e2   : > { %3016 = vst [vmem:[%s5874_s12 + $0x20] sm:$0xff] %v3008_v16  ;;  %v3001_v38 = vmul.f32 %v5866_v1, %v2978_v11 }
 0x3e4   : > { %v3009_v37 = vadd.f32 %v3001_v38, %v1806_v26 }
 0x3e6   : > { %3017 = vst [vmem:[%s5874_s12 + $0x28] sm:$0xff] %v3009_v37 }
 0x405   : > { %v3540_v24 = vpop.f32.mrf.mxu0 }
 0x406   : > { %v3580_v7 = vpop.f32.mrf.mxu1 }
 0x407   : > { %v3541_v39 = vpop.f32.mrf.mxu0 }
 0x408   : > { %v3542_v46 = vadd.f32 %v3541_v39, %v3540_v24  ;;  %v3581_v44 = vpop.f32.mrf.mxu1 }
 0x409   : > { %v3543_v27 = vpop.f32.mrf.mxu0  ;;  %v3582_v21 = vadd.f32 %v3581_v44, %v3580_v7 }
 0x40a   : > { %v2918_v33 = vadd.f32 %v3542_v46, %v5854_v63  ;;  %v3583_v48 = vpop.f32.mrf.mxu1 }
 0x40b   : > { %v3544_v60 = vpop.f32.mrf.mxu0 }
 0x40c   : > { %v2983_v50 = vadd.f32 %v3582_v21, %v2918_v33  ;;  %v3545_v13 = vadd.f32 %v3544_v60, %v3543_v27  ;;  %v3584_v56 = vpop.f32.mrf.mxu1 }
 0x40d   : > { %v3585_v41 = vadd.f32 %v3584_v56, %v3583_v48 }
 0x40e   : > { %v3002_v53 = vmul.f32 %v5866_v1, %v2983_v50  ;;  %v2921_v58 = vadd.f32 %v3545_v13, %v5854_v63 }
 0x410   : > { %v3010_v52 = vadd.f32 %v3002_v53, %v1807_v10  ;;  %v2986_v61 = vadd.f32 %v3585_v41, %v2921_v58 }
 0x412   : > { %3018 = vst [vmem:[%s5874_s12 + $0x30] sm:$0xff] %v3010_v52  ;;  %v3003_v59 = vmul.f32 %v5866_v1, %v2986_v61 }
 0x414   : > { %v3011_v57 = vadd.f32 %v3003_v59, %v1808_v40 }
 0x416   : > { %3019 = vst [vmem:[%s5874_s12 + $0x38] sm:$0xff] %v3011_v57 }
 0x417 PF: > { %s21_s17 = sadd.s32 1, %s3763_s17  }
 0x418   : > { %p18_p4 = scmp.ge.s32.totalorder %s21_s17, 4  }
 0x41a   :  { %20 = sbr.rel (!%p18_p4) target bundleno = 1 (0x1), region = 103 }

</bundles_post_ra>
